<compile_context>
chip_gen: v7x
topology: tpu7x:2x2x1
jax: 0.10.0
libtpu: 0.0.40
codegen_flags: <defaults>
</compile_context>

<pallas_src>
import functools
import math

import jax
import jax.numpy as jnp
from jax import lax
from jax.experimental import pallas as pl
from jax.experimental.pallas import tpu as pltpu

F32 = jnp.float32
BF16 = jnp.bfloat16
VMEM = pl.BlockSpec(memory_space=pltpu.MemorySpace.VMEM)


# --------------------------- small helpers -----------------------------------

def _nbytes(a):
    return int(math.prod(a.shape)) * jnp.dtype(a.dtype).itemsize


def _ln(x, g, b):
    """LayerNorm over the last dim (f32 in, f32 out)."""
    mu = jnp.mean(x, axis=-1, keepdims=True)
    xc = x - mu
    var = jnp.mean(xc * xc, axis=-1, keepdims=True)
    return xc * lax.rsqrt(var + 1e-5) * g + b


def _mm(a, b):
    """bf16 x bf16 MXU matmul with f32 accumulation."""
    return jnp.dot(a.astype(BF16), b.astype(BF16), preferred_element_type=F32)


def _mm_t(a, b):
    """a @ b.T (contraction on the last dim of both) without materializing b.T."""
    return lax.dot_general(a.astype(BF16), b.astype(BF16),
                           (((1,), (1,)), ((), ())),
                           preferred_element_type=F32)


# --------------------------- small standalone kernels ------------------------

def _matmul_kernel(a_ref, w_ref, o_ref):
    o_ref[...] = _mm(a_ref[...], w_ref[...]).astype(o_ref.dtype)


def _matmul_bias_kernel(a_ref, w_ref, b_ref, o_ref):
    o_ref[...] = (_mm(a_ref[...], w_ref[...]) + b_ref[...]).astype(o_ref.dtype)


def pallas_linear(a, w, b=None):
    """(M, K) @ (K, N) [+ bias].  bf16 activations at the call boundary."""
    M = a.shape[0]
    N = w.shape[1]
    out = jax.ShapeDtypeStruct((M, N), F32)
    if b is None:                       # no synthesized zero bias / extra DMA
        return pl.pallas_call(
            _matmul_kernel, out_shape=out,
            in_specs=[VMEM, VMEM], out_specs=VMEM,
        )(a.astype(BF16), w.astype(BF16))
    return pl.pallas_call(
        _matmul_bias_kernel, out_shape=out,
        in_specs=[VMEM, VMEM, VMEM], out_specs=VMEM,
    )(a.astype(BF16), w.astype(BF16), b.reshape(1, N).astype(F32))


def _post_kernel(x_ref, g_ref, b_ref, w_ref, o_ref):
    # LayerNorm -> projection -> L2 normalize, fused in one kernel.
    x = _ln(x_ref[...].astype(F32), g_ref[...], b_ref[...])
    y = _mm(x, w_ref[...])
    o_ref[...] = (y * lax.rsqrt(jnp.sum(y * y, axis=-1, keepdims=True) + 1e-12)
                  ).astype(o_ref.dtype)


def pallas_post_project(x, gamma, beta, w):
    M = x.shape[0]
    N = w.shape[1]
    return pl.pallas_call(
        _post_kernel,
        out_shape=jax.ShapeDtypeStruct((M, N), F32),
        in_specs=[VMEM, VMEM, VMEM, VMEM], out_specs=VMEM,
    )(x.astype(BF16), gamma.reshape(1, -1).astype(F32),
      beta.reshape(1, -1).astype(F32), w.astype(BF16))


def _logits_kernel(img_ref, txt_ref, o_ref, *, scale):
    # logits = logit_scale * image_features @ text_features.T
    o_ref[...] = (scale * _mm_t(img_ref[...], txt_ref[...])).astype(o_ref.dtype)


def pallas_logits(img, txt, logit_scale):
    B = img.shape[0]
    n_cls = txt.shape[0]
    return pl.pallas_call(
        functools.partial(_logits_kernel, scale=float(logit_scale)),
        out_shape=jax.ShapeDtypeStruct((B, n_cls), F32),
        in_specs=[VMEM, VMEM], out_specs=VMEM,
    )(img.astype(BF16), txt.astype(BF16))


# --------------------------- fused residual block ----------------------------

def _resblock_kernel(*refs, n_heads, scale, has_mask, has_inject, has_pre_ln,
                     inject_off, inject_len):
    """One CLIP residual attention block for a single batch element (L, D).

    Optionally: deep-prompt row injection, pre-LayerNorm (vision layer 0),
    and an additive (L, L) attention mask (text causal mask).
    """
    refs = list(refs)
    o_ref = refs.pop()                       # output ref is last
    it = iter(refs)
    x_ref = next(it)
    mask_ref = next(it) if has_mask else None
    inj_ref = next(it) if has_inject else None
    pre_g = next(it) if has_pre_ln else None
    pre_b = next(it) if has_pre_ln else None
    (ln1g, ln1b, wqkv, bqkv, wo, bo,
     ln2g, ln2b, wfc, bfc, wpr, bpr) = it    # exactly 12 weight refs

    x = x_ref[0].astype(F32)                 # (L, D) f32 working copy
    L, D = x.shape
    Dh = D // n_heads

    # ---- MaPLe deep-prompt injection (replaces rows [off, off+len)) ----
    if has_inject:
        row = lax.broadcasted_iota(jnp.int32, (L, D), 0)
        sel = (row >= inject_off) & (row < inject_off + inject_len)
        x = jnp.where(sel, inj_ref[...].astype(F32), x)

    # ---- fused ln_pre (vision tower, first block only) ----
    if has_pre_ln:
        x = _ln(x, pre_g[...], pre_b[...])

    # ---- multi-head self attention ----
    h = _ln(x, ln1g[...], ln1b[...])
    qkv = _mm(h, wqkv[...]) + bqkv[...]      # ONE wide (L, D) @ (D, 3D) matmul
    heads = []
    for hd in range(n_heads):                # tiny per-head softmax math only
        lo = hd * Dh
        q = qkv[:, lo:lo + Dh] * scale       # attention scale folded into q
        k = qkv[:, D + lo:D + lo + Dh]
        v = qkv[:, 2 * D + lo:2 * D + lo + Dh]
        s = _mm_t(q, k)                      # (L, L)
        if has_mask:
            s = s + mask_ref[...]
        s = s - jnp.max(s, axis=-1, keepdims=True)
        p = jnp.exp(s)
        p = p * pl.reciprocal(jnp.sum(p, axis=-1, keepdims=True), approx=True)
        heads.append(_mm(p, v))              # (L, Dh)
    ctx = jnp.concatenate(heads, axis=-1)    # (L, D)
    x = x + _mm(ctx, wo[...]) + bo[...]      # ONE wide (L, D) @ (D, D) out-proj

    # ---- MLP (fc -> quickGELU -> proj) ----
    h = _ln(x, ln2g[...], ln2b[...])
    h = _mm(h, wfc[...]) + bfc[...]
    h = h * jax.nn.sigmoid(1.702 * h)        # quickGELU
    h = _mm(h, wpr[...]) + bpr[...]
    o_ref[0] = (x + h).astype(o_ref.dtype)


def fused_resblock(x, bp, n_heads, *, mask=None, inject=None, pre_ln=None):
    """x: (B, L, D) bf16 residual stream.  Grid over B ('parallel')."""
    B, L, D = x.shape
    Dh = D // n_heads

    def const_spec(arr):
        # Grid-invariant input: fetched once, single-buffered (halves its VMEM).
        nd = arr.ndim
        return pl.BlockSpec(arr.shape, lambda b: (0,) * nd,
                            pipeline_mode=pl.Buffered(1))

    extra = []
    has_mask = mask is not None
    has_inject = inject is not None
    has_pre = pre_ln is not None
    inj_off = inj_len = 0
    if has_mask:
        extra.append(mask.astype(F32))
    if has_inject:
        inj_arr, inj_off, inj_len = inject
        extra.append(inj_arr.astype(BF16))
    if has_pre:
        extra.append(pre_ln[0].reshape(1, -1).astype(F32))
        extra.append(pre_ln[1].reshape(1, -1).astype(F32))

    weights = [bp['ln1_g'], bp['ln1_b'], bp['w_qkv'], bp['b_qkv'],
               bp['w_o'], bp['b_o'], bp['ln2_g'], bp['ln2_b'],
               bp['fc_w'], bp['fc_b'], bp['proj_w'], bp['proj_b']]
    args = extra + weights

    # Advisory cost estimate (QKV + scores/context + out-proj + MLP).
    flops = 2 * B * L * D * (12 * D + 2 * L)
    transcend = B * (n_heads * L * L + 4 * L * D)
    bytes_acc = 2 * B * L * D * 2 + sum(_nbytes(a) for a in args)
    cost = pl.CostEstimate(flops=int(flops), transcendentals=int(transcend),
                           bytes_accessed=int(bytes_acc))

    # Explicit VMEM budget: single-buffered weights + double-buffered (1,L,D)
    # activations + f32 intermediate headroom; never below 32 MiB (v5e fix).
    vmem_est = (sum(_nbytes(a) for a in args)
                + 4 * (L * D * 2)
                + 16 * L * max(4 * D, 3 * D) * 4)
    vmem_limit = int(min(100 * 2 ** 20, max(32 * 2 ** 20, 2 * vmem_est)))

    kern = functools.partial(
        _resblock_kernel, n_heads=n_heads, scale=1.0 / math.sqrt(Dh),
        has_mask=has_mask, has_inject=has_inject, has_pre_ln=has_pre,
        inject_off=inj_off, inject_len=inj_len)

    return pl.pallas_call(
        kern,
        grid=(B,),
        out_shape=jax.ShapeDtypeStruct((B, L, D), BF16),
        in_specs=[pl.BlockSpec((1, L, D), lambda b: (b, 0, 0))]
                 + [const_spec(a) for a in args],
        out_specs=pl.BlockSpec((1, L, D), lambda b: (b, 0, 0)),
        compiler_params=pltpu.CompilerParams(
            dimension_semantics=("parallel",),
            vmem_limit_bytes=vmem_limit),
        cost_estimate=cost,
    )(x.astype(BF16), *args)


# --------------------------- model blocks -------------------------------------

def run_transformer(x, blocks, deep_prompts, *, mask, n_ctx, n_heads, mode,
                    pre_ln=None):
    """MaPLe transformer: deep prompts injected at layers 1..prompt_depth-1,
    inside the fused block (no inter-kernel residual-stream copies)."""
    B, L, D = x.shape
    for i, bp in enumerate(blocks):
        inject = None
        if 1 <= i <= len(deep_prompts):
            off = 1 if mode == 'text' else L - n_ctx        # text: after SOS
            padded = lax.dynamic_update_slice(
                jnp.zeros((L, D), F32), deep_prompts[i - 1].astype(F32), (off, 0))
            inject = (padded, off, n_ctx)
        x = fused_resblock(x, bp, n_heads, mask=mask, inject=inject,
                           pre_ln=pre_ln if i == 0 else None)
    return x


def prompt_learner_forward(plp, n_cls):
    ctx = plp['ctx']                                       # (n_ctx, ctx_dim)
    n_ctx, ctx_dim = ctx.shape
    ctx_exp = jnp.broadcast_to(ctx[None], (n_cls, n_ctx, ctx_dim))
    prompts = jnp.concatenate(
        [plp['token_prefix'], ctx_exp, plp['token_suffix']], axis=1)
    shared_ctx = pallas_linear(ctx, plp['proj_w'], plp['proj_b'])
    deep_text = plp['compound_prompts_text']
    deep_vis = [pallas_linear(deep_text[i], plp['cproj_w'][i], plp['cproj_b'][i])
                for i in range(len(deep_text))]
    return prompts, shared_ctx, deep_text, deep_vis


def text_encoder(prompts, tokenized_prompts, deep_text, tp, cfg):
    n_cls, L, _ = prompts.shape
    x = (prompts.astype(F32) + tp['pos_emb'][None]).astype(BF16)   # bf16 stream
    # CLIP causal attention mask (build_attention_mask equivalent), f32 in-kernel
    causal = jnp.triu(jnp.full((L, L), -1e30, F32), k=1)
    x = run_transformer(x, tp['blocks'], deep_text, mask=causal,
                        n_ctx=cfg['n_ctx'], n_heads=cfg['txt_heads'], mode='text')
    # gather EOT tokens first (LN is per-token, so this commutes with ln_final)
    eot = jnp.argmax(tokenized_prompts, axis=-1)
    x_eot = x[jnp.arange(n_cls), eot]                      # (n_cls, D) bf16
    # ln_final -> text_projection -> L2 normalize, fused
    return pallas_post_project(x_eot, tp['lnf_g'], tp['lnf_b'],
                               tp['text_projection'])


def image_encoder(image, shared_ctx, deep_vis, vp, cfg):
    B, C, H, W = image.shape
    P, vw = cfg['patch'], cfg['vis_width']
    gh, gw = H // P, W // P
    # patchify == conv2d(stride=P, no bias); projection runs on the MXU
    patches = image.reshape(B, C, gh, P, gw, P)
    patches = jnp.transpose(patches, (0, 2, 4, 1, 3, 5)).reshape(
        B * gh * gw, C * P * P)
    x = pallas_linear(patches, vp['conv_w']).reshape(B, gh * gw, vw)
    cls = jnp.broadcast_to(vp['cls_emb'].reshape(1, 1, vw), (B, 1, vw))
    x = jnp.concatenate([cls, x], axis=1) + vp['pos_emb'][None]
    ctx = jnp.broadcast_to(shared_ctx[None], (B,) + shared_ctx.shape)
    x = jnp.concatenate([x, ctx], axis=1).astype(BF16)     # bf16 residual stream
    # ln_pre is fused into the first resblock; no mask in the vision tower.
    x = run_transformer(x, vp['blocks'], deep_vis, mask=None,
                        n_ctx=cfg['n_ctx'], n_heads=cfg['vis_heads'],
                        mode='vision',
                        pre_ln=(vp['ln_pre_g'], vp['ln_pre_b']))
    # ln_post(cls token) -> visual projection -> L2 normalize, fused
    return pallas_post_project(x[:, 0, :], vp['ln_post_g'], vp['ln_post_b'],
                               vp['proj'])


def custom_clip_forward(params, cfg, image):
    prompts, shared_ctx, deep_text, deep_vis = prompt_learner_forward(
        params['prompt_learner'], cfg['n_cls'])
    text_features = text_encoder(prompts, params['tokenized_prompts'],
                                 deep_text, params['text'], cfg)
    image_features = image_encoder(image, shared_ctx, deep_vis,
                                   params['vision'], cfg)
    logit_scale = math.exp(params['logit_scale'])
    return pallas_logits(image_features, text_features, logit_scale)


# --------------------------- parameter init -----------------------------------

def init_params(key, cfg):
    ks = iter(jax.random.split(key, 128))

    def nrm(shape, std=0.02, dtype=F32):
        return (std * jax.random.normal(next(ks), shape)).astype(dtype)

    def zeros(shape):
        return jnp.zeros(shape, F32)

    def block(D, heads):
        # Lane-dense packed attention weights: QKV (D, 3D) and out-proj (D, D).
        return dict(
            ln1_g=jnp.ones((1, D), F32), ln1_b=zeros((1, D)),
            w_qkv=nrm((D, 3 * D), dtype=BF16), b_qkv=zeros((1, 3 * D)),
            w_o=nrm((D, D), dtype=BF16), b_o=zeros((1, D)),
            ln2_g=jnp.ones((1, D), F32), ln2_b=zeros((1, D)),
            fc_w=nrm((D, 4 * D), dtype=BF16), fc_b=zeros((1, 4 * D)),
            proj_w=nrm((4 * D, D), dtype=BF16), proj_b=zeros((1, D)),
        )

    n_cls, n_ctx, L = cfg['n_cls'], cfg['n_ctx'], cfg['txt_len']
    tw, vw, ed = cfg['txt_width'], cfg['vis_width'], cfg['embed_dim']
    P, C = cfg['patch'], cfg['in_chans']
    npatch = (cfg['img_size'] // P) ** 2
    depth = cfg['prompt_depth']

    # synthetic frozen token embeddings of the tokenized class prompts
    embedding = nrm((n_cls, L, tw))
    prompt_learner = dict(
        ctx=nrm((n_ctx, tw)),
        proj_w=nrm((tw, vw), dtype=BF16), proj_b=zeros((vw,)),
        token_prefix=embedding[:, :1, :],
        token_suffix=embedding[:, 1 + n_ctx:, :],
        compound_prompts_text=[nrm((n_ctx, tw)) for _ in range(depth - 1)],
        cproj_w=[nrm((tw, vw), dtype=BF16) for _ in range(depth - 1)],
        cproj_b=[zeros((vw,)) for _ in range(depth - 1)],
    )

    text = dict(
        pos_emb=nrm((L, tw)),
        blocks=[block(tw, cfg['txt_heads']) for _ in range(cfg['txt_layers'])],
        lnf_g=jnp.ones((tw,), F32), lnf_b=zeros((tw,)),
        text_projection=nrm((tw, ed), dtype=BF16),
    )

    # conv1 weight (vw, C, P, P) flattened for the patch-embed matmul kernel
    conv_w = nrm((vw, C, P, P)).reshape(vw, C * P * P).T.astype(BF16)
    vision = dict(
        conv_w=conv_w,
        cls_emb=nrm((vw,)),
        pos_emb=nrm((1 + npatch, vw)),
        ln_pre_g=jnp.ones((vw,), F32), ln_pre_b=zeros((vw,)),
        blocks=[block(vw, cfg['vis_heads']) for _ in range(cfg['vis_layers'])],
        ln_post_g=jnp.ones((vw,), F32), ln_post_b=zeros((vw,)),
        proj=nrm((vw, ed), dtype=BF16),
    )

    # synthetic tokenized prompts: SOS + ctx + name tokens + EOT (argmax = EOT)
    eot_pos = jnp.array([min(1 + n_ctx + 1 + i, L - 1) for i in range(n_cls)],
                        jnp.int32)
    tok = jnp.zeros((n_cls, L), jnp.int32).at[:, 0].set(49406)
    tok = tok.at[jnp.arange(n_cls), eot_pos].set(49407)

    return dict(prompt_learner=prompt_learner, text=text, vision=vision,
                tokenized_prompts=tok,
                logit_scale=float(math.log(1.0 / 0.07)))


# --------------------------- main ----------------------------------------------

if __name__ == "__main__":
    cfg = dict(
        n_cls=3, n_ctx=2, prompt_depth=2,
        txt_len=8, txt_width=64, txt_layers=2, txt_heads=4,
        img_size=16, patch=8, in_chans=3,
        vis_width=96, vis_layers=2, vis_heads=4,
        embed_dim=64,
    )
    pkey, ikey = jax.random.split(jax.random.PRNGKey(0))
    params = init_params(pkey, cfg)
    image = jax.random.normal(
        ikey, (2, cfg['in_chans'], cfg['img_size'], cfg['img_size']), F32)

    fwd = jax.jit(lambda img: custom_clip_forward(params, cfg, img))
    logits = jax.block_until_ready(fwd(image))

    assert logits.shape == (2, cfg['n_cls']), logits.shape
    assert bool(jnp.all(jnp.isfinite(logits)))
    print("KERNEL_OK")
</pallas_src>

<mosaic_0001>
module attributes {stable_mosaic.version = 11 : i64} {
  func.func @_matmul_bias_kernel(%arg0: memref<2x64xbf16, #tpu.memory_space<vmem>>, %arg1: memref<64x96xbf16, #tpu.memory_space<vmem>>, %arg2: memref<1x96xf32, #tpu.memory_space<vmem>>, %arg3: memref<2x96xf32, #tpu.memory_space<vmem>>) attributes {dimension_semantics = [], scalar_prefetch = 0 : i64, scratch_operands = 0 : i64, tpu.core_type = #tpu.core_type<tc>} {
    %c0 = arith.constant 0 : index
    %c0_0 = arith.constant 0 : index
    %0 = vector.load %arg0[%c0, %c0_0] : memref<2x64xbf16, #tpu.memory_space<vmem>>, vector<2x64xbf16>
    %c0_1 = arith.constant 0 : index
    %c0_2 = arith.constant 0 : index
    %1 = vector.load %arg1[%c0_1, %c0_2] : memref<64x96xbf16, #tpu.memory_space<vmem>>, vector<64x96xbf16>
    %cst = arith.constant dense<0.000000e+00> : vector<2x96xf32>
    %2 = tpu.matmul %0, %1, %cst {dimension_numbers = #tpu.dot_dimension_numbers<[1], [0], [0], [1], [0, 0, 1, 1], [], []>} : vector<2x64xbf16>, vector<64x96xbf16>, vector<2x96xf32> -> vector<2x96xf32>
    %c0_3 = arith.constant 0 : index
    %c0_4 = arith.constant 0 : index
    %3 = vector.load %arg2[%c0_3, %c0_4] : memref<1x96xf32, #tpu.memory_space<vmem>>, vector<1x96xf32>
    %4 = vector.broadcast %3 : vector<1x96xf32> to vector<2x96xf32>
    %5 = arith.addf %2, %4 : vector<2x96xf32>
    %c0_5 = arith.constant 0 : index
    %c0_6 = arith.constant 0 : index
    %6 = vector.load %arg3[%c0_5, %c0_6] : memref<2x96xf32, #tpu.memory_space<vmem>>, vector<2x96xf32>
    tpu.vector_store %arg3[%c0_5, %c0_6], %5 {strides = array<i32>} : memref<2x96xf32, #tpu.memory_space<vmem>>, vector<2x96xf32>,
    return
  }
}

module attributes {stable_mosaic.version = 11 : i64} {
  func.func @_matmul_kernel(%arg0: memref<8x192xbf16, #tpu.memory_space<vmem>>, %arg1: memref<192x96xbf16, #tpu.memory_space<vmem>>, %arg2: memref<8x96xf32, #tpu.memory_space<vmem>>) attributes {dimension_semantics = [], scalar_prefetch = 0 : i64, scratch_operands = 0 : i64, tpu.core_type = #tpu.core_type<tc>} {
    %c0 = arith.constant 0 : index
    %c0_0 = arith.constant 0 : index
    %0 = vector.load %arg0[%c0, %c0_0] : memref<8x192xbf16, #tpu.memory_space<vmem>>, vector<8x192xbf16>
    %c0_1 = arith.constant 0 : index
    %c0_2 = arith.constant 0 : index
    %1 = vector.load %arg1[%c0_1, %c0_2] : memref<192x96xbf16, #tpu.memory_space<vmem>>, vector<192x96xbf16>
    %cst = arith.constant dense<0.000000e+00> : vector<8x96xf32>
    %2 = tpu.matmul %0, %1, %cst {dimension_numbers = #tpu.dot_dimension_numbers<[1], [0], [0], [1], [0, 0, 1, 1], [], []>} : vector<8x192xbf16>, vector<192x96xbf16>, vector<8x96xf32> -> vector<8x96xf32>
    %c0_3 = arith.constant 0 : index
    %c0_4 = arith.constant 0 : index
    %3 = vector.load %arg2[%c0_3, %c0_4] : memref<8x96xf32, #tpu.memory_space<vmem>>, vector<8x96xf32>
    tpu.vector_store %arg2[%c0_3, %c0_4], %2 {strides = array<i32>} : memref<8x96xf32, #tpu.memory_space<vmem>>, vector<8x96xf32>,
    return
  }
}

module attributes {stable_mosaic.version = 11 : i64} {
  func.func @_resblock_kernel(%arg0: i32, %arg1: memref<1x7x96xbf16, #tpu.memory_space<vmem>>, %arg2: memref<7x96xbf16, #tpu.memory_space<vmem>>, %arg3: memref<1x96xf32, #tpu.memory_space<vmem>>, %arg4: memref<1x96xf32, #tpu.memory_space<vmem>>, %arg5: memref<96x288xbf16, #tpu.memory_space<vmem>>, %arg6: memref<1x288xf32, #tpu.memory_space<vmem>>, %arg7: memref<96x96xbf16, #tpu.memory_space<vmem>>, %arg8: memref<1x96xf32, #tpu.memory_space<vmem>>, %arg9: memref<1x96xf32, #tpu.memory_space<vmem>>, %arg10: memref<1x96xf32, #tpu.memory_space<vmem>>, %arg11: memref<96x384xbf16, #tpu.memory_space<vmem>>, %arg12: memref<1x384xf32, #tpu.memory_space<vmem>>, %arg13: memref<384x96xbf16, #tpu.memory_space<vmem>>, %arg14: memref<1x96xf32, #tpu.memory_space<vmem>>, %arg15: memref<1x7x96xbf16, #tpu.memory_space<vmem>>) attributes {dimension_semantics = [#tpu.dimension_semantics<parallel>], iteration_bounds = array<i64: 2>, scalar_prefetch = 0 : i64, scratch_operands = 0 : i64, tpu.core_type = #tpu.core_type<tc>, window_params = [{transform_indices = @transform_0, window_bounds = array<i64: 1, 7, 96>}, {pipeline_mode = #tpu.pipeline_mode<synchronous>, transform_indices = @transform_1, window_bounds = array<i64: 7, 96>}, {pipeline_mode = #tpu.pipeline_mode<synchronous>, transform_indices = @transform_2, window_bounds = array<i64: 1, 96>}, {pipeline_mode = #tpu.pipeline_mode<synchronous>, transform_indices = @transform_3, window_bounds = array<i64: 1, 96>}, {pipeline_mode = #tpu.pipeline_mode<synchronous>, transform_indices = @transform_4, window_bounds = array<i64: 96, 288>}, {pipeline_mode = #tpu.pipeline_mode<synchronous>, transform_indices = @transform_5, window_bounds = array<i64: 1, 288>}, {pipeline_mode = #tpu.pipeline_mode<synchronous>, transform_indices = @transform_6, window_bounds = array<i64: 96, 96>}, {pipeline_mode = #tpu.pipeline_mode<synchronous>, transform_indices = @transform_7, window_bounds = array<i64: 1, 96>}, {pipeline_mode = #tpu.pipeline_mode<synchronous>, transform_indices = @transform_8, window_bounds = array<i64: 1, 96>}, {pipeline_mode = #tpu.pipeline_mode<synchronous>, transform_indices = @transform_9, window_bounds = array<i64: 1, 96>}, {pipeline_mode = #tpu.pipeline_mode<synchronous>, transform_indices = @transform_10, window_bounds = array<i64: 96, 384>}, {pipeline_mode = #tpu.pipeline_mode<synchronous>, transform_indices = @transform_11, window_bounds = array<i64: 1, 384>}, {pipeline_mode = #tpu.pipeline_mode<synchronous>, transform_indices = @transform_12, window_bounds = array<i64: 384, 96>}, {pipeline_mode = #tpu.pipeline_mode<synchronous>, transform_indices = @transform_13, window_bounds = array<i64: 1, 96>}, {transform_indices = @transform_14, window_bounds = array<i64: 1, 7, 96>}]} {
    %c0 = arith.constant 0 : index
    %c0_0 = arith.constant 0 : index
    %c0_1 = arith.constant 0 : index
    %0 = vector.load %arg1[%c0, %c0_0, %c0_1] : memref<1x7x96xbf16, #tpu.memory_space<vmem>>, vector<1x7x96xbf16>
    %1 = vector.shape_cast %0 : vector<1x7x96xbf16> to vector<7x96xbf16>
    %2 = arith.extf %1 : vector<7x96xbf16> to vector<7x96xf32>
    %3 = tpu.iota {dimensions = array<i32: 0>} : vector<7x96xi32>
    %c5_i32 = arith.constant 5 : i32
    %4 = vector.broadcast %c5_i32 : i32 to vector<7x96xi32>
    %5 = arith.cmpi sge, %3, %4 : vector<7x96xi32>
    %c7_i32 = arith.constant 7 : i32
    %6 = vector.broadcast %c7_i32 : i32 to vector<7x96xi32>
    %7 = arith.cmpi slt, %3, %6 : vector<7x96xi32>
    %8 = arith.andi %5, %7 : vector<7x96xi1>
    %c0_2 = arith.constant 0 : index
    %c0_3 = arith.constant 0 : index
    %9 = vector.load %arg2[%c0_2, %c0_3] : memref<7x96xbf16, #tpu.memory_space<vmem>>, vector<7x96xbf16>
    %10 = arith.extf %9 : vector<7x96xbf16> to vector<7x96xf32>
    %11 = arith.select %8, %10, %2 : vector<7x96xi1>, vector<7x96xf32>
    %c0_4 = arith.constant 0 : index
    %c0_5 = arith.constant 0 : index
    %12 = vector.load %arg3[%c0_4, %c0_5] : memref<1x96xf32, #tpu.memory_space<vmem>>, vector<1x96xf32>
    %c0_6 = arith.constant 0 : index
    %c0_7 = arith.constant 0 : index
    %13 = vector.load %arg4[%c0_6, %c0_7] : memref<1x96xf32, #tpu.memory_space<vmem>>, vector<1x96xf32>
    %cst = arith.constant dense<0.000000e+00> : vector<7xf32>
    %14 = vector.multi_reduction <add>, %11, %cst [1] : vector<7x96xf32> to vector<7xf32>
    %15 = vector.shape_cast %14 : vector<7xf32> to vector<7x1xf32>
    %cst_8 = arith.constant 9.600000e+01 : f32
    %16 = vector.broadcast %cst_8 : f32 to vector<7x1xf32>
    %17 = arith.divf %15, %16 : vector<7x1xf32>
    %18 = vector.broadcast %17 : vector<7x1xf32> to vector<7x96xf32>
    %19 = arith.subf %11, %18 : vector<7x96xf32>
    %20 = arith.mulf %19, %19 : vector<7x96xf32>
    %cst_9 = arith.constant dense<0.000000e+00> : vector<7xf32>
    %21 = vector.multi_reduction <add>, %20, %cst_9 [1] : vector<7x96xf32> to vector<7xf32>
    %22 = vector.shape_cast %21 : vector<7xf32> to vector<7x1xf32>
    %cst_10 = arith.constant 9.600000e+01 : f32
    %23 = vector.broadcast %cst_10 : f32 to vector<7x1xf32>
    %24 = arith.divf %22, %23 : vector<7x1xf32>
    %cst_11 = arith.constant 9.99999974E-6 : f32
    %25 = vector.broadcast %cst_11 : f32 to vector<7x1xf32>
    %26 = arith.addf %24, %25 : vector<7x1xf32>
    %27 = math.rsqrt %26 : vector<7x1xf32>
    %28 = vector.broadcast %27 : vector<7x1xf32> to vector<7x96xf32>
    %29 = arith.mulf %19, %28 : vector<7x96xf32>
    %30 = vector.broadcast %12 : vector<1x96xf32> to vector<7x96xf32>
    %31 = arith.mulf %29, %30 : vector<7x96xf32>
    %32 = vector.broadcast %13 : vector<1x96xf32> to vector<7x96xf32>
    %33 = arith.addf %31, %32 : vector<7x96xf32>
    %c0_12 = arith.constant 0 : index
    %c0_13 = arith.constant 0 : index
    %34 = vector.load %arg5[%c0_12, %c0_13] : memref<96x288xbf16, #tpu.memory_space<vmem>>, vector<96x288xbf16>
    %35 = arith.truncf %33 : vector<7x96xf32> to vector<7x96xbf16>
    %cst_14 = arith.constant dense<0.000000e+00> : vector<7x288xf32>
    %36 = tpu.matmul %35, %34, %cst_14 {dimension_numbers = #tpu.dot_dimension_numbers<[1], [0], [0], [1], [0, 0, 1, 1], [], []>} : vector<7x96xbf16>, vector<96x288xbf16>, vector<7x288xf32> -> vector<7x288xf32>
    %c0_15 = arith.constant 0 : index
    %c0_16 = arith.constant 0 : index
    %37 = vector.load %arg6[%c0_15, %c0_16] : memref<1x288xf32, #tpu.memory_space<vmem>>, vector<1x288xf32>
    %38 = vector.broadcast %37 : vector<1x288xf32> to vector<7x288xf32>
    %39 = arith.addf %36, %38 : vector<7x288xf32>
    %40 = vector.extract_strided_slice %39 {offsets = [0, 0], sizes = [7, 24], strides = [1, 1]} : vector<7x288xf32> to vector<7x24xf32>
    %cst_17 = arith.constant 0.204124153 : f32
    %41 = vector.broadcast %cst_17 : f32 to vector<7x24xf32>
    %42 = arith.mulf %40, %41 : vector<7x24xf32>
    %43 = vector.extract_strided_slice %39 {offsets = [0, 96], sizes = [7, 24], strides = [1, 1]} : vector<7x288xf32> to vector<7x24xf32>
    %44 = vector.extract_strided_slice %39 {offsets = [0, 192], sizes = [7, 24], strides = [1, 1]} : vector<7x288xf32> to vector<7x24xf32>
    %45 = arith.truncf %42 : vector<7x24xf32> to vector<7x24xbf16>
    %46 = arith.truncf %43 : vector<7x24xf32> to vector<7x24xbf16>
    %cst_18 = arith.constant dense<0.000000e+00> : vector<7x7xf32>
    %47 = tpu.matmul %45, %46, %cst_18 {dimension_numbers = #tpu.dot_dimension_numbers<[1], [1], [0], [0], [0, 0, 1, 0], [], []>} : vector<7x24xbf16>, vector<7x24xbf16>, vector<7x7xf32> -> vector<7x7xf32>
    %cst_19 = arith.constant dense<0xFF800000> : vector<7xf32>
    %48 = vector.multi_reduction <maximumf>, %47, %cst_19 [1] : vector<7x7xf32> to vector<7xf32>
    %49 = vector.shape_cast %48 : vector<7xf32> to vector<7x1xf32>
    %50 = vector.broadcast %49 : vector<7x1xf32> to vector<7x7xf32>
    %51 = arith.subf %47, %50 : vector<7x7xf32>
    %52 = math.exp %51 : vector<7x7xf32>
    %cst_20 = arith.constant dense<0.000000e+00> : vector<7xf32>
    %53 = vector.multi_reduction <add>, %52, %cst_20 [1] : vector<7x7xf32> to vector<7xf32>
    %54 = vector.shape_cast %53 : vector<7xf32> to vector<7x1xf32>
    %55 = tpu.reciprocal %54 {approx = true} : vector<7x1xf32> -> vector<7x1xf32>
    %56 = vector.broadcast %55 : vector<7x1xf32> to vector<7x7xf32>
    %57 = arith.mulf %52, %56 : vector<7x7xf32>
    %58 = arith.truncf %57 : vector<7x7xf32> to vector<7x7xbf16>
    %59 = arith.truncf %44 : vector<7x24xf32> to vector<7x24xbf16>
    %cst_21 = arith.constant dense<0.000000e+00> : vector<7x24xf32>
    %60 = tpu.matmul %58, %59, %cst_21 {dimension_numbers = #tpu.dot_dimension_numbers<[1], [0], [0], [1], [0, 0, 1, 1], [], []>} : vector<7x7xbf16>, vector<7x24xbf16>, vector<7x24xf32> -> vector<7x24xf32>
    %61 = vector.extract_strided_slice %39 {offsets = [0, 24], sizes = [7, 24], strides = [1, 1]} : vector<7x288xf32> to vector<7x24xf32>
    %cst_22 = arith.constant 0.204124153 : f32
    %62 = vector.broadcast %cst_22 : f32 to vector<7x24xf32>
    %63 = arith.mulf %61, %62 : vector<7x24xf32>
    %64 = vector.extract_strided_slice %39 {offsets = [0, 120], sizes = [7, 24], strides = [1, 1]} : vector<7x288xf32> to vector<7x24xf32>
    %65 = vector.extract_strided_slice %39 {offsets = [0, 216], sizes = [7, 24], strides = [1, 1]} : vector<7x288xf32> to vector<7x24xf32>
    %66 = arith.truncf %63 : vector<7x24xf32> to vector<7x24xbf16>
    %67 = arith.truncf %64 : vector<7x24xf32> to vector<7x24xbf16>
    %cst_23 = arith.constant dense<0.000000e+00> : vector<7x7xf32>
    %68 = tpu.matmul %66, %67, %cst_23 {dimension_numbers = #tpu.dot_dimension_numbers<[1], [1], [0], [0], [0, 0, 1, 0], [], []>} : vector<7x24xbf16>, vector<7x24xbf16>, vector<7x7xf32> -> vector<7x7xf32>
    %cst_24 = arith.constant dense<0xFF800000> : vector<7xf32>
    %69 = vector.multi_reduction <maximumf>, %68, %cst_24 [1] : vector<7x7xf32> to vector<7xf32>
    %70 = vector.shape_cast %69 : vector<7xf32> to vector<7x1xf32>
    %71 = vector.broadcast %70 : vector<7x1xf32> to vector<7x7xf32>
    %72 = arith.subf %68, %71 : vector<7x7xf32>
    %73 = math.exp %72 : vector<7x7xf32>
    %cst_25 = arith.constant dense<0.000000e+00> : vector<7xf32>
    %74 = vector.multi_reduction <add>, %73, %cst_25 [1] : vector<7x7xf32> to vector<7xf32>
    %75 = vector.shape_cast %74 : vector<7xf32> to vector<7x1xf32>
    %76 = tpu.reciprocal %75 {approx = true} : vector<7x1xf32> -> vector<7x1xf32>
    %77 = vector.broadcast %76 : vector<7x1xf32> to vector<7x7xf32>
    %78 = arith.mulf %73, %77 : vector<7x7xf32>
    %79 = arith.truncf %78 : vector<7x7xf32> to vector<7x7xbf16>
    %80 = arith.truncf %65 : vector<7x24xf32> to vector<7x24xbf16>
    %cst_26 = arith.constant dense<0.000000e+00> : vector<7x24xf32>
    %81 = tpu.matmul %79, %80, %cst_26 {dimension_numbers = #tpu.dot_dimension_numbers<[1], [0], [0], [1], [0, 0, 1, 1], [], []>} : vector<7x7xbf16>, vector<7x24xbf16>, vector<7x24xf32> -> vector<7x24xf32>
    %82 = vector.extract_strided_slice %39 {offsets = [0, 48], sizes = [7, 24], strides = [1, 1]} : vector<7x288xf32> to vector<7x24xf32>
    %cst_27 = arith.constant 0.204124153 : f32
    %83 = vector.broadcast %cst_27 : f32 to vector<7x24xf32>
    %84 = arith.mulf %82, %83 : vector<7x24xf32>
    %85 = vector.extract_strided_slice %39 {offsets = [0, 144], sizes = [7, 24], strides = [1, 1]} : vector<7x288xf32> to vector<7x24xf32>
    %86 = vector.extract_strided_slice %39 {offsets = [0, 240], sizes = [7, 24], strides = [1, 1]} : vector<7x288xf32> to vector<7x24xf32>
    %87 = arith.truncf %84 : vector<7x24xf32> to vector<7x24xbf16>
    %88 = arith.truncf %85 : vector<7x24xf32> to vector<7x24xbf16>
    %cst_28 = arith.constant dense<0.000000e+00> : vector<7x7xf32>
    %89 = tpu.matmul %87, %88, %cst_28 {dimension_numbers = #tpu.dot_dimension_numbers<[1], [1], [0], [0], [0, 0, 1, 0], [], []>} : vector<7x24xbf16>, vector<7x24xbf16>, vector<7x7xf32> -> vector<7x7xf32>
    %cst_29 = arith.constant dense<0xFF800000> : vector<7xf32>
    %90 = vector.multi_reduction <maximumf>, %89, %cst_29 [1] : vector<7x7xf32> to vector<7xf32>
    %91 = vector.shape_cast %90 : vector<7xf32> to vector<7x1xf32>
    %92 = vector.broadcast %91 : vector<7x1xf32> to vector<7x7xf32>
    %93 = arith.subf %89, %92 : vector<7x7xf32>
    %94 = math.exp %93 : vector<7x7xf32>
    %cst_30 = arith.constant dense<0.000000e+00> : vector<7xf32>
    %95 = vector.multi_reduction <add>, %94, %cst_30 [1] : vector<7x7xf32> to vector<7xf32>
    %96 = vector.shape_cast %95 : vector<7xf32> to vector<7x1xf32>
    %97 = tpu.reciprocal %96 {approx = true} : vector<7x1xf32> -> vector<7x1xf32>
    %98 = vector.broadcast %97 : vector<7x1xf32> to vector<7x7xf32>
    %99 = arith.mulf %94, %98 : vector<7x7xf32>
    %100 = arith.truncf %99 : vector<7x7xf32> to vector<7x7xbf16>
    %101 = arith.truncf %86 : vector<7x24xf32> to vector<7x24xbf16>
    %cst_31 = arith.constant dense<0.000000e+00> : vector<7x24xf32>
    %102 = tpu.matmul %100, %101, %cst_31 {dimension_numbers = #tpu.dot_dimension_numbers<[1], [0], [0], [1], [0, 0, 1, 1], [], []>} : vector<7x7xbf16>, vector<7x24xbf16>, vector<7x24xf32> -> vector<7x24xf32>
    %103 = vector.extract_strided_slice %39 {offsets = [0, 72], sizes = [7, 24], strides = [1, 1]} : vector<7x288xf32> to vector<7x24xf32>
    %cst_32 = arith.constant 0.204124153 : f32
    %104 = vector.broadcast %cst_32 : f32 to vector<7x24xf32>
    %105 = arith.mulf %103, %104 : vector<7x24xf32>
    %106 = vector.extract_strided_slice %39 {offsets = [0, 168], sizes = [7, 24], strides = [1, 1]} : vector<7x288xf32> to vector<7x24xf32>
    %107 = vector.extract_strided_slice %39 {offsets = [0, 264], sizes = [7, 24], strides = [1, 1]} : vector<7x288xf32> to vector<7x24xf32>
    %108 = arith.truncf %105 : vector<7x24xf32> to vector<7x24xbf16>
    %109 = arith.truncf %106 : vector<7x24xf32> to vector<7x24xbf16>
    %cst_33 = arith.constant dense<0.000000e+00> : vector<7x7xf32>
    %110 = tpu.matmul %108, %109, %cst_33 {dimension_numbers = #tpu.dot_dimension_numbers<[1], [1], [0], [0], [0, 0, 1, 0], [], []>} : vector<7x24xbf16>, vector<7x24xbf16>, vector<7x7xf32> -> vector<7x7xf32>
    %cst_34 = arith.constant dense<0xFF800000> : vector<7xf32>
    %111 = vector.multi_reduction <maximumf>, %110, %cst_34 [1] : vector<7x7xf32> to vector<7xf32>
    %112 = vector.shape_cast %111 : vector<7xf32> to vector<7x1xf32>
    %113 = vector.broadcast %112 : vector<7x1xf32> to vector<7x7xf32>
    %114 = arith.subf %110, %113 : vector<7x7xf32>
    %115 = math.exp %114 : vector<7x7xf32>
    %cst_35 = arith.constant dense<0.000000e+00> : vector<7xf32>
    %116 = vector.multi_reduction <add>, %115, %cst_35 [1] : vector<7x7xf32> to vector<7xf32>
    %117 = vector.shape_cast %116 : vector<7xf32> to vector<7x1xf32>
    %118 = tpu.reciprocal %117 {approx = true} : vector<7x1xf32> -> vector<7x1xf32>
    %119 = vector.broadcast %118 : vector<7x1xf32> to vector<7x7xf32>
    %120 = arith.mulf %115, %119 : vector<7x7xf32>
    %121 = arith.truncf %120 : vector<7x7xf32> to vector<7x7xbf16>
    %122 = arith.truncf %107 : vector<7x24xf32> to vector<7x24xbf16>
    %cst_36 = arith.constant dense<0.000000e+00> : vector<7x24xf32>
    %123 = tpu.matmul %121, %122, %cst_36 {dimension_numbers = #tpu.dot_dimension_numbers<[1], [0], [0], [1], [0, 0, 1, 1], [], []>} : vector<7x7xbf16>, vector<7x24xbf16>, vector<7x24xf32> -> vector<7x24xf32>
    %124 = tpu.concatenate %60, %81, %102, %123 in 1 : vector<7x24xf32>, vector<7x24xf32>, vector<7x24xf32>, vector<7x24xf32> -> vector<7x96xf32>
    %c0_37 = arith.constant 0 : index
    %c0_38 = arith.constant 0 : index
    %125 = vector.load %arg7[%c0_37, %c0_38] : memref<96x96xbf16, #tpu.memory_space<vmem>>, vector<96x96xbf16>
    %126 = arith.truncf %124 : vector<7x96xf32> to vector<7x96xbf16>
    %cst_39 = arith.constant dense<0.000000e+00> : vector<7x96xf32>
    %127 = tpu.matmul %126, %125, %cst_39 {dimension_numbers = #tpu.dot_dimension_numbers<[1], [0], [0], [1], [0, 0, 1, 1], [], []>} : vector<7x96xbf16>, vector<96x96xbf16>, vector<7x96xf32> -> vector<7x96xf32>
    %128 = arith.addf %11, %127 : vector<7x96xf32>
    %c0_40 = arith.constant 0 : index
    %c0_41 = arith.constant 0 : index
    %129 = vector.load %arg8[%c0_40, %c0_41] : memref<1x96xf32, #tpu.memory_space<vmem>>, vector<1x96xf32>
    %130 = vector.broadcast %129 : vector<1x96xf32> to vector<7x96xf32>
    %131 = arith.addf %128, %130 : vector<7x96xf32>
    %c0_42 = arith.constant 0 : index
    %c0_43 = arith.constant 0 : index
    %132 = vector.load %arg9[%c0_42, %c0_43] : memref<1x96xf32, #tpu.memory_space<vmem>>, vector<1x96xf32>
    %c0_44 = arith.constant 0 : index
    %c0_45 = arith.constant 0 : index
    %133 = vector.load %arg10[%c0_44, %c0_45] : memref<1x96xf32, #tpu.memory_space<vmem>>, vector<1x96xf32>
    %cst_46 = arith.constant dense<0.000000e+00> : vector<7xf32>
    %134 = vector.multi_reduction <add>, %131, %cst_46 [1] : vector<7x96xf32> to vector<7xf32>
    %135 = vector.shape_cast %134 : vector<7xf32> to vector<7x1xf32>
    %cst_47 = arith.constant 9.600000e+01 : f32
    %136 = vector.broadcast %cst_47 : f32 to vector<7x1xf32>
    %137 = arith.divf %135, %136 : vector<7x1xf32>
    %138 = vector.broadcast %137 : vector<7x1xf32> to vector<7x96xf32>
    %139 = arith.subf %131, %138 : vector<7x96xf32>
    %140 = arith.mulf %139, %139 : vector<7x96xf32>
    %cst_48 = arith.constant dense<0.000000e+00> : vector<7xf32>
    %141 = vector.multi_reduction <add>, %140, %cst_48 [1] : vector<7x96xf32> to vector<7xf32>
    %142 = vector.shape_cast %141 : vector<7xf32> to vector<7x1xf32>
    %cst_49 = arith.constant 9.600000e+01 : f32
    %143 = vector.broadcast %cst_49 : f32 to vector<7x1xf32>
    %144 = arith.divf %142, %143 : vector<7x1xf32>
    %cst_50 = arith.constant 9.99999974E-6 : f32
    %145 = vector.broadcast %cst_50 : f32 to vector<7x1xf32>
    %146 = arith.addf %144, %145 : vector<7x1xf32>
    %147 = math.rsqrt %146 : vector<7x1xf32>
    %148 = vector.broadcast %147 : vector<7x1xf32> to vector<7x96xf32>
    %149 = arith.mulf %139, %148 : vector<7x96xf32>
    %150 = vector.broadcast %132 : vector<1x96xf32> to vector<7x96xf32>
    %151 = arith.mulf %149, %150 : vector<7x96xf32>
    %152 = vector.broadcast %133 : vector<1x96xf32> to vector<7x96xf32>
    %153 = arith.addf %151, %152 : vector<7x96xf32>
    %c0_51 = arith.constant 0 : index
    %c0_52 = arith.constant 0 : index
    %154 = vector.load %arg11[%c0_51, %c0_52] : memref<96x384xbf16, #tpu.memory_space<vmem>>, vector<96x384xbf16>
    %155 = arith.truncf %153 : vector<7x96xf32> to vector<7x96xbf16>
    %cst_53 = arith.constant dense<0.000000e+00> : vector<7x384xf32>
    %156 = tpu.matmul %155, %154, %cst_53 {dimension_numbers = #tpu.dot_dimension_numbers<[1], [0], [0], [1], [0, 0, 1, 1], [], []>} : vector<7x96xbf16>, vector<96x384xbf16>, vector<7x384xf32> -> vector<7x384xf32>
    %c0_54 = arith.constant 0 : index
    %c0_55 = arith.constant 0 : index
    %157 = vector.load %arg12[%c0_54, %c0_55] : memref<1x384xf32, #tpu.memory_space<vmem>>, vector<1x384xf32>
    %158 = vector.broadcast %157 : vector<1x384xf32> to vector<7x384xf32>
    %159 = arith.addf %156, %158 : vector<7x384xf32>
    %cst_56 = arith.constant 1.702000e+00 : f32
    %160 = vector.broadcast %cst_56 : f32 to vector<7x384xf32>
    %161 = arith.mulf %160, %159 : vector<7x384xf32>
    %162 = arith.negf %161 : vector<7x384xf32>
    %163 = math.exp %162 : vector<7x384xf32>
    %cst_57 = arith.constant 1.000000e+00 : f32
    %164 = vector.broadcast %cst_57 : f32 to vector<7x384xf32>
    %165 = arith.addf %164, %163 : vector<7x384xf32>
    %166 = arith.divf %164, %165 : vector<7x384xf32>
    %167 = arith.mulf %159, %166 : vector<7x384xf32>
    %c0_58 = arith.constant 0 : index
    %c0_59 = arith.constant 0 : index
    %168 = vector.load %arg13[%c0_58, %c0_59] : memref<384x96xbf16, #tpu.memory_space<vmem>>, vector<384x96xbf16>
    %169 = arith.truncf %167 : vector<7x384xf32> to vector<7x384xbf16>
    %cst_60 = arith.constant dense<0.000000e+00> : vector<7x96xf32>
    %170 = tpu.matmul %169, %168, %cst_60 {dimension_numbers = #tpu.dot_dimension_numbers<[1], [0], [0], [1], [0, 0, 1, 1], [], []>} : vector<7x384xbf16>, vector<384x96xbf16>, vector<7x96xf32> -> vector<7x96xf32>
    %c0_61 = arith.constant 0 : index
    %c0_62 = arith.constant 0 : index
    %171 = vector.load %arg14[%c0_61, %c0_62] : memref<1x96xf32, #tpu.memory_space<vmem>>, vector<1x96xf32>
    %172 = vector.broadcast %171 : vector<1x96xf32> to vector<7x96xf32>
    %173 = arith.addf %170, %172 : vector<7x96xf32>
    %174 = arith.addf %131, %173 : vector<7x96xf32>
    %175 = arith.truncf %174 : vector<7x96xf32> to vector<7x96xbf16>
    %c0_63 = arith.constant 0 : index
    %c0_64 = arith.constant 0 : index
    %c0_65 = arith.constant 0 : index
    %176 = vector.load %arg15[%c0_63, %c0_64, %c0_65] : memref<1x7x96xbf16, #tpu.memory_space<vmem>>, vector<1x7x96xbf16>
    %177 = vector.shape_cast %176 : vector<1x7x96xbf16> to vector<7x96xbf16>
    %178 = vector.shape_cast %175 : vector<7x96xbf16> to vector<1x7x96xbf16>
    tpu.vector_store %arg15[%c0_63, %c0_64, %c0_65], %178 {strides = array<i32>} : memref<1x7x96xbf16, #tpu.memory_space<vmem>>, vector<1x7x96xbf16>,
    return
  }
  func.func @transform_0(%arg0: i32) -> (i32, i32, i32) {
    %c0_i32 = arith.constant 0 : i32
    %c0_i32_0 = arith.constant 0 : i32
    %c0_i32_1 = arith.constant 0 : i32
    return %arg0, %c0_i32, %c0_i32_0 : i32, i32, i32
  }
  func.func @transform_1(%arg0: i32) -> (i32, i32) {
    %c0_i32 = arith.constant 0 : i32
    %c0_i32_0 = arith.constant 0 : i32
    %c0_i32_1 = arith.constant 0 : i32
    return %c0_i32, %c0_i32_0 : i32, i32
  }
  func.func @transform_2(%arg0: i32) -> (i32, i32) {
    %c0_i32 = arith.constant 0 : i32
    %c0_i32_0 = arith.constant 0 : i32
    %c0_i32_1 = arith.constant 0 : i32
    return %c0_i32, %c0_i32_0 : i32, i32
  }
  func.func @transform_3(%arg0: i32) -> (i32, i32) {
    %c0_i32 = arith.constant 0 : i32
    %c0_i32_0 = arith.constant 0 : i32
    %c0_i32_1 = arith.constant 0 : i32
    return %c0_i32, %c0_i32_0 : i32, i32
  }
  func.func @transform_4(%arg0: i32) -> (i32, i32) {
    %c0_i32 = arith.constant 0 : i32
    %c0_i32_0 = arith.constant 0 : i32
    %c0_i32_1 = arith.constant 0 : i32
    return %c0_i32, %c0_i32_0 : i32, i32
  }
  func.func @transform_5(%arg0: i32) -> (i32, i32) {
    %c0_i32 = arith.constant 0 : i32
    %c0_i32_0 = arith.constant 0 : i32
    %c0_i32_1 = arith.constant 0 : i32
    return %c0_i32, %c0_i32_0 : i32, i32
  }
  func.func @transform_6(%arg0: i32) -> (i32, i32) {
    %c0_i32 = arith.constant 0 : i32
    %c0_i32_0 = arith.constant 0 : i32
    %c0_i32_1 = arith.constant 0 : i32
    return %c0_i32, %c0_i32_0 : i32, i32
  }
  func.func @transform_7(%arg0: i32) -> (i32, i32) {
    %c0_i32 = arith.constant 0 : i32
    %c0_i32_0 = arith.constant 0 : i32
    %c0_i32_1 = arith.constant 0 : i32
    return %c0_i32, %c0_i32_0 : i32, i32
  }
  func.func @transform_8(%arg0: i32) -> (i32, i32) {
    %c0_i32 = arith.constant 0 : i32
    %c0_i32_0 = arith.constant 0 : i32
    %c0_i32_1 = arith.constant 0 : i32
    return %c0_i32, %c0_i32_0 : i32, i32
  }
  func.func @transform_9(%arg0: i32) -> (i32, i32) {
    %c0_i32 = arith.constant 0 : i32
    %c0_i32_0 = arith.constant 0 : i32
    %c0_i32_1 = arith.constant 0 : i32
    return %c0_i32, %c0_i32_0 : i32, i32
  }
  func.func @transform_10(%arg0: i32) -> (i32, i32) {
    %c0_i32 = arith.constant 0 : i32
    %c0_i32_0 = arith.constant 0 : i32
    %c0_i32_1 = arith.constant 0 : i32
    return %c0_i32, %c0_i32_0 : i32, i32
  }
  func.func @transform_11(%arg0: i32) -> (i32, i32) {
    %c0_i32 = arith.constant 0 : i32
    %c0_i32_0 = arith.constant 0 : i32
    %c0_i32_1 = arith.constant 0 : i32
    return %c0_i32, %c0_i32_0 : i32, i32
  }
  func.func @transform_12(%arg0: i32) -> (i32, i32) {
    %c0_i32 = arith.constant 0 : i32
    %c0_i32_0 = arith.constant 0 : i32
    %c0_i32_1 = arith.constant 0 : i32
    return %c0_i32, %c0_i32_0 : i32, i32
  }
  func.func @transform_13(%arg0: i32) -> (i32, i32) {
    %c0_i32 = arith.constant 0 : i32
    %c0_i32_0 = arith.constant 0 : i32
    %c0_i32_1 = arith.constant 0 : i32
    return %c0_i32, %c0_i32_0 : i32, i32
  }
  func.func @transform_14(%arg0: i32) -> (i32, i32, i32) {
    %c0_i32 = arith.constant 0 : i32
    %c0_i32_0 = arith.constant 0 : i32
    %c0_i32_1 = arith.constant 0 : i32
    return %arg0, %c0_i32, %c0_i32_0 : i32, i32, i32
  }
}

module attributes {stable_mosaic.version = 11 : i64} {
  func.func @_resblock_kernel(%arg0: i32, %arg1: memref<1x7x96xbf16, #tpu.memory_space<vmem>>, %arg2: memref<1x96xf32, #tpu.memory_space<vmem>>, %arg3: memref<1x96xf32, #tpu.memory_space<vmem>>, %arg4: memref<1x96xf32, #tpu.memory_space<vmem>>, %arg5: memref<1x96xf32, #tpu.memory_space<vmem>>, %arg6: memref<96x288xbf16, #tpu.memory_space<vmem>>, %arg7: memref<1x288xf32, #tpu.memory_space<vmem>>, %arg8: memref<96x96xbf16, #tpu.memory_space<vmem>>, %arg9: memref<1x96xf32, #tpu.memory_space<vmem>>, %arg10: memref<1x96xf32, #tpu.memory_space<vmem>>, %arg11: memref<1x96xf32, #tpu.memory_space<vmem>>, %arg12: memref<96x384xbf16, #tpu.memory_space<vmem>>, %arg13: memref<1x384xf32, #tpu.memory_space<vmem>>, %arg14: memref<384x96xbf16, #tpu.memory_space<vmem>>, %arg15: memref<1x96xf32, #tpu.memory_space<vmem>>, %arg16: memref<1x7x96xbf16, #tpu.memory_space<vmem>>) attributes {dimension_semantics = [#tpu.dimension_semantics<parallel>], iteration_bounds = array<i64: 2>, scalar_prefetch = 0 : i64, scratch_operands = 0 : i64, tpu.core_type = #tpu.core_type<tc>, window_params = [{transform_indices = @transform_0, window_bounds = array<i64: 1, 7, 96>}, {pipeline_mode = #tpu.pipeline_mode<synchronous>, transform_indices = @transform_1, window_bounds = array<i64: 1, 96>}, {pipeline_mode = #tpu.pipeline_mode<synchronous>, transform_indices = @transform_2, window_bounds = array<i64: 1, 96>}, {pipeline_mode = #tpu.pipeline_mode<synchronous>, transform_indices = @transform_3, window_bounds = array<i64: 1, 96>}, {pipeline_mode = #tpu.pipeline_mode<synchronous>, transform_indices = @transform_4, window_bounds = array<i64: 1, 96>}, {pipeline_mode = #tpu.pipeline_mode<synchronous>, transform_indices = @transform_5, window_bounds = array<i64: 96, 288>}, {pipeline_mode = #tpu.pipeline_mode<synchronous>, transform_indices = @transform_6, window_bounds = array<i64: 1, 288>}, {pipeline_mode = #tpu.pipeline_mode<synchronous>, transform_indices = @transform_7, window_bounds = array<i64: 96, 96>}, {pipeline_mode = #tpu.pipeline_mode<synchronous>, transform_indices = @transform_8, window_bounds = array<i64: 1, 96>}, {pipeline_mode = #tpu.pipeline_mode<synchronous>, transform_indices = @transform_9, window_bounds = array<i64: 1, 96>}, {pipeline_mode = #tpu.pipeline_mode<synchronous>, transform_indices = @transform_10, window_bounds = array<i64: 1, 96>}, {pipeline_mode = #tpu.pipeline_mode<synchronous>, transform_indices = @transform_11, window_bounds = array<i64: 96, 384>}, {pipeline_mode = #tpu.pipeline_mode<synchronous>, transform_indices = @transform_12, window_bounds = array<i64: 1, 384>}, {pipeline_mode = #tpu.pipeline_mode<synchronous>, transform_indices = @transform_13, window_bounds = array<i64: 384, 96>}, {pipeline_mode = #tpu.pipeline_mode<synchronous>, transform_indices = @transform_14, window_bounds = array<i64: 1, 96>}, {transform_indices = @transform_15, window_bounds = array<i64: 1, 7, 96>}]} {
    %c0 = arith.constant 0 : index
    %c0_0 = arith.constant 0 : index
    %c0_1 = arith.constant 0 : index
    %0 = vector.load %arg1[%c0, %c0_0, %c0_1] : memref<1x7x96xbf16, #tpu.memory_space<vmem>>, vector<1x7x96xbf16>
    %1 = vector.shape_cast %0 : vector<1x7x96xbf16> to vector<7x96xbf16>
    %2 = arith.extf %1 : vector<7x96xbf16> to vector<7x96xf32>
    %c0_2 = arith.constant 0 : index
    %c0_3 = arith.constant 0 : index
    %3 = vector.load %arg2[%c0_2, %c0_3] : memref<1x96xf32, #tpu.memory_space<vmem>>, vector<1x96xf32>
    %c0_4 = arith.constant 0 : index
    %c0_5 = arith.constant 0 : index
    %4 = vector.load %arg3[%c0_4, %c0_5] : memref<1x96xf32, #tpu.memory_space<vmem>>, vector<1x96xf32>
    %cst = arith.constant dense<0.000000e+00> : vector<7xf32>
    %5 = vector.multi_reduction <add>, %2, %cst [1] : vector<7x96xf32> to vector<7xf32>
    %6 = vector.shape_cast %5 : vector<7xf32> to vector<7x1xf32>
    %cst_6 = arith.constant 9.600000e+01 : f32
    %7 = vector.broadcast %cst_6 : f32 to vector<7x1xf32>
    %8 = arith.divf %6, %7 : vector<7x1xf32>
    %9 = vector.broadcast %8 : vector<7x1xf32> to vector<7x96xf32>
    %10 = arith.subf %2, %9 : vector<7x96xf32>
    %11 = arith.mulf %10, %10 : vector<7x96xf32>
    %cst_7 = arith.constant dense<0.000000e+00> : vector<7xf32>
    %12 = vector.multi_reduction <add>, %11, %cst_7 [1] : vector<7x96xf32> to vector<7xf32>
    %13 = vector.shape_cast %12 : vector<7xf32> to vector<7x1xf32>
    %cst_8 = arith.constant 9.600000e+01 : f32
    %14 = vector.broadcast %cst_8 : f32 to vector<7x1xf32>
    %15 = arith.divf %13, %14 : vector<7x1xf32>
    %cst_9 = arith.constant 9.99999974E-6 : f32
    %16 = vector.broadcast %cst_9 : f32 to vector<7x1xf32>
    %17 = arith.addf %15, %16 : vector<7x1xf32>
    %18 = math.rsqrt %17 : vector<7x1xf32>
    %19 = vector.broadcast %18 : vector<7x1xf32> to vector<7x96xf32>
    %20 = arith.mulf %10, %19 : vector<7x96xf32>
    %21 = vector.broadcast %3 : vector<1x96xf32> to vector<7x96xf32>
    %22 = arith.mulf %20, %21 : vector<7x96xf32>
    %23 = vector.broadcast %4 : vector<1x96xf32> to vector<7x96xf32>
    %24 = arith.addf %22, %23 : vector<7x96xf32>
    %c0_10 = arith.constant 0 : index
    %c0_11 = arith.constant 0 : index
    %25 = vector.load %arg4[%c0_10, %c0_11] : memref<1x96xf32, #tpu.memory_space<vmem>>, vector<1x96xf32>
    %c0_12 = arith.constant 0 : index
    %c0_13 = arith.constant 0 : index
    %26 = vector.load %arg5[%c0_12, %c0_13] : memref<1x96xf32, #tpu.memory_space<vmem>>, vector<1x96xf32>
    %cst_14 = arith.constant dense<0.000000e+00> : vector<7xf32>
    %27 = vector.multi_reduction <add>, %24, %cst_14 [1] : vector<7x96xf32> to vector<7xf32>
    %28 = vector.shape_cast %27 : vector<7xf32> to vector<7x1xf32>
    %cst_15 = arith.constant 9.600000e+01 : f32
    %29 = vector.broadcast %cst_15 : f32 to vector<7x1xf32>
    %30 = arith.divf %28, %29 : vector<7x1xf32>
    %31 = vector.broadcast %30 : vector<7x1xf32> to vector<7x96xf32>
    %32 = arith.subf %24, %31 : vector<7x96xf32>
    %33 = arith.mulf %32, %32 : vector<7x96xf32>
    %cst_16 = arith.constant dense<0.000000e+00> : vector<7xf32>
    %34 = vector.multi_reduction <add>, %33, %cst_16 [1] : vector<7x96xf32> to vector<7xf32>
    %35 = vector.shape_cast %34 : vector<7xf32> to vector<7x1xf32>
    %cst_17 = arith.constant 9.600000e+01 : f32
    %36 = vector.broadcast %cst_17 : f32 to vector<7x1xf32>
    %37 = arith.divf %35, %36 : vector<7x1xf32>
    %cst_18 = arith.constant 9.99999974E-6 : f32
    %38 = vector.broadcast %cst_18 : f32 to vector<7x1xf32>
    %39 = arith.addf %37, %38 : vector<7x1xf32>
    %40 = math.rsqrt %39 : vector<7x1xf32>
    %41 = vector.broadcast %40 : vector<7x1xf32> to vector<7x96xf32>
    %42 = arith.mulf %32, %41 : vector<7x96xf32>
    %43 = vector.broadcast %25 : vector<1x96xf32> to vector<7x96xf32>
    %44 = arith.mulf %42, %43 : vector<7x96xf32>
    %45 = vector.broadcast %26 : vector<1x96xf32> to vector<7x96xf32>
    %46 = arith.addf %44, %45 : vector<7x96xf32>
    %c0_19 = arith.constant 0 : index
    %c0_20 = arith.constant 0 : index
    %47 = vector.load %arg6[%c0_19, %c0_20] : memref<96x288xbf16, #tpu.memory_space<vmem>>, vector<96x288xbf16>
    %48 = arith.truncf %46 : vector<7x96xf32> to vector<7x96xbf16>
    %cst_21 = arith.constant dense<0.000000e+00> : vector<7x288xf32>
    %49 = tpu.matmul %48, %47, %cst_21 {dimension_numbers = #tpu.dot_dimension_numbers<[1], [0], [0], [1], [0, 0, 1, 1], [], []>} : vector<7x96xbf16>, vector<96x288xbf16>, vector<7x288xf32> -> vector<7x288xf32>
    %c0_22 = arith.constant 0 : index
    %c0_23 = arith.constant 0 : index
    %50 = vector.load %arg7[%c0_22, %c0_23] : memref<1x288xf32, #tpu.memory_space<vmem>>, vector<1x288xf32>
    %51 = vector.broadcast %50 : vector<1x288xf32> to vector<7x288xf32>
    %52 = arith.addf %49, %51 : vector<7x288xf32>
    %53 = vector.extract_strided_slice %52 {offsets = [0, 0], sizes = [7, 24], strides = [1, 1]} : vector<7x288xf32> to vector<7x24xf32>
    %cst_24 = arith.constant 0.204124153 : f32
    %54 = vector.broadcast %cst_24 : f32 to vector<7x24xf32>
    %55 = arith.mulf %53, %54 : vector<7x24xf32>
    %56 = vector.extract_strided_slice %52 {offsets = [0, 96], sizes = [7, 24], strides = [1, 1]} : vector<7x288xf32> to vector<7x24xf32>
    %57 = vector.extract_strided_slice %52 {offsets = [0, 192], sizes = [7, 24], strides = [1, 1]} : vector<7x288xf32> to vector<7x24xf32>
    %58 = arith.truncf %55 : vector<7x24xf32> to vector<7x24xbf16>
    %59 = arith.truncf %56 : vector<7x24xf32> to vector<7x24xbf16>
    %cst_25 = arith.constant dense<0.000000e+00> : vector<7x7xf32>
    %60 = tpu.matmul %58, %59, %cst_25 {dimension_numbers = #tpu.dot_dimension_numbers<[1], [1], [0], [0], [0, 0, 1, 0], [], []>} : vector<7x24xbf16>, vector<7x24xbf16>, vector<7x7xf32> -> vector<7x7xf32>
    %cst_26 = arith.constant dense<0xFF800000> : vector<7xf32>
    %61 = vector.multi_reduction <maximumf>, %60, %cst_26 [1] : vector<7x7xf32> to vector<7xf32>
    %62 = vector.shape_cast %61 : vector<7xf32> to vector<7x1xf32>
    %63 = vector.broadcast %62 : vector<7x1xf32> to vector<7x7xf32>
    %64 = arith.subf %60, %63 : vector<7x7xf32>
    %65 = math.exp %64 : vector<7x7xf32>
    %cst_27 = arith.constant dense<0.000000e+00> : vector<7xf32>
    %66 = vector.multi_reduction <add>, %65, %cst_27 [1] : vector<7x7xf32> to vector<7xf32>
    %67 = vector.shape_cast %66 : vector<7xf32> to vector<7x1xf32>
    %68 = tpu.reciprocal %67 {approx = true} : vector<7x1xf32> -> vector<7x1xf32>
    %69 = vector.broadcast %68 : vector<7x1xf32> to vector<7x7xf32>
    %70 = arith.mulf %65, %69 : vector<7x7xf32>
    %71 = arith.truncf %70 : vector<7x7xf32> to vector<7x7xbf16>
    %72 = arith.truncf %57 : vector<7x24xf32> to vector<7x24xbf16>
    %cst_28 = arith.constant dense<0.000000e+00> : vector<7x24xf32>
    %73 = tpu.matmul %71, %72, %cst_28 {dimension_numbers = #tpu.dot_dimension_numbers<[1], [0], [0], [1], [0, 0, 1, 1], [], []>} : vector<7x7xbf16>, vector<7x24xbf16>, vector<7x24xf32> -> vector<7x24xf32>
    %74 = vector.extract_strided_slice %52 {offsets = [0, 24], sizes = [7, 24], strides = [1, 1]} : vector<7x288xf32> to vector<7x24xf32>
    %cst_29 = arith.constant 0.204124153 : f32
    %75 = vector.broadcast %cst_29 : f32 to vector<7x24xf32>
    %76 = arith.mulf %74, %75 : vector<7x24xf32>
    %77 = vector.extract_strided_slice %52 {offsets = [0, 120], sizes = [7, 24], strides = [1, 1]} : vector<7x288xf32> to vector<7x24xf32>
    %78 = vector.extract_strided_slice %52 {offsets = [0, 216], sizes = [7, 24], strides = [1, 1]} : vector<7x288xf32> to vector<7x24xf32>
    %79 = arith.truncf %76 : vector<7x24xf32> to vector<7x24xbf16>
    %80 = arith.truncf %77 : vector<7x24xf32> to vector<7x24xbf16>
    %cst_30 = arith.constant dense<0.000000e+00> : vector<7x7xf32>
    %81 = tpu.matmul %79, %80, %cst_30 {dimension_numbers = #tpu.dot_dimension_numbers<[1], [1], [0], [0], [0, 0, 1, 0], [], []>} : vector<7x24xbf16>, vector<7x24xbf16>, vector<7x7xf32> -> vector<7x7xf32>
    %cst_31 = arith.constant dense<0xFF800000> : vector<7xf32>
    %82 = vector.multi_reduction <maximumf>, %81, %cst_31 [1] : vector<7x7xf32> to vector<7xf32>
    %83 = vector.shape_cast %82 : vector<7xf32> to vector<7x1xf32>
    %84 = vector.broadcast %83 : vector<7x1xf32> to vector<7x7xf32>
    %85 = arith.subf %81, %84 : vector<7x7xf32>
    %86 = math.exp %85 : vector<7x7xf32>
    %cst_32 = arith.constant dense<0.000000e+00> : vector<7xf32>
    %87 = vector.multi_reduction <add>, %86, %cst_32 [1] : vector<7x7xf32> to vector<7xf32>
    %88 = vector.shape_cast %87 : vector<7xf32> to vector<7x1xf32>
    %89 = tpu.reciprocal %88 {approx = true} : vector<7x1xf32> -> vector<7x1xf32>
    %90 = vector.broadcast %89 : vector<7x1xf32> to vector<7x7xf32>
    %91 = arith.mulf %86, %90 : vector<7x7xf32>
    %92 = arith.truncf %91 : vector<7x7xf32> to vector<7x7xbf16>
    %93 = arith.truncf %78 : vector<7x24xf32> to vector<7x24xbf16>
    %cst_33 = arith.constant dense<0.000000e+00> : vector<7x24xf32>
    %94 = tpu.matmul %92, %93, %cst_33 {dimension_numbers = #tpu.dot_dimension_numbers<[1], [0], [0], [1], [0, 0, 1, 1], [], []>} : vector<7x7xbf16>, vector<7x24xbf16>, vector<7x24xf32> -> vector<7x24xf32>
    %95 = vector.extract_strided_slice %52 {offsets = [0, 48], sizes = [7, 24], strides = [1, 1]} : vector<7x288xf32> to vector<7x24xf32>
    %cst_34 = arith.constant 0.204124153 : f32
    %96 = vector.broadcast %cst_34 : f32 to vector<7x24xf32>
    %97 = arith.mulf %95, %96 : vector<7x24xf32>
    %98 = vector.extract_strided_slice %52 {offsets = [0, 144], sizes = [7, 24], strides = [1, 1]} : vector<7x288xf32> to vector<7x24xf32>
    %99 = vector.extract_strided_slice %52 {offsets = [0, 240], sizes = [7, 24], strides = [1, 1]} : vector<7x288xf32> to vector<7x24xf32>
    %100 = arith.truncf %97 : vector<7x24xf32> to vector<7x24xbf16>
    %101 = arith.truncf %98 : vector<7x24xf32> to vector<7x24xbf16>
    %cst_35 = arith.constant dense<0.000000e+00> : vector<7x7xf32>
    %102 = tpu.matmul %100, %101, %cst_35 {dimension_numbers = #tpu.dot_dimension_numbers<[1], [1], [0], [0], [0, 0, 1, 0], [], []>} : vector<7x24xbf16>, vector<7x24xbf16>, vector<7x7xf32> -> vector<7x7xf32>
    %cst_36 = arith.constant dense<0xFF800000> : vector<7xf32>
    %103 = vector.multi_reduction <maximumf>, %102, %cst_36 [1] : vector<7x7xf32> to vector<7xf32>
    %104 = vector.shape_cast %103 : vector<7xf32> to vector<7x1xf32>
    %105 = vector.broadcast %104 : vector<7x1xf32> to vector<7x7xf32>
    %106 = arith.subf %102, %105 : vector<7x7xf32>
    %107 = math.exp %106 : vector<7x7xf32>
    %cst_37 = arith.constant dense<0.000000e+00> : vector<7xf32>
    %108 = vector.multi_reduction <add>, %107, %cst_37 [1] : vector<7x7xf32> to vector<7xf32>
    %109 = vector.shape_cast %108 : vector<7xf32> to vector<7x1xf32>
    %110 = tpu.reciprocal %109 {approx = true} : vector<7x1xf32> -> vector<7x1xf32>
    %111 = vector.broadcast %110 : vector<7x1xf32> to vector<7x7xf32>
    %112 = arith.mulf %107, %111 : vector<7x7xf32>
    %113 = arith.truncf %112 : vector<7x7xf32> to vector<7x7xbf16>
    %114 = arith.truncf %99 : vector<7x24xf32> to vector<7x24xbf16>
    %cst_38 = arith.constant dense<0.000000e+00> : vector<7x24xf32>
    %115 = tpu.matmul %113, %114, %cst_38 {dimension_numbers = #tpu.dot_dimension_numbers<[1], [0], [0], [1], [0, 0, 1, 1], [], []>} : vector<7x7xbf16>, vector<7x24xbf16>, vector<7x24xf32> -> vector<7x24xf32>
    %116 = vector.extract_strided_slice %52 {offsets = [0, 72], sizes = [7, 24], strides = [1, 1]} : vector<7x288xf32> to vector<7x24xf32>
    %cst_39 = arith.constant 0.204124153 : f32
    %117 = vector.broadcast %cst_39 : f32 to vector<7x24xf32>
    %118 = arith.mulf %116, %117 : vector<7x24xf32>
    %119 = vector.extract_strided_slice %52 {offsets = [0, 168], sizes = [7, 24], strides = [1, 1]} : vector<7x288xf32> to vector<7x24xf32>
    %120 = vector.extract_strided_slice %52 {offsets = [0, 264], sizes = [7, 24], strides = [1, 1]} : vector<7x288xf32> to vector<7x24xf32>
    %121 = arith.truncf %118 : vector<7x24xf32> to vector<7x24xbf16>
    %122 = arith.truncf %119 : vector<7x24xf32> to vector<7x24xbf16>
    %cst_40 = arith.constant dense<0.000000e+00> : vector<7x7xf32>
    %123 = tpu.matmul %121, %122, %cst_40 {dimension_numbers = #tpu.dot_dimension_numbers<[1], [1], [0], [0], [0, 0, 1, 0], [], []>} : vector<7x24xbf16>, vector<7x24xbf16>, vector<7x7xf32> -> vector<7x7xf32>
    %cst_41 = arith.constant dense<0xFF800000> : vector<7xf32>
    %124 = vector.multi_reduction <maximumf>, %123, %cst_41 [1] : vector<7x7xf32> to vector<7xf32>
    %125 = vector.shape_cast %124 : vector<7xf32> to vector<7x1xf32>
    %126 = vector.broadcast %125 : vector<7x1xf32> to vector<7x7xf32>
    %127 = arith.subf %123, %126 : vector<7x7xf32>
    %128 = math.exp %127 : vector<7x7xf32>
    %cst_42 = arith.constant dense<0.000000e+00> : vector<7xf32>
    %129 = vector.multi_reduction <add>, %128, %cst_42 [1] : vector<7x7xf32> to vector<7xf32>
    %130 = vector.shape_cast %129 : vector<7xf32> to vector<7x1xf32>
    %131 = tpu.reciprocal %130 {approx = true} : vector<7x1xf32> -> vector<7x1xf32>
    %132 = vector.broadcast %131 : vector<7x1xf32> to vector<7x7xf32>
    %133 = arith.mulf %128, %132 : vector<7x7xf32>
    %134 = arith.truncf %133 : vector<7x7xf32> to vector<7x7xbf16>
    %135 = arith.truncf %120 : vector<7x24xf32> to vector<7x24xbf16>
    %cst_43 = arith.constant dense<0.000000e+00> : vector<7x24xf32>
    %136 = tpu.matmul %134, %135, %cst_43 {dimension_numbers = #tpu.dot_dimension_numbers<[1], [0], [0], [1], [0, 0, 1, 1], [], []>} : vector<7x7xbf16>, vector<7x24xbf16>, vector<7x24xf32> -> vector<7x24xf32>
    %137 = tpu.concatenate %73, %94, %115, %136 in 1 : vector<7x24xf32>, vector<7x24xf32>, vector<7x24xf32>, vector<7x24xf32> -> vector<7x96xf32>
    %c0_44 = arith.constant 0 : index
    %c0_45 = arith.constant 0 : index
    %138 = vector.load %arg8[%c0_44, %c0_45] : memref<96x96xbf16, #tpu.memory_space<vmem>>, vector<96x96xbf16>
    %139 = arith.truncf %137 : vector<7x96xf32> to vector<7x96xbf16>
    %cst_46 = arith.constant dense<0.000000e+00> : vector<7x96xf32>
    %140 = tpu.matmul %139, %138, %cst_46 {dimension_numbers = #tpu.dot_dimension_numbers<[1], [0], [0], [1], [0, 0, 1, 1], [], []>} : vector<7x96xbf16>, vector<96x96xbf16>, vector<7x96xf32> -> vector<7x96xf32>
    %141 = arith.addf %24, %140 : vector<7x96xf32>
    %c0_47 = arith.constant 0 : index
    %c0_48 = arith.constant 0 : index
    %142 = vector.load %arg9[%c0_47, %c0_48] : memref<1x96xf32, #tpu.memory_space<vmem>>, vector<1x96xf32>
    %143 = vector.broadcast %142 : vector<1x96xf32> to vector<7x96xf32>
    %144 = arith.addf %141, %143 : vector<7x96xf32>
    %c0_49 = arith.constant 0 : index
    %c0_50 = arith.constant 0 : index
    %145 = vector.load %arg10[%c0_49, %c0_50] : memref<1x96xf32, #tpu.memory_space<vmem>>, vector<1x96xf32>
    %c0_51 = arith.constant 0 : index
    %c0_52 = arith.constant 0 : index
    %146 = vector.load %arg11[%c0_51, %c0_52] : memref<1x96xf32, #tpu.memory_space<vmem>>, vector<1x96xf32>
    %cst_53 = arith.constant dense<0.000000e+00> : vector<7xf32>
    %147 = vector.multi_reduction <add>, %144, %cst_53 [1] : vector<7x96xf32> to vector<7xf32>
    %148 = vector.shape_cast %147 : vector<7xf32> to vector<7x1xf32>
    %cst_54 = arith.constant 9.600000e+01 : f32
    %149 = vector.broadcast %cst_54 : f32 to vector<7x1xf32>
    %150 = arith.divf %148, %149 : vector<7x1xf32>
    %151 = vector.broadcast %150 : vector<7x1xf32> to vector<7x96xf32>
    %152 = arith.subf %144, %151 : vector<7x96xf32>
    %153 = arith.mulf %152, %152 : vector<7x96xf32>
    %cst_55 = arith.constant dense<0.000000e+00> : vector<7xf32>
    %154 = vector.multi_reduction <add>, %153, %cst_55 [1] : vector<7x96xf32> to vector<7xf32>
    %155 = vector.shape_cast %154 : vector<7xf32> to vector<7x1xf32>
    %cst_56 = arith.constant 9.600000e+01 : f32
    %156 = vector.broadcast %cst_56 : f32 to vector<7x1xf32>
    %157 = arith.divf %155, %156 : vector<7x1xf32>
    %cst_57 = arith.constant 9.99999974E-6 : f32
    %158 = vector.broadcast %cst_57 : f32 to vector<7x1xf32>
    %159 = arith.addf %157, %158 : vector<7x1xf32>
    %160 = math.rsqrt %159 : vector<7x1xf32>
    %161 = vector.broadcast %160 : vector<7x1xf32> to vector<7x96xf32>
    %162 = arith.mulf %152, %161 : vector<7x96xf32>
    %163 = vector.broadcast %145 : vector<1x96xf32> to vector<7x96xf32>
    %164 = arith.mulf %162, %163 : vector<7x96xf32>
    %165 = vector.broadcast %146 : vector<1x96xf32> to vector<7x96xf32>
    %166 = arith.addf %164, %165 : vector<7x96xf32>
    %c0_58 = arith.constant 0 : index
    %c0_59 = arith.constant 0 : index
    %167 = vector.load %arg12[%c0_58, %c0_59] : memref<96x384xbf16, #tpu.memory_space<vmem>>, vector<96x384xbf16>
    %168 = arith.truncf %166 : vector<7x96xf32> to vector<7x96xbf16>
    %cst_60 = arith.constant dense<0.000000e+00> : vector<7x384xf32>
    %169 = tpu.matmul %168, %167, %cst_60 {dimension_numbers = #tpu.dot_dimension_numbers<[1], [0], [0], [1], [0, 0, 1, 1], [], []>} : vector<7x96xbf16>, vector<96x384xbf16>, vector<7x384xf32> -> vector<7x384xf32>
    %c0_61 = arith.constant 0 : index
    %c0_62 = arith.constant 0 : index
    %170 = vector.load %arg13[%c0_61, %c0_62] : memref<1x384xf32, #tpu.memory_space<vmem>>, vector<1x384xf32>
    %171 = vector.broadcast %170 : vector<1x384xf32> to vector<7x384xf32>
    %172 = arith.addf %169, %171 : vector<7x384xf32>
    %cst_63 = arith.constant 1.702000e+00 : f32
    %173 = vector.broadcast %cst_63 : f32 to vector<7x384xf32>
    %174 = arith.mulf %173, %172 : vector<7x384xf32>
    %175 = arith.negf %174 : vector<7x384xf32>
    %176 = math.exp %175 : vector<7x384xf32>
    %cst_64 = arith.constant 1.000000e+00 : f32
    %177 = vector.broadcast %cst_64 : f32 to vector<7x384xf32>
    %178 = arith.addf %177, %176 : vector<7x384xf32>
    %179 = arith.divf %177, %178 : vector<7x384xf32>
    %180 = arith.mulf %172, %179 : vector<7x384xf32>
    %c0_65 = arith.constant 0 : index
    %c0_66 = arith.constant 0 : index
    %181 = vector.load %arg14[%c0_65, %c0_66] : memref<384x96xbf16, #tpu.memory_space<vmem>>, vector<384x96xbf16>
    %182 = arith.truncf %180 : vector<7x384xf32> to vector<7x384xbf16>
    %cst_67 = arith.constant dense<0.000000e+00> : vector<7x96xf32>
    %183 = tpu.matmul %182, %181, %cst_67 {dimension_numbers = #tpu.dot_dimension_numbers<[1], [0], [0], [1], [0, 0, 1, 1], [], []>} : vector<7x384xbf16>, vector<384x96xbf16>, vector<7x96xf32> -> vector<7x96xf32>
    %c0_68 = arith.constant 0 : index
    %c0_69 = arith.constant 0 : index
    %184 = vector.load %arg15[%c0_68, %c0_69] : memref<1x96xf32, #tpu.memory_space<vmem>>, vector<1x96xf32>
    %185 = vector.broadcast %184 : vector<1x96xf32> to vector<7x96xf32>
    %186 = arith.addf %183, %185 : vector<7x96xf32>
    %187 = arith.addf %144, %186 : vector<7x96xf32>
    %188 = arith.truncf %187 : vector<7x96xf32> to vector<7x96xbf16>
    %c0_70 = arith.constant 0 : index
    %c0_71 = arith.constant 0 : index
    %c0_72 = arith.constant 0 : index
    %189 = vector.load %arg16[%c0_70, %c0_71, %c0_72] : memref<1x7x96xbf16, #tpu.memory_space<vmem>>, vector<1x7x96xbf16>
    %190 = vector.shape_cast %189 : vector<1x7x96xbf16> to vector<7x96xbf16>
    %191 = vector.shape_cast %188 : vector<7x96xbf16> to vector<1x7x96xbf16>
    tpu.vector_store %arg16[%c0_70, %c0_71, %c0_72], %191 {strides = array<i32>} : memref<1x7x96xbf16, #tpu.memory_space<vmem>>, vector<1x7x96xbf16>,
    return
  }
  func.func @transform_0(%arg0: i32) -> (i32, i32, i32) {
    %c0_i32 = arith.constant 0 : i32
    %c0_i32_0 = arith.constant 0 : i32
    %c0_i32_1 = arith.constant 0 : i32
    return %arg0, %c0_i32, %c0_i32_0 : i32, i32, i32
  }
  func.func @transform_1(%arg0: i32) -> (i32, i32) {
    %c0_i32 = arith.constant 0 : i32
    %c0_i32_0 = arith.constant 0 : i32
    %c0_i32_1 = arith.constant 0 : i32
    return %c0_i32, %c0_i32_0 : i32, i32
  }
  func.func @transform_2(%arg0: i32) -> (i32, i32) {
    %c0_i32 = arith.constant 0 : i32
    %c0_i32_0 = arith.constant 0 : i32
    %c0_i32_1 = arith.constant 0 : i32
    return %c0_i32, %c0_i32_0 : i32, i32
  }
  func.func @transform_3(%arg0: i32) -> (i32, i32) {
    %c0_i32 = arith.constant 0 : i32
    %c0_i32_0 = arith.constant 0 : i32
    %c0_i32_1 = arith.constant 0 : i32
    return %c0_i32, %c0_i32_0 : i32, i32
  }
  func.func @transform_4(%arg0: i32) -> (i32, i32) {
    %c0_i32 = arith.constant 0 : i32
    %c0_i32_0 = arith.constant 0 : i32
    %c0_i32_1 = arith.constant 0 : i32
    return %c0_i32, %c0_i32_0 : i32, i32
  }
  func.func @transform_5(%arg0: i32) -> (i32, i32) {
    %c0_i32 = arith.constant 0 : i32
    %c0_i32_0 = arith.constant 0 : i32
    %c0_i32_1 = arith.constant 0 : i32
    return %c0_i32, %c0_i32_0 : i32, i32
  }
  func.func @transform_6(%arg0: i32) -> (i32, i32) {
    %c0_i32 = arith.constant 0 : i32
    %c0_i32_0 = arith.constant 0 : i32
    %c0_i32_1 = arith.constant 0 : i32
    return %c0_i32, %c0_i32_0 : i32, i32
  }
  func.func @transform_7(%arg0: i32) -> (i32, i32) {
    %c0_i32 = arith.constant 0 : i32
    %c0_i32_0 = arith.constant 0 : i32
    %c0_i32_1 = arith.constant 0 : i32
    return %c0_i32, %c0_i32_0 : i32, i32
  }
  func.func @transform_8(%arg0: i32) -> (i32, i32) {
    %c0_i32 = arith.constant 0 : i32
    %c0_i32_0 = arith.constant 0 : i32
    %c0_i32_1 = arith.constant 0 : i32
    return %c0_i32, %c0_i32_0 : i32, i32
  }
  func.func @transform_9(%arg0: i32) -> (i32, i32) {
    %c0_i32 = arith.constant 0 : i32
    %c0_i32_0 = arith.constant 0 : i32
    %c0_i32_1 = arith.constant 0 : i32
    return %c0_i32, %c0_i32_0 : i32, i32
  }
  func.func @transform_10(%arg0: i32) -> (i32, i32) {
    %c0_i32 = arith.constant 0 : i32
    %c0_i32_0 = arith.constant 0 : i32
    %c0_i32_1 = arith.constant 0 : i32
    return %c0_i32, %c0_i32_0 : i32, i32
  }
  func.func @transform_11(%arg0: i32) -> (i32, i32) {
    %c0_i32 = arith.constant 0 : i32
    %c0_i32_0 = arith.constant 0 : i32
    %c0_i32_1 = arith.constant 0 : i32
    return %c0_i32, %c0_i32_0 : i32, i32
  }
  func.func @transform_12(%arg0: i32) -> (i32, i32) {
    %c0_i32 = arith.constant 0 : i32
    %c0_i32_0 = arith.constant 0 : i32
    %c0_i32_1 = arith.constant 0 : i32
    return %c0_i32, %c0_i32_0 : i32, i32
  }
  func.func @transform_13(%arg0: i32) -> (i32, i32) {
    %c0_i32 = arith.constant 0 : i32
    %c0_i32_0 = arith.constant 0 : i32
    %c0_i32_1 = arith.constant 0 : i32
    return %c0_i32, %c0_i32_0 : i32, i32
  }
  func.func @transform_14(%arg0: i32) -> (i32, i32) {
    %c0_i32 = arith.constant 0 : i32
    %c0_i32_0 = arith.constant 0 : i32
    %c0_i32_1 = arith.constant 0 : i32
    return %c0_i32, %c0_i32_0 : i32, i32
  }
  func.func @transform_15(%arg0: i32) -> (i32, i32, i32) {
    %c0_i32 = arith.constant 0 : i32
    %c0_i32_0 = arith.constant 0 : i32
    %c0_i32_1 = arith.constant 0 : i32
    return %arg0, %c0_i32, %c0_i32_0 : i32, i32, i32
  }
}

module attributes {stable_mosaic.version = 11 : i64} {
  func.func @_post_kernel(%arg0: memref<2x96xbf16, #tpu.memory_space<vmem>>, %arg1: memref<1x96xf32, #tpu.memory_space<vmem>>, %arg2: memref<1x96xf32, #tpu.memory_space<vmem>>, %arg3: memref<96x64xbf16, #tpu.memory_space<vmem>>, %arg4: memref<2x64xf32, #tpu.memory_space<vmem>>) attributes {dimension_semantics = [], scalar_prefetch = 0 : i64, scratch_operands = 0 : i64, tpu.core_type = #tpu.core_type<tc>} {
    %c0 = arith.constant 0 : index
    %c0_0 = arith.constant 0 : index
    %0 = vector.load %arg0[%c0, %c0_0] : memref<2x96xbf16, #tpu.memory_space<vmem>>, vector<2x96xbf16>
    %1 = arith.extf %0 : vector<2x96xbf16> to vector<2x96xf32>
    %c0_1 = arith.constant 0 : index
    %c0_2 = arith.constant 0 : index
    %2 = vector.load %arg1[%c0_1, %c0_2] : memref<1x96xf32, #tpu.memory_space<vmem>>, vector<1x96xf32>
    %c0_3 = arith.constant 0 : index
    %c0_4 = arith.constant 0 : index
    %3 = vector.load %arg2[%c0_3, %c0_4] : memref<1x96xf32, #tpu.memory_space<vmem>>, vector<1x96xf32>
    %cst = arith.constant dense<0.000000e+00> : vector<2xf32>
    %4 = vector.multi_reduction <add>, %1, %cst [1] : vector<2x96xf32> to vector<2xf32>
    %5 = vector.shape_cast %4 : vector<2xf32> to vector<2x1xf32>
    %cst_5 = arith.constant 9.600000e+01 : f32
    %6 = vector.broadcast %cst_5 : f32 to vector<2x1xf32>
    %7 = arith.divf %5, %6 : vector<2x1xf32>
    %8 = vector.broadcast %7 : vector<2x1xf32> to vector<2x96xf32>
    %9 = arith.subf %1, %8 : vector<2x96xf32>
    %10 = arith.mulf %9, %9 : vector<2x96xf32>
    %cst_6 = arith.constant dense<0.000000e+00> : vector<2xf32>
    %11 = vector.multi_reduction <add>, %10, %cst_6 [1] : vector<2x96xf32> to vector<2xf32>
    %12 = vector.shape_cast %11 : vector<2xf32> to vector<2x1xf32>
    %cst_7 = arith.constant 9.600000e+01 : f32
    %13 = vector.broadcast %cst_7 : f32 to vector<2x1xf32>
    %14 = arith.divf %12, %13 : vector<2x1xf32>
    %cst_8 = arith.constant 9.99999974E-6 : f32
    %15 = vector.broadcast %cst_8 : f32 to vector<2x1xf32>
    %16 = arith.addf %14, %15 : vector<2x1xf32>
    %17 = math.rsqrt %16 : vector<2x1xf32>
    %18 = vector.broadcast %17 : vector<2x1xf32> to vector<2x96xf32>
    %19 = arith.mulf %9, %18 : vector<2x96xf32>
    %20 = vector.broadcast %2 : vector<1x96xf32> to vector<2x96xf32>
    %21 = arith.mulf %19, %20 : vector<2x96xf32>
    %22 = vector.broadcast %3 : vector<1x96xf32> to vector<2x96xf32>
    %23 = arith.addf %21, %22 : vector<2x96xf32>
    %c0_9 = arith.constant 0 : index
    %c0_10 = arith.constant 0 : index
    %24 = vector.load %arg3[%c0_9, %c0_10] : memref<96x64xbf16, #tpu.memory_space<vmem>>, vector<96x64xbf16>
    %25 = arith.truncf %23 : vector<2x96xf32> to vector<2x96xbf16>
    %cst_11 = arith.constant dense<0.000000e+00> : vector<2x64xf32>
    %26 = tpu.matmul %25, %24, %cst_11 {dimension_numbers = #tpu.dot_dimension_numbers<[1], [0], [0], [1], [0, 0, 1, 1], [], []>} : vector<2x96xbf16>, vector<96x64xbf16>, vector<2x64xf32> -> vector<2x64xf32>
    %27 = arith.mulf %26, %26 : vector<2x64xf32>
    %cst_12 = arith.constant dense<0.000000e+00> : vector<2xf32>
    %28 = vector.multi_reduction <add>, %27, %cst_12 [1] : vector<2x64xf32> to vector<2xf32>
    %29 = vector.shape_cast %28 : vector<2xf32> to vector<2x1xf32>
    %cst_13 = arith.constant 9.99999996E-13 : f32
    %30 = vector.broadcast %cst_13 : f32 to vector<2x1xf32>
    %31 = arith.addf %29, %30 : vector<2x1xf32>
    %32 = math.rsqrt %31 : vector<2x1xf32>
    %33 = vector.broadcast %32 : vector<2x1xf32> to vector<2x64xf32>
    %34 = arith.mulf %26, %33 : vector<2x64xf32>
    %c0_14 = arith.constant 0 : index
    %c0_15 = arith.constant 0 : index
    %35 = vector.load %arg4[%c0_14, %c0_15] : memref<2x64xf32, #tpu.memory_space<vmem>>, vector<2x64xf32>
    tpu.vector_store %arg4[%c0_14, %c0_15], %34 {strides = array<i32>} : memref<2x64xf32, #tpu.memory_space<vmem>>, vector<2x64xf32>,
    return
  }
}

module attributes {stable_mosaic.version = 11 : i64} {
  func.func @_resblock_kernel(%arg0: i32, %arg1: memref<1x8x64xbf16, #tpu.memory_space<vmem>>, %arg2: memref<8x8xf32, #tpu.memory_space<vmem>>, %arg3: memref<1x64xf32, #tpu.memory_space<vmem>>, %arg4: memref<1x64xf32, #tpu.memory_space<vmem>>, %arg5: memref<64x192xbf16, #tpu.memory_space<vmem>>, %arg6: memref<1x192xf32, #tpu.memory_space<vmem>>, %arg7: memref<64x64xbf16, #tpu.memory_space<vmem>>, %arg8: memref<1x64xf32, #tpu.memory_space<vmem>>, %arg9: memref<1x64xf32, #tpu.memory_space<vmem>>, %arg10: memref<1x64xf32, #tpu.memory_space<vmem>>, %arg11: memref<64x256xbf16, #tpu.memory_space<vmem>>, %arg12: memref<1x256xf32, #tpu.memory_space<vmem>>, %arg13: memref<256x64xbf16, #tpu.memory_space<vmem>>, %arg14: memref<1x64xf32, #tpu.memory_space<vmem>>, %arg15: memref<1x8x64xbf16, #tpu.memory_space<vmem>>) attributes {dimension_semantics = [#tpu.dimension_semantics<parallel>], iteration_bounds = array<i64: 3>, scalar_prefetch = 0 : i64, scratch_operands = 0 : i64, tpu.core_type = #tpu.core_type<tc>, window_params = [{transform_indices = @transform_0, window_bounds = array<i64: 1, 8, 64>}, {pipeline_mode = #tpu.pipeline_mode<synchronous>, transform_indices = @transform_1, window_bounds = array<i64: 8, 8>}, {pipeline_mode = #tpu.pipeline_mode<synchronous>, transform_indices = @transform_2, window_bounds = array<i64: 1, 64>}, {pipeline_mode = #tpu.pipeline_mode<synchronous>, transform_indices = @transform_3, window_bounds = array<i64: 1, 64>}, {pipeline_mode = #tpu.pipeline_mode<synchronous>, transform_indices = @transform_4, window_bounds = array<i64: 64, 192>}, {pipeline_mode = #tpu.pipeline_mode<synchronous>, transform_indices = @transform_5, window_bounds = array<i64: 1, 192>}, {pipeline_mode = #tpu.pipeline_mode<synchronous>, transform_indices = @transform_6, window_bounds = array<i64: 64, 64>}, {pipeline_mode = #tpu.pipeline_mode<synchronous>, transform_indices = @transform_7, window_bounds = array<i64: 1, 64>}, {pipeline_mode = #tpu.pipeline_mode<synchronous>, transform_indices = @transform_8, window_bounds = array<i64: 1, 64>}, {pipeline_mode = #tpu.pipeline_mode<synchronous>, transform_indices = @transform_9, window_bounds = array<i64: 1, 64>}, {pipeline_mode = #tpu.pipeline_mode<synchronous>, transform_indices = @transform_10, window_bounds = array<i64: 64, 256>}, {pipeline_mode = #tpu.pipeline_mode<synchronous>, transform_indices = @transform_11, window_bounds = array<i64: 1, 256>}, {pipeline_mode = #tpu.pipeline_mode<synchronous>, transform_indices = @transform_12, window_bounds = array<i64: 256, 64>}, {pipeline_mode = #tpu.pipeline_mode<synchronous>, transform_indices = @transform_13, window_bounds = array<i64: 1, 64>}, {transform_indices = @transform_14, window_bounds = array<i64: 1, 8, 64>}]} {
    %c0 = arith.constant 0 : index
    %c0_0 = arith.constant 0 : index
    %c0_1 = arith.constant 0 : index
    %0 = vector.load %arg1[%c0, %c0_0, %c0_1] : memref<1x8x64xbf16, #tpu.memory_space<vmem>>, vector<1x8x64xbf16>
    %1 = vector.shape_cast %0 : vector<1x8x64xbf16> to vector<8x64xbf16>
    %2 = arith.extf %1 : vector<8x64xbf16> to vector<8x64xf32>
    %c0_2 = arith.constant 0 : index
    %c0_3 = arith.constant 0 : index
    %3 = vector.load %arg3[%c0_2, %c0_3] : memref<1x64xf32, #tpu.memory_space<vmem>>, vector<1x64xf32>
    %c0_4 = arith.constant 0 : index
    %c0_5 = arith.constant 0 : index
    %4 = vector.load %arg4[%c0_4, %c0_5] : memref<1x64xf32, #tpu.memory_space<vmem>>, vector<1x64xf32>
    %cst = arith.constant dense<0.000000e+00> : vector<8xf32>
    %5 = vector.multi_reduction <add>, %2, %cst [1] : vector<8x64xf32> to vector<8xf32>
    %6 = vector.shape_cast %5 : vector<8xf32> to vector<8x1xf32>
    %cst_6 = arith.constant 6.400000e+01 : f32
    %7 = vector.broadcast %cst_6 : f32 to vector<8x1xf32>
    %8 = arith.divf %6, %7 : vector<8x1xf32>
    %9 = vector.broadcast %8 : vector<8x1xf32> to vector<8x64xf32>
    %10 = arith.subf %2, %9 : vector<8x64xf32>
    %11 = arith.mulf %10, %10 : vector<8x64xf32>
    %cst_7 = arith.constant dense<0.000000e+00> : vector<8xf32>
    %12 = vector.multi_reduction <add>, %11, %cst_7 [1] : vector<8x64xf32> to vector<8xf32>
    %13 = vector.shape_cast %12 : vector<8xf32> to vector<8x1xf32>
    %cst_8 = arith.constant 6.400000e+01 : f32
    %14 = vector.broadcast %cst_8 : f32 to vector<8x1xf32>
    %15 = arith.divf %13, %14 : vector<8x1xf32>
    %cst_9 = arith.constant 9.99999974E-6 : f32
    %16 = vector.broadcast %cst_9 : f32 to vector<8x1xf32>
    %17 = arith.addf %15, %16 : vector<8x1xf32>
    %18 = math.rsqrt %17 : vector<8x1xf32>
    %19 = vector.broadcast %18 : vector<8x1xf32> to vector<8x64xf32>
    %20 = arith.mulf %10, %19 : vector<8x64xf32>
    %21 = vector.broadcast %3 : vector<1x64xf32> to vector<8x64xf32>
    %22 = arith.mulf %20, %21 : vector<8x64xf32>
    %23 = vector.broadcast %4 : vector<1x64xf32> to vector<8x64xf32>
    %24 = arith.addf %22, %23 : vector<8x64xf32>
    %c0_10 = arith.constant 0 : index
    %c0_11 = arith.constant 0 : index
    %25 = vector.load %arg5[%c0_10, %c0_11] : memref<64x192xbf16, #tpu.memory_space<vmem>>, vector<64x192xbf16>
    %26 = arith.truncf %24 : vector<8x64xf32> to vector<8x64xbf16>
    %cst_12 = arith.constant dense<0.000000e+00> : vector<8x192xf32>
    %27 = tpu.matmul %26, %25, %cst_12 {dimension_numbers = #tpu.dot_dimension_numbers<[1], [0], [0], [1], [0, 0, 1, 1], [], []>} : vector<8x64xbf16>, vector<64x192xbf16>, vector<8x192xf32> -> vector<8x192xf32>
    %c0_13 = arith.constant 0 : index
    %c0_14 = arith.constant 0 : index
    %28 = vector.load %arg6[%c0_13, %c0_14] : memref<1x192xf32, #tpu.memory_space<vmem>>, vector<1x192xf32>
    %29 = vector.broadcast %28 : vector<1x192xf32> to vector<8x192xf32>
    %30 = arith.addf %27, %29 : vector<8x192xf32>
    %31 = vector.extract_strided_slice %30 {offsets = [0, 0], sizes = [8, 16], strides = [1, 1]} : vector<8x192xf32> to vector<8x16xf32>
    %cst_15 = arith.constant 2.500000e-01 : f32
    %32 = vector.broadcast %cst_15 : f32 to vector<8x16xf32>
    %33 = arith.mulf %31, %32 : vector<8x16xf32>
    %34 = vector.extract_strided_slice %30 {offsets = [0, 64], sizes = [8, 16], strides = [1, 1]} : vector<8x192xf32> to vector<8x16xf32>
    %35 = vector.extract_strided_slice %30 {offsets = [0, 128], sizes = [8, 16], strides = [1, 1]} : vector<8x192xf32> to vector<8x16xf32>
    %36 = arith.truncf %33 : vector<8x16xf32> to vector<8x16xbf16>
    %37 = arith.truncf %34 : vector<8x16xf32> to vector<8x16xbf16>
    %cst_16 = arith.constant dense<0.000000e+00> : vector<8x8xf32>
    %38 = tpu.matmul %36, %37, %cst_16 {dimension_numbers = #tpu.dot_dimension_numbers<[1], [1], [0], [0], [0, 0, 1, 0], [], []>} : vector<8x16xbf16>, vector<8x16xbf16>, vector<8x8xf32> -> vector<8x8xf32>
    %c0_17 = arith.constant 0 : index
    %c0_18 = arith.constant 0 : index
    %39 = vector.load %arg2[%c0_17, %c0_18] : memref<8x8xf32, #tpu.memory_space<vmem>>, vector<8x8xf32>
    %40 = arith.addf %38, %39 : vector<8x8xf32>
    %cst_19 = arith.constant dense<0xFF800000> : vector<8xf32>
    %41 = vector.multi_reduction <maximumf>, %40, %cst_19 [1] : vector<8x8xf32> to vector<8xf32>
    %42 = vector.shape_cast %41 : vector<8xf32> to vector<8x1xf32>
    %43 = vector.broadcast %42 : vector<8x1xf32> to vector<8x8xf32>
    %44 = arith.subf %40, %43 : vector<8x8xf32>
    %45 = math.exp %44 : vector<8x8xf32>
    %cst_20 = arith.constant dense<0.000000e+00> : vector<8xf32>
    %46 = vector.multi_reduction <add>, %45, %cst_20 [1] : vector<8x8xf32> to vector<8xf32>
    %47 = vector.shape_cast %46 : vector<8xf32> to vector<8x1xf32>
    %48 = tpu.reciprocal %47 {approx = true} : vector<8x1xf32> -> vector<8x1xf32>
    %49 = vector.broadcast %48 : vector<8x1xf32> to vector<8x8xf32>
    %50 = arith.mulf %45, %49 : vector<8x8xf32>
    %51 = arith.truncf %50 : vector<8x8xf32> to vector<8x8xbf16>
    %52 = arith.truncf %35 : vector<8x16xf32> to vector<8x16xbf16>
    %cst_21 = arith.constant dense<0.000000e+00> : vector<8x16xf32>
    %53 = tpu.matmul %51, %52, %cst_21 {dimension_numbers = #tpu.dot_dimension_numbers<[1], [0], [0], [1], [0, 0, 1, 1], [], []>} : vector<8x8xbf16>, vector<8x16xbf16>, vector<8x16xf32> -> vector<8x16xf32>
    %54 = vector.extract_strided_slice %30 {offsets = [0, 16], sizes = [8, 16], strides = [1, 1]} : vector<8x192xf32> to vector<8x16xf32>
    %cst_22 = arith.constant 2.500000e-01 : f32
    %55 = vector.broadcast %cst_22 : f32 to vector<8x16xf32>
    %56 = arith.mulf %54, %55 : vector<8x16xf32>
    %57 = vector.extract_strided_slice %30 {offsets = [0, 80], sizes = [8, 16], strides = [1, 1]} : vector<8x192xf32> to vector<8x16xf32>
    %58 = vector.extract_strided_slice %30 {offsets = [0, 144], sizes = [8, 16], strides = [1, 1]} : vector<8x192xf32> to vector<8x16xf32>
    %59 = arith.truncf %56 : vector<8x16xf32> to vector<8x16xbf16>
    %60 = arith.truncf %57 : vector<8x16xf32> to vector<8x16xbf16>
    %cst_23 = arith.constant dense<0.000000e+00> : vector<8x8xf32>
    %61 = tpu.matmul %59, %60, %cst_23 {dimension_numbers = #tpu.dot_dimension_numbers<[1], [1], [0], [0], [0, 0, 1, 0], [], []>} : vector<8x16xbf16>, vector<8x16xbf16>, vector<8x8xf32> -> vector<8x8xf32>
    %c0_24 = arith.constant 0 : index
    %c0_25 = arith.constant 0 : index
    %62 = vector.load %arg2[%c0_24, %c0_25] : memref<8x8xf32, #tpu.memory_space<vmem>>, vector<8x8xf32>
    %63 = arith.addf %61, %62 : vector<8x8xf32>
    %cst_26 = arith.constant dense<0xFF800000> : vector<8xf32>
    %64 = vector.multi_reduction <maximumf>, %63, %cst_26 [1] : vector<8x8xf32> to vector<8xf32>
    %65 = vector.shape_cast %64 : vector<8xf32> to vector<8x1xf32>
    %66 = vector.broadcast %65 : vector<8x1xf32> to vector<8x8xf32>
    %67 = arith.subf %63, %66 : vector<8x8xf32>
    %68 = math.exp %67 : vector<8x8xf32>
    %cst_27 = arith.constant dense<0.000000e+00> : vector<8xf32>
    %69 = vector.multi_reduction <add>, %68, %cst_27 [1] : vector<8x8xf32> to vector<8xf32>
    %70 = vector.shape_cast %69 : vector<8xf32> to vector<8x1xf32>
    %71 = tpu.reciprocal %70 {approx = true} : vector<8x1xf32> -> vector<8x1xf32>
    %72 = vector.broadcast %71 : vector<8x1xf32> to vector<8x8xf32>
    %73 = arith.mulf %68, %72 : vector<8x8xf32>
    %74 = arith.truncf %73 : vector<8x8xf32> to vector<8x8xbf16>
    %75 = arith.truncf %58 : vector<8x16xf32> to vector<8x16xbf16>
    %cst_28 = arith.constant dense<0.000000e+00> : vector<8x16xf32>
    %76 = tpu.matmul %74, %75, %cst_28 {dimension_numbers = #tpu.dot_dimension_numbers<[1], [0], [0], [1], [0, 0, 1, 1], [], []>} : vector<8x8xbf16>, vector<8x16xbf16>, vector<8x16xf32> -> vector<8x16xf32>
    %77 = vector.extract_strided_slice %30 {offsets = [0, 32], sizes = [8, 16], strides = [1, 1]} : vector<8x192xf32> to vector<8x16xf32>
    %cst_29 = arith.constant 2.500000e-01 : f32
    %78 = vector.broadcast %cst_29 : f32 to vector<8x16xf32>
    %79 = arith.mulf %77, %78 : vector<8x16xf32>
    %80 = vector.extract_strided_slice %30 {offsets = [0, 96], sizes = [8, 16], strides = [1, 1]} : vector<8x192xf32> to vector<8x16xf32>
    %81 = vector.extract_strided_slice %30 {offsets = [0, 160], sizes = [8, 16], strides = [1, 1]} : vector<8x192xf32> to vector<8x16xf32>
    %82 = arith.truncf %79 : vector<8x16xf32> to vector<8x16xbf16>
    %83 = arith.truncf %80 : vector<8x16xf32> to vector<8x16xbf16>
    %cst_30 = arith.constant dense<0.000000e+00> : vector<8x8xf32>
    %84 = tpu.matmul %82, %83, %cst_30 {dimension_numbers = #tpu.dot_dimension_numbers<[1], [1], [0], [0], [0, 0, 1, 0], [], []>} : vector<8x16xbf16>, vector<8x16xbf16>, vector<8x8xf32> -> vector<8x8xf32>
    %c0_31 = arith.constant 0 : index
    %c0_32 = arith.constant 0 : index
    %85 = vector.load %arg2[%c0_31, %c0_32] : memref<8x8xf32, #tpu.memory_space<vmem>>, vector<8x8xf32>
    %86 = arith.addf %84, %85 : vector<8x8xf32>
    %cst_33 = arith.constant dense<0xFF800000> : vector<8xf32>
    %87 = vector.multi_reduction <maximumf>, %86, %cst_33 [1] : vector<8x8xf32> to vector<8xf32>
    %88 = vector.shape_cast %87 : vector<8xf32> to vector<8x1xf32>
    %89 = vector.broadcast %88 : vector<8x1xf32> to vector<8x8xf32>
    %90 = arith.subf %86, %89 : vector<8x8xf32>
    %91 = math.exp %90 : vector<8x8xf32>
    %cst_34 = arith.constant dense<0.000000e+00> : vector<8xf32>
    %92 = vector.multi_reduction <add>, %91, %cst_34 [1] : vector<8x8xf32> to vector<8xf32>
    %93 = vector.shape_cast %92 : vector<8xf32> to vector<8x1xf32>
    %94 = tpu.reciprocal %93 {approx = true} : vector<8x1xf32> -> vector<8x1xf32>
    %95 = vector.broadcast %94 : vector<8x1xf32> to vector<8x8xf32>
    %96 = arith.mulf %91, %95 : vector<8x8xf32>
    %97 = arith.truncf %96 : vector<8x8xf32> to vector<8x8xbf16>
    %98 = arith.truncf %81 : vector<8x16xf32> to vector<8x16xbf16>
    %cst_35 = arith.constant dense<0.000000e+00> : vector<8x16xf32>
    %99 = tpu.matmul %97, %98, %cst_35 {dimension_numbers = #tpu.dot_dimension_numbers<[1], [0], [0], [1], [0, 0, 1, 1], [], []>} : vector<8x8xbf16>, vector<8x16xbf16>, vector<8x16xf32> -> vector<8x16xf32>
    %100 = vector.extract_strided_slice %30 {offsets = [0, 48], sizes = [8, 16], strides = [1, 1]} : vector<8x192xf32> to vector<8x16xf32>
    %cst_36 = arith.constant 2.500000e-01 : f32
    %101 = vector.broadcast %cst_36 : f32 to vector<8x16xf32>
    %102 = arith.mulf %100, %101 : vector<8x16xf32>
    %103 = vector.extract_strided_slice %30 {offsets = [0, 112], sizes = [8, 16], strides = [1, 1]} : vector<8x192xf32> to vector<8x16xf32>
    %104 = vector.extract_strided_slice %30 {offsets = [0, 176], sizes = [8, 16], strides = [1, 1]} : vector<8x192xf32> to vector<8x16xf32>
    %105 = arith.truncf %102 : vector<8x16xf32> to vector<8x16xbf16>
    %106 = arith.truncf %103 : vector<8x16xf32> to vector<8x16xbf16>
    %cst_37 = arith.constant dense<0.000000e+00> : vector<8x8xf32>
    %107 = tpu.matmul %105, %106, %cst_37 {dimension_numbers = #tpu.dot_dimension_numbers<[1], [1], [0], [0], [0, 0, 1, 0], [], []>} : vector<8x16xbf16>, vector<8x16xbf16>, vector<8x8xf32> -> vector<8x8xf32>
    %c0_38 = arith.constant 0 : index
    %c0_39 = arith.constant 0 : index
    %108 = vector.load %arg2[%c0_38, %c0_39] : memref<8x8xf32, #tpu.memory_space<vmem>>, vector<8x8xf32>
    %109 = arith.addf %107, %108 : vector<8x8xf32>
    %cst_40 = arith.constant dense<0xFF800000> : vector<8xf32>
    %110 = vector.multi_reduction <maximumf>, %109, %cst_40 [1] : vector<8x8xf32> to vector<8xf32>
    %111 = vector.shape_cast %110 : vector<8xf32> to vector<8x1xf32>
    %112 = vector.broadcast %111 : vector<8x1xf32> to vector<8x8xf32>
    %113 = arith.subf %109, %112 : vector<8x8xf32>
    %114 = math.exp %113 : vector<8x8xf32>
    %cst_41 = arith.constant dense<0.000000e+00> : vector<8xf32>
    %115 = vector.multi_reduction <add>, %114, %cst_41 [1] : vector<8x8xf32> to vector<8xf32>
    %116 = vector.shape_cast %115 : vector<8xf32> to vector<8x1xf32>
    %117 = tpu.reciprocal %116 {approx = true} : vector<8x1xf32> -> vector<8x1xf32>
    %118 = vector.broadcast %117 : vector<8x1xf32> to vector<8x8xf32>
    %119 = arith.mulf %114, %118 : vector<8x8xf32>
    %120 = arith.truncf %119 : vector<8x8xf32> to vector<8x8xbf16>
    %121 = arith.truncf %104 : vector<8x16xf32> to vector<8x16xbf16>
    %cst_42 = arith.constant dense<0.000000e+00> : vector<8x16xf32>
    %122 = tpu.matmul %120, %121, %cst_42 {dimension_numbers = #tpu.dot_dimension_numbers<[1], [0], [0], [1], [0, 0, 1, 1], [], []>} : vector<8x8xbf16>, vector<8x16xbf16>, vector<8x16xf32> -> vector<8x16xf32>
    %123 = tpu.concatenate %53, %76, %99, %122 in 1 : vector<8x16xf32>, vector<8x16xf32>, vector<8x16xf32>, vector<8x16xf32> -> vector<8x64xf32>
    %c0_43 = arith.constant 0 : index
    %c0_44 = arith.constant 0 : index
    %124 = vector.load %arg7[%c0_43, %c0_44] : memref<64x64xbf16, #tpu.memory_space<vmem>>, vector<64x64xbf16>
    %125 = arith.truncf %123 : vector<8x64xf32> to vector<8x64xbf16>
    %cst_45 = arith.constant dense<0.000000e+00> : vector<8x64xf32>
    %126 = tpu.matmul %125, %124, %cst_45 {dimension_numbers = #tpu.dot_dimension_numbers<[1], [0], [0], [1], [0, 0, 1, 1], [], []>} : vector<8x64xbf16>, vector<64x64xbf16>, vector<8x64xf32> -> vector<8x64xf32>
    %127 = arith.addf %2, %126 : vector<8x64xf32>
    %c0_46 = arith.constant 0 : index
    %c0_47 = arith.constant 0 : index
    %128 = vector.load %arg8[%c0_46, %c0_47] : memref<1x64xf32, #tpu.memory_space<vmem>>, vector<1x64xf32>
    %129 = vector.broadcast %128 : vector<1x64xf32> to vector<8x64xf32>
    %130 = arith.addf %127, %129 : vector<8x64xf32>
    %c0_48 = arith.constant 0 : index
    %c0_49 = arith.constant 0 : index
    %131 = vector.load %arg9[%c0_48, %c0_49] : memref<1x64xf32, #tpu.memory_space<vmem>>, vector<1x64xf32>
    %c0_50 = arith.constant 0 : index
    %c0_51 = arith.constant 0 : index
    %132 = vector.load %arg10[%c0_50, %c0_51] : memref<1x64xf32, #tpu.memory_space<vmem>>, vector<1x64xf32>
    %cst_52 = arith.constant dense<0.000000e+00> : vector<8xf32>
    %133 = vector.multi_reduction <add>, %130, %cst_52 [1] : vector<8x64xf32> to vector<8xf32>
    %134 = vector.shape_cast %133 : vector<8xf32> to vector<8x1xf32>
    %cst_53 = arith.constant 6.400000e+01 : f32
    %135 = vector.broadcast %cst_53 : f32 to vector<8x1xf32>
    %136 = arith.divf %134, %135 : vector<8x1xf32>
    %137 = vector.broadcast %136 : vector<8x1xf32> to vector<8x64xf32>
    %138 = arith.subf %130, %137 : vector<8x64xf32>
    %139 = arith.mulf %138, %138 : vector<8x64xf32>
    %cst_54 = arith.constant dense<0.000000e+00> : vector<8xf32>
    %140 = vector.multi_reduction <add>, %139, %cst_54 [1] : vector<8x64xf32> to vector<8xf32>
    %141 = vector.shape_cast %140 : vector<8xf32> to vector<8x1xf32>
    %cst_55 = arith.constant 6.400000e+01 : f32
    %142 = vector.broadcast %cst_55 : f32 to vector<8x1xf32>
    %143 = arith.divf %141, %142 : vector<8x1xf32>
    %cst_56 = arith.constant 9.99999974E-6 : f32
    %144 = vector.broadcast %cst_56 : f32 to vector<8x1xf32>
    %145 = arith.addf %143, %144 : vector<8x1xf32>
    %146 = math.rsqrt %145 : vector<8x1xf32>
    %147 = vector.broadcast %146 : vector<8x1xf32> to vector<8x64xf32>
    %148 = arith.mulf %138, %147 : vector<8x64xf32>
    %149 = vector.broadcast %131 : vector<1x64xf32> to vector<8x64xf32>
    %150 = arith.mulf %148, %149 : vector<8x64xf32>
    %151 = vector.broadcast %132 : vector<1x64xf32> to vector<8x64xf32>
    %152 = arith.addf %150, %151 : vector<8x64xf32>
    %c0_57 = arith.constant 0 : index
    %c0_58 = arith.constant 0 : index
    %153 = vector.load %arg11[%c0_57, %c0_58] : memref<64x256xbf16, #tpu.memory_space<vmem>>, vector<64x256xbf16>
    %154 = arith.truncf %152 : vector<8x64xf32> to vector<8x64xbf16>
    %cst_59 = arith.constant dense<0.000000e+00> : vector<8x256xf32>
    %155 = tpu.matmul %154, %153, %cst_59 {dimension_numbers = #tpu.dot_dimension_numbers<[1], [0], [0], [1], [0, 0, 1, 1], [], []>} : vector<8x64xbf16>, vector<64x256xbf16>, vector<8x256xf32> -> vector<8x256xf32>
    %c0_60 = arith.constant 0 : index
    %c0_61 = arith.constant 0 : index
    %156 = vector.load %arg12[%c0_60, %c0_61] : memref<1x256xf32, #tpu.memory_space<vmem>>, vector<1x256xf32>
    %157 = vector.broadcast %156 : vector<1x256xf32> to vector<8x256xf32>
    %158 = arith.addf %155, %157 : vector<8x256xf32>
    %cst_62 = arith.constant 1.702000e+00 : f32
    %159 = vector.broadcast %cst_62 : f32 to vector<8x256xf32>
    %160 = arith.mulf %159, %158 : vector<8x256xf32>
    %161 = arith.negf %160 : vector<8x256xf32>
    %162 = math.exp %161 : vector<8x256xf32>
    %cst_63 = arith.constant 1.000000e+00 : f32
    %163 = vector.broadcast %cst_63 : f32 to vector<8x256xf32>
    %164 = arith.addf %163, %162 : vector<8x256xf32>
    %165 = arith.divf %163, %164 : vector<8x256xf32>
    %166 = arith.mulf %158, %165 : vector<8x256xf32>
    %c0_64 = arith.constant 0 : index
    %c0_65 = arith.constant 0 : index
    %167 = vector.load %arg13[%c0_64, %c0_65] : memref<256x64xbf16, #tpu.memory_space<vmem>>, vector<256x64xbf16>
    %168 = arith.truncf %166 : vector<8x256xf32> to vector<8x256xbf16>
    %cst_66 = arith.constant dense<0.000000e+00> : vector<8x64xf32>
    %169 = tpu.matmul %168, %167, %cst_66 {dimension_numbers = #tpu.dot_dimension_numbers<[1], [0], [0], [1], [0, 0, 1, 1], [], []>} : vector<8x256xbf16>, vector<256x64xbf16>, vector<8x64xf32> -> vector<8x64xf32>
    %c0_67 = arith.constant 0 : index
    %c0_68 = arith.constant 0 : index
    %170 = vector.load %arg14[%c0_67, %c0_68] : memref<1x64xf32, #tpu.memory_space<vmem>>, vector<1x64xf32>
    %171 = vector.broadcast %170 : vector<1x64xf32> to vector<8x64xf32>
    %172 = arith.addf %169, %171 : vector<8x64xf32>
    %173 = arith.addf %130, %172 : vector<8x64xf32>
    %174 = arith.truncf %173 : vector<8x64xf32> to vector<8x64xbf16>
    %c0_69 = arith.constant 0 : index
    %c0_70 = arith.constant 0 : index
    %c0_71 = arith.constant 0 : index
    %175 = vector.load %arg15[%c0_69, %c0_70, %c0_71] : memref<1x8x64xbf16, #tpu.memory_space<vmem>>, vector<1x8x64xbf16>
    %176 = vector.shape_cast %175 : vector<1x8x64xbf16> to vector<8x64xbf16>
    %177 = vector.shape_cast %174 : vector<8x64xbf16> to vector<1x8x64xbf16>
    tpu.vector_store %arg15[%c0_69, %c0_70, %c0_71], %177 {strides = array<i32>} : memref<1x8x64xbf16, #tpu.memory_space<vmem>>, vector<1x8x64xbf16>,
    return
  }
  func.func @transform_0(%arg0: i32) -> (i32, i32, i32) {
    %c0_i32 = arith.constant 0 : i32
    %c0_i32_0 = arith.constant 0 : i32
    %c0_i32_1 = arith.constant 0 : i32
    return %arg0, %c0_i32, %c0_i32_0 : i32, i32, i32
  }
  func.func @transform_1(%arg0: i32) -> (i32, i32) {
    %c0_i32 = arith.constant 0 : i32
    %c0_i32_0 = arith.constant 0 : i32
    %c0_i32_1 = arith.constant 0 : i32
    return %c0_i32, %c0_i32_0 : i32, i32
  }
  func.func @transform_2(%arg0: i32) -> (i32, i32) {
    %c0_i32 = arith.constant 0 : i32
    %c0_i32_0 = arith.constant 0 : i32
    %c0_i32_1 = arith.constant 0 : i32
    return %c0_i32, %c0_i32_0 : i32, i32
  }
  func.func @transform_3(%arg0: i32) -> (i32, i32) {
    %c0_i32 = arith.constant 0 : i32
    %c0_i32_0 = arith.constant 0 : i32
    %c0_i32_1 = arith.constant 0 : i32
    return %c0_i32, %c0_i32_0 : i32, i32
  }
  func.func @transform_4(%arg0: i32) -> (i32, i32) {
    %c0_i32 = arith.constant 0 : i32
    %c0_i32_0 = arith.constant 0 : i32
    %c0_i32_1 = arith.constant 0 : i32
    return %c0_i32, %c0_i32_0 : i32, i32
  }
  func.func @transform_5(%arg0: i32) -> (i32, i32) {
    %c0_i32 = arith.constant 0 : i32
    %c0_i32_0 = arith.constant 0 : i32
    %c0_i32_1 = arith.constant 0 : i32
    return %c0_i32, %c0_i32_0 : i32, i32
  }
  func.func @transform_6(%arg0: i32) -> (i32, i32) {
    %c0_i32 = arith.constant 0 : i32
    %c0_i32_0 = arith.constant 0 : i32
    %c0_i32_1 = arith.constant 0 : i32
    return %c0_i32, %c0_i32_0 : i32, i32
  }
  func.func @transform_7(%arg0: i32) -> (i32, i32) {
    %c0_i32 = arith.constant 0 : i32
    %c0_i32_0 = arith.constant 0 : i32
    %c0_i32_1 = arith.constant 0 : i32
    return %c0_i32, %c0_i32_0 : i32, i32
  }
  func.func @transform_8(%arg0: i32) -> (i32, i32) {
    %c0_i32 = arith.constant 0 : i32
    %c0_i32_0 = arith.constant 0 : i32
    %c0_i32_1 = arith.constant 0 : i32
    return %c0_i32, %c0_i32_0 : i32, i32
  }
  func.func @transform_9(%arg0: i32) -> (i32, i32) {
    %c0_i32 = arith.constant 0 : i32
    %c0_i32_0 = arith.constant 0 : i32
    %c0_i32_1 = arith.constant 0 : i32
    return %c0_i32, %c0_i32_0 : i32, i32
  }
  func.func @transform_10(%arg0: i32) -> (i32, i32) {
    %c0_i32 = arith.constant 0 : i32
    %c0_i32_0 = arith.constant 0 : i32
    %c0_i32_1 = arith.constant 0 : i32
    return %c0_i32, %c0_i32_0 : i32, i32
  }
  func.func @transform_11(%arg0: i32) -> (i32, i32) {
    %c0_i32 = arith.constant 0 : i32
    %c0_i32_0 = arith.constant 0 : i32
    %c0_i32_1 = arith.constant 0 : i32
    return %c0_i32, %c0_i32_0 : i32, i32
  }
  func.func @transform_12(%arg0: i32) -> (i32, i32) {
    %c0_i32 = arith.constant 0 : i32
    %c0_i32_0 = arith.constant 0 : i32
    %c0_i32_1 = arith.constant 0 : i32
    return %c0_i32, %c0_i32_0 : i32, i32
  }
  func.func @transform_13(%arg0: i32) -> (i32, i32) {
    %c0_i32 = arith.constant 0 : i32
    %c0_i32_0 = arith.constant 0 : i32
    %c0_i32_1 = arith.constant 0 : i32
    return %c0_i32, %c0_i32_0 : i32, i32
  }
  func.func @transform_14(%arg0: i32) -> (i32, i32, i32) {
    %c0_i32 = arith.constant 0 : i32
    %c0_i32_0 = arith.constant 0 : i32
    %c0_i32_1 = arith.constant 0 : i32
    return %arg0, %c0_i32, %c0_i32_0 : i32, i32, i32
  }
}

module attributes {stable_mosaic.version = 11 : i64} {
  func.func @_resblock_kernel(%arg0: i32, %arg1: memref<1x8x64xbf16, #tpu.memory_space<vmem>>, %arg2: memref<8x8xf32, #tpu.memory_space<vmem>>, %arg3: memref<8x64xbf16, #tpu.memory_space<vmem>>, %arg4: memref<1x64xf32, #tpu.memory_space<vmem>>, %arg5: memref<1x64xf32, #tpu.memory_space<vmem>>, %arg6: memref<64x192xbf16, #tpu.memory_space<vmem>>, %arg7: memref<1x192xf32, #tpu.memory_space<vmem>>, %arg8: memref<64x64xbf16, #tpu.memory_space<vmem>>, %arg9: memref<1x64xf32, #tpu.memory_space<vmem>>, %arg10: memref<1x64xf32, #tpu.memory_space<vmem>>, %arg11: memref<1x64xf32, #tpu.memory_space<vmem>>, %arg12: memref<64x256xbf16, #tpu.memory_space<vmem>>, %arg13: memref<1x256xf32, #tpu.memory_space<vmem>>, %arg14: memref<256x64xbf16, #tpu.memory_space<vmem>>, %arg15: memref<1x64xf32, #tpu.memory_space<vmem>>, %arg16: memref<1x8x64xbf16, #tpu.memory_space<vmem>>) attributes {dimension_semantics = [#tpu.dimension_semantics<parallel>], iteration_bounds = array<i64: 3>, scalar_prefetch = 0 : i64, scratch_operands = 0 : i64, tpu.core_type = #tpu.core_type<tc>, window_params = [{transform_indices = @transform_0, window_bounds = array<i64: 1, 8, 64>}, {pipeline_mode = #tpu.pipeline_mode<synchronous>, transform_indices = @transform_1, window_bounds = array<i64: 8, 8>}, {pipeline_mode = #tpu.pipeline_mode<synchronous>, transform_indices = @transform_2, window_bounds = array<i64: 8, 64>}, {pipeline_mode = #tpu.pipeline_mode<synchronous>, transform_indices = @transform_3, window_bounds = array<i64: 1, 64>}, {pipeline_mode = #tpu.pipeline_mode<synchronous>, transform_indices = @transform_4, window_bounds = array<i64: 1, 64>}, {pipeline_mode = #tpu.pipeline_mode<synchronous>, transform_indices = @transform_5, window_bounds = array<i64: 64, 192>}, {pipeline_mode = #tpu.pipeline_mode<synchronous>, transform_indices = @transform_6, window_bounds = array<i64: 1, 192>}, {pipeline_mode = #tpu.pipeline_mode<synchronous>, transform_indices = @transform_7, window_bounds = array<i64: 64, 64>}, {pipeline_mode = #tpu.pipeline_mode<synchronous>, transform_indices = @transform_8, window_bounds = array<i64: 1, 64>}, {pipeline_mode = #tpu.pipeline_mode<synchronous>, transform_indices = @transform_9, window_bounds = array<i64: 1, 64>}, {pipeline_mode = #tpu.pipeline_mode<synchronous>, transform_indices = @transform_10, window_bounds = array<i64: 1, 64>}, {pipeline_mode = #tpu.pipeline_mode<synchronous>, transform_indices = @transform_11, window_bounds = array<i64: 64, 256>}, {pipeline_mode = #tpu.pipeline_mode<synchronous>, transform_indices = @transform_12, window_bounds = array<i64: 1, 256>}, {pipeline_mode = #tpu.pipeline_mode<synchronous>, transform_indices = @transform_13, window_bounds = array<i64: 256, 64>}, {pipeline_mode = #tpu.pipeline_mode<synchronous>, transform_indices = @transform_14, window_bounds = array<i64: 1, 64>}, {transform_indices = @transform_15, window_bounds = array<i64: 1, 8, 64>}]} {
    %c0 = arith.constant 0 : index
    %c0_0 = arith.constant 0 : index
    %c0_1 = arith.constant 0 : index
    %0 = vector.load %arg1[%c0, %c0_0, %c0_1] : memref<1x8x64xbf16, #tpu.memory_space<vmem>>, vector<1x8x64xbf16>
    %1 = vector.shape_cast %0 : vector<1x8x64xbf16> to vector<8x64xbf16>
    %2 = arith.extf %1 : vector<8x64xbf16> to vector<8x64xf32>
    %3 = tpu.iota {dimensions = array<i32: 0>} : vector<8x64xi32>
    %c1_i32 = arith.constant 1 : i32
    %4 = vector.broadcast %c1_i32 : i32 to vector<8x64xi32>
    %5 = arith.cmpi sge, %3, %4 : vector<8x64xi32>
    %c3_i32 = arith.constant 3 : i32
    %6 = vector.broadcast %c3_i32 : i32 to vector<8x64xi32>
    %7 = arith.cmpi slt, %3, %6 : vector<8x64xi32>
    %8 = arith.andi %5, %7 : vector<8x64xi1>
    %c0_2 = arith.constant 0 : index
    %c0_3 = arith.constant 0 : index
    %9 = vector.load %arg3[%c0_2, %c0_3] : memref<8x64xbf16, #tpu.memory_space<vmem>>, vector<8x64xbf16>
    %10 = arith.extf %9 : vector<8x64xbf16> to vector<8x64xf32>
    %11 = arith.select %8, %10, %2 : vector<8x64xi1>, vector<8x64xf32>
    %c0_4 = arith.constant 0 : index
    %c0_5 = arith.constant 0 : index
    %12 = vector.load %arg4[%c0_4, %c0_5] : memref<1x64xf32, #tpu.memory_space<vmem>>, vector<1x64xf32>
    %c0_6 = arith.constant 0 : index
    %c0_7 = arith.constant 0 : index
    %13 = vector.load %arg5[%c0_6, %c0_7] : memref<1x64xf32, #tpu.memory_space<vmem>>, vector<1x64xf32>
    %cst = arith.constant dense<0.000000e+00> : vector<8xf32>
    %14 = vector.multi_reduction <add>, %11, %cst [1] : vector<8x64xf32> to vector<8xf32>
    %15 = vector.shape_cast %14 : vector<8xf32> to vector<8x1xf32>
    %cst_8 = arith.constant 6.400000e+01 : f32
    %16 = vector.broadcast %cst_8 : f32 to vector<8x1xf32>
    %17 = arith.divf %15, %16 : vector<8x1xf32>
    %18 = vector.broadcast %17 : vector<8x1xf32> to vector<8x64xf32>
    %19 = arith.subf %11, %18 : vector<8x64xf32>
    %20 = arith.mulf %19, %19 : vector<8x64xf32>
    %cst_9 = arith.constant dense<0.000000e+00> : vector<8xf32>
    %21 = vector.multi_reduction <add>, %20, %cst_9 [1] : vector<8x64xf32> to vector<8xf32>
    %22 = vector.shape_cast %21 : vector<8xf32> to vector<8x1xf32>
    %cst_10 = arith.constant 6.400000e+01 : f32
    %23 = vector.broadcast %cst_10 : f32 to vector<8x1xf32>
    %24 = arith.divf %22, %23 : vector<8x1xf32>
    %cst_11 = arith.constant 9.99999974E-6 : f32
    %25 = vector.broadcast %cst_11 : f32 to vector<8x1xf32>
    %26 = arith.addf %24, %25 : vector<8x1xf32>
    %27 = math.rsqrt %26 : vector<8x1xf32>
    %28 = vector.broadcast %27 : vector<8x1xf32> to vector<8x64xf32>
    %29 = arith.mulf %19, %28 : vector<8x64xf32>
    %30 = vector.broadcast %12 : vector<1x64xf32> to vector<8x64xf32>
    %31 = arith.mulf %29, %30 : vector<8x64xf32>
    %32 = vector.broadcast %13 : vector<1x64xf32> to vector<8x64xf32>
    %33 = arith.addf %31, %32 : vector<8x64xf32>
    %c0_12 = arith.constant 0 : index
    %c0_13 = arith.constant 0 : index
    %34 = vector.load %arg6[%c0_12, %c0_13] : memref<64x192xbf16, #tpu.memory_space<vmem>>, vector<64x192xbf16>
    %35 = arith.truncf %33 : vector<8x64xf32> to vector<8x64xbf16>
    %cst_14 = arith.constant dense<0.000000e+00> : vector<8x192xf32>
    %36 = tpu.matmul %35, %34, %cst_14 {dimension_numbers = #tpu.dot_dimension_numbers<[1], [0], [0], [1], [0, 0, 1, 1], [], []>} : vector<8x64xbf16>, vector<64x192xbf16>, vector<8x192xf32> -> vector<8x192xf32>
    %c0_15 = arith.constant 0 : index
    %c0_16 = arith.constant 0 : index
    %37 = vector.load %arg7[%c0_15, %c0_16] : memref<1x192xf32, #tpu.memory_space<vmem>>, vector<1x192xf32>
    %38 = vector.broadcast %37 : vector<1x192xf32> to vector<8x192xf32>
    %39 = arith.addf %36, %38 : vector<8x192xf32>
    %40 = vector.extract_strided_slice %39 {offsets = [0, 0], sizes = [8, 16], strides = [1, 1]} : vector<8x192xf32> to vector<8x16xf32>
    %cst_17 = arith.constant 2.500000e-01 : f32
    %41 = vector.broadcast %cst_17 : f32 to vector<8x16xf32>
    %42 = arith.mulf %40, %41 : vector<8x16xf32>
    %43 = vector.extract_strided_slice %39 {offsets = [0, 64], sizes = [8, 16], strides = [1, 1]} : vector<8x192xf32> to vector<8x16xf32>
    %44 = vector.extract_strided_slice %39 {offsets = [0, 128], sizes = [8, 16], strides = [1, 1]} : vector<8x192xf32> to vector<8x16xf32>
    %45 = arith.truncf %42 : vector<8x16xf32> to vector<8x16xbf16>
    %46 = arith.truncf %43 : vector<8x16xf32> to vector<8x16xbf16>
    %cst_18 = arith.constant dense<0.000000e+00> : vector<8x8xf32>
    %47 = tpu.matmul %45, %46, %cst_18 {dimension_numbers = #tpu.dot_dimension_numbers<[1], [1], [0], [0], [0, 0, 1, 0], [], []>} : vector<8x16xbf16>, vector<8x16xbf16>, vector<8x8xf32> -> vector<8x8xf32>
    %c0_19 = arith.constant 0 : index
    %c0_20 = arith.constant 0 : index
    %48 = vector.load %arg2[%c0_19, %c0_20] : memref<8x8xf32, #tpu.memory_space<vmem>>, vector<8x8xf32>
    %49 = arith.addf %47, %48 : vector<8x8xf32>
    %cst_21 = arith.constant dense<0xFF800000> : vector<8xf32>
    %50 = vector.multi_reduction <maximumf>, %49, %cst_21 [1] : vector<8x8xf32> to vector<8xf32>
    %51 = vector.shape_cast %50 : vector<8xf32> to vector<8x1xf32>
    %52 = vector.broadcast %51 : vector<8x1xf32> to vector<8x8xf32>
    %53 = arith.subf %49, %52 : vector<8x8xf32>
    %54 = math.exp %53 : vector<8x8xf32>
    %cst_22 = arith.constant dense<0.000000e+00> : vector<8xf32>
    %55 = vector.multi_reduction <add>, %54, %cst_22 [1] : vector<8x8xf32> to vector<8xf32>
    %56 = vector.shape_cast %55 : vector<8xf32> to vector<8x1xf32>
    %57 = tpu.reciprocal %56 {approx = true} : vector<8x1xf32> -> vector<8x1xf32>
    %58 = vector.broadcast %57 : vector<8x1xf32> to vector<8x8xf32>
    %59 = arith.mulf %54, %58 : vector<8x8xf32>
    %60 = arith.truncf %59 : vector<8x8xf32> to vector<8x8xbf16>
    %61 = arith.truncf %44 : vector<8x16xf32> to vector<8x16xbf16>
    %cst_23 = arith.constant dense<0.000000e+00> : vector<8x16xf32>
    %62 = tpu.matmul %60, %61, %cst_23 {dimension_numbers = #tpu.dot_dimension_numbers<[1], [0], [0], [1], [0, 0, 1, 1], [], []>} : vector<8x8xbf16>, vector<8x16xbf16>, vector<8x16xf32> -> vector<8x16xf32>
    %63 = vector.extract_strided_slice %39 {offsets = [0, 16], sizes = [8, 16], strides = [1, 1]} : vector<8x192xf32> to vector<8x16xf32>
    %cst_24 = arith.constant 2.500000e-01 : f32
    %64 = vector.broadcast %cst_24 : f32 to vector<8x16xf32>
    %65 = arith.mulf %63, %64 : vector<8x16xf32>
    %66 = vector.extract_strided_slice %39 {offsets = [0, 80], sizes = [8, 16], strides = [1, 1]} : vector<8x192xf32> to vector<8x16xf32>
    %67 = vector.extract_strided_slice %39 {offsets = [0, 144], sizes = [8, 16], strides = [1, 1]} : vector<8x192xf32> to vector<8x16xf32>
    %68 = arith.truncf %65 : vector<8x16xf32> to vector<8x16xbf16>
    %69 = arith.truncf %66 : vector<8x16xf32> to vector<8x16xbf16>
    %cst_25 = arith.constant dense<0.000000e+00> : vector<8x8xf32>
    %70 = tpu.matmul %68, %69, %cst_25 {dimension_numbers = #tpu.dot_dimension_numbers<[1], [1], [0], [0], [0, 0, 1, 0], [], []>} : vector<8x16xbf16>, vector<8x16xbf16>, vector<8x8xf32> -> vector<8x8xf32>
    %c0_26 = arith.constant 0 : index
    %c0_27 = arith.constant 0 : index
    %71 = vector.load %arg2[%c0_26, %c0_27] : memref<8x8xf32, #tpu.memory_space<vmem>>, vector<8x8xf32>
    %72 = arith.addf %70, %71 : vector<8x8xf32>
    %cst_28 = arith.constant dense<0xFF800000> : vector<8xf32>
    %73 = vector.multi_reduction <maximumf>, %72, %cst_28 [1] : vector<8x8xf32> to vector<8xf32>
    %74 = vector.shape_cast %73 : vector<8xf32> to vector<8x1xf32>
    %75 = vector.broadcast %74 : vector<8x1xf32> to vector<8x8xf32>
    %76 = arith.subf %72, %75 : vector<8x8xf32>
    %77 = math.exp %76 : vector<8x8xf32>
    %cst_29 = arith.constant dense<0.000000e+00> : vector<8xf32>
    %78 = vector.multi_reduction <add>, %77, %cst_29 [1] : vector<8x8xf32> to vector<8xf32>
    %79 = vector.shape_cast %78 : vector<8xf32> to vector<8x1xf32>
    %80 = tpu.reciprocal %79 {approx = true} : vector<8x1xf32> -> vector<8x1xf32>
    %81 = vector.broadcast %80 : vector<8x1xf32> to vector<8x8xf32>
    %82 = arith.mulf %77, %81 : vector<8x8xf32>
    %83 = arith.truncf %82 : vector<8x8xf32> to vector<8x8xbf16>
    %84 = arith.truncf %67 : vector<8x16xf32> to vector<8x16xbf16>
    %cst_30 = arith.constant dense<0.000000e+00> : vector<8x16xf32>
    %85 = tpu.matmul %83, %84, %cst_30 {dimension_numbers = #tpu.dot_dimension_numbers<[1], [0], [0], [1], [0, 0, 1, 1], [], []>} : vector<8x8xbf16>, vector<8x16xbf16>, vector<8x16xf32> -> vector<8x16xf32>
    %86 = vector.extract_strided_slice %39 {offsets = [0, 32], sizes = [8, 16], strides = [1, 1]} : vector<8x192xf32> to vector<8x16xf32>
    %cst_31 = arith.constant 2.500000e-01 : f32
    %87 = vector.broadcast %cst_31 : f32 to vector<8x16xf32>
    %88 = arith.mulf %86, %87 : vector<8x16xf32>
    %89 = vector.extract_strided_slice %39 {offsets = [0, 96], sizes = [8, 16], strides = [1, 1]} : vector<8x192xf32> to vector<8x16xf32>
    %90 = vector.extract_strided_slice %39 {offsets = [0, 160], sizes = [8, 16], strides = [1, 1]} : vector<8x192xf32> to vector<8x16xf32>
    %91 = arith.truncf %88 : vector<8x16xf32> to vector<8x16xbf16>
    %92 = arith.truncf %89 : vector<8x16xf32> to vector<8x16xbf16>
    %cst_32 = arith.constant dense<0.000000e+00> : vector<8x8xf32>
    %93 = tpu.matmul %91, %92, %cst_32 {dimension_numbers = #tpu.dot_dimension_numbers<[1], [1], [0], [0], [0, 0, 1, 0], [], []>} : vector<8x16xbf16>, vector<8x16xbf16>, vector<8x8xf32> -> vector<8x8xf32>
    %c0_33 = arith.constant 0 : index
    %c0_34 = arith.constant 0 : index
    %94 = vector.load %arg2[%c0_33, %c0_34] : memref<8x8xf32, #tpu.memory_space<vmem>>, vector<8x8xf32>
    %95 = arith.addf %93, %94 : vector<8x8xf32>
    %cst_35 = arith.constant dense<0xFF800000> : vector<8xf32>
    %96 = vector.multi_reduction <maximumf>, %95, %cst_35 [1] : vector<8x8xf32> to vector<8xf32>
    %97 = vector.shape_cast %96 : vector<8xf32> to vector<8x1xf32>
    %98 = vector.broadcast %97 : vector<8x1xf32> to vector<8x8xf32>
    %99 = arith.subf %95, %98 : vector<8x8xf32>
    %100 = math.exp %99 : vector<8x8xf32>
    %cst_36 = arith.constant dense<0.000000e+00> : vector<8xf32>
    %101 = vector.multi_reduction <add>, %100, %cst_36 [1] : vector<8x8xf32> to vector<8xf32>
    %102 = vector.shape_cast %101 : vector<8xf32> to vector<8x1xf32>
    %103 = tpu.reciprocal %102 {approx = true} : vector<8x1xf32> -> vector<8x1xf32>
    %104 = vector.broadcast %103 : vector<8x1xf32> to vector<8x8xf32>
    %105 = arith.mulf %100, %104 : vector<8x8xf32>
    %106 = arith.truncf %105 : vector<8x8xf32> to vector<8x8xbf16>
    %107 = arith.truncf %90 : vector<8x16xf32> to vector<8x16xbf16>
    %cst_37 = arith.constant dense<0.000000e+00> : vector<8x16xf32>
    %108 = tpu.matmul %106, %107, %cst_37 {dimension_numbers = #tpu.dot_dimension_numbers<[1], [0], [0], [1], [0, 0, 1, 1], [], []>} : vector<8x8xbf16>, vector<8x16xbf16>, vector<8x16xf32> -> vector<8x16xf32>
    %109 = vector.extract_strided_slice %39 {offsets = [0, 48], sizes = [8, 16], strides = [1, 1]} : vector<8x192xf32> to vector<8x16xf32>
    %cst_38 = arith.constant 2.500000e-01 : f32
    %110 = vector.broadcast %cst_38 : f32 to vector<8x16xf32>
    %111 = arith.mulf %109, %110 : vector<8x16xf32>
    %112 = vector.extract_strided_slice %39 {offsets = [0, 112], sizes = [8, 16], strides = [1, 1]} : vector<8x192xf32> to vector<8x16xf32>
    %113 = vector.extract_strided_slice %39 {offsets = [0, 176], sizes = [8, 16], strides = [1, 1]} : vector<8x192xf32> to vector<8x16xf32>
    %114 = arith.truncf %111 : vector<8x16xf32> to vector<8x16xbf16>
    %115 = arith.truncf %112 : vector<8x16xf32> to vector<8x16xbf16>
    %cst_39 = arith.constant dense<0.000000e+00> : vector<8x8xf32>
    %116 = tpu.matmul %114, %115, %cst_39 {dimension_numbers = #tpu.dot_dimension_numbers<[1], [1], [0], [0], [0, 0, 1, 0], [], []>} : vector<8x16xbf16>, vector<8x16xbf16>, vector<8x8xf32> -> vector<8x8xf32>
    %c0_40 = arith.constant 0 : index
    %c0_41 = arith.constant 0 : index
    %117 = vector.load %arg2[%c0_40, %c0_41] : memref<8x8xf32, #tpu.memory_space<vmem>>, vector<8x8xf32>
    %118 = arith.addf %116, %117 : vector<8x8xf32>
    %cst_42 = arith.constant dense<0xFF800000> : vector<8xf32>
    %119 = vector.multi_reduction <maximumf>, %118, %cst_42 [1] : vector<8x8xf32> to vector<8xf32>
    %120 = vector.shape_cast %119 : vector<8xf32> to vector<8x1xf32>
    %121 = vector.broadcast %120 : vector<8x1xf32> to vector<8x8xf32>
    %122 = arith.subf %118, %121 : vector<8x8xf32>
    %123 = math.exp %122 : vector<8x8xf32>
    %cst_43 = arith.constant dense<0.000000e+00> : vector<8xf32>
    %124 = vector.multi_reduction <add>, %123, %cst_43 [1] : vector<8x8xf32> to vector<8xf32>
    %125 = vector.shape_cast %124 : vector<8xf32> to vector<8x1xf32>
    %126 = tpu.reciprocal %125 {approx = true} : vector<8x1xf32> -> vector<8x1xf32>
    %127 = vector.broadcast %126 : vector<8x1xf32> to vector<8x8xf32>
    %128 = arith.mulf %123, %127 : vector<8x8xf32>
    %129 = arith.truncf %128 : vector<8x8xf32> to vector<8x8xbf16>
    %130 = arith.truncf %113 : vector<8x16xf32> to vector<8x16xbf16>
    %cst_44 = arith.constant dense<0.000000e+00> : vector<8x16xf32>
    %131 = tpu.matmul %129, %130, %cst_44 {dimension_numbers = #tpu.dot_dimension_numbers<[1], [0], [0], [1], [0, 0, 1, 1], [], []>} : vector<8x8xbf16>, vector<8x16xbf16>, vector<8x16xf32> -> vector<8x16xf32>
    %132 = tpu.concatenate %62, %85, %108, %131 in 1 : vector<8x16xf32>, vector<8x16xf32>, vector<8x16xf32>, vector<8x16xf32> -> vector<8x64xf32>
    %c0_45 = arith.constant 0 : index
    %c0_46 = arith.constant 0 : index
    %133 = vector.load %arg8[%c0_45, %c0_46] : memref<64x64xbf16, #tpu.memory_space<vmem>>, vector<64x64xbf16>
    %134 = arith.truncf %132 : vector<8x64xf32> to vector<8x64xbf16>
    %cst_47 = arith.constant dense<0.000000e+00> : vector<8x64xf32>
    %135 = tpu.matmul %134, %133, %cst_47 {dimension_numbers = #tpu.dot_dimension_numbers<[1], [0], [0], [1], [0, 0, 1, 1], [], []>} : vector<8x64xbf16>, vector<64x64xbf16>, vector<8x64xf32> -> vector<8x64xf32>
    %136 = arith.addf %11, %135 : vector<8x64xf32>
    %c0_48 = arith.constant 0 : index
    %c0_49 = arith.constant 0 : index
    %137 = vector.load %arg9[%c0_48, %c0_49] : memref<1x64xf32, #tpu.memory_space<vmem>>, vector<1x64xf32>
    %138 = vector.broadcast %137 : vector<1x64xf32> to vector<8x64xf32>
    %139 = arith.addf %136, %138 : vector<8x64xf32>
    %c0_50 = arith.constant 0 : index
    %c0_51 = arith.constant 0 : index
    %140 = vector.load %arg10[%c0_50, %c0_51] : memref<1x64xf32, #tpu.memory_space<vmem>>, vector<1x64xf32>
    %c0_52 = arith.constant 0 : index
    %c0_53 = arith.constant 0 : index
    %141 = vector.load %arg11[%c0_52, %c0_53] : memref<1x64xf32, #tpu.memory_space<vmem>>, vector<1x64xf32>
    %cst_54 = arith.constant dense<0.000000e+00> : vector<8xf32>
    %142 = vector.multi_reduction <add>, %139, %cst_54 [1] : vector<8x64xf32> to vector<8xf32>
    %143 = vector.shape_cast %142 : vector<8xf32> to vector<8x1xf32>
    %cst_55 = arith.constant 6.400000e+01 : f32
    %144 = vector.broadcast %cst_55 : f32 to vector<8x1xf32>
    %145 = arith.divf %143, %144 : vector<8x1xf32>
    %146 = vector.broadcast %145 : vector<8x1xf32> to vector<8x64xf32>
    %147 = arith.subf %139, %146 : vector<8x64xf32>
    %148 = arith.mulf %147, %147 : vector<8x64xf32>
    %cst_56 = arith.constant dense<0.000000e+00> : vector<8xf32>
    %149 = vector.multi_reduction <add>, %148, %cst_56 [1] : vector<8x64xf32> to vector<8xf32>
    %150 = vector.shape_cast %149 : vector<8xf32> to vector<8x1xf32>
    %cst_57 = arith.constant 6.400000e+01 : f32
    %151 = vector.broadcast %cst_57 : f32 to vector<8x1xf32>
    %152 = arith.divf %150, %151 : vector<8x1xf32>
    %cst_58 = arith.constant 9.99999974E-6 : f32
    %153 = vector.broadcast %cst_58 : f32 to vector<8x1xf32>
    %154 = arith.addf %152, %153 : vector<8x1xf32>
    %155 = math.rsqrt %154 : vector<8x1xf32>
    %156 = vector.broadcast %155 : vector<8x1xf32> to vector<8x64xf32>
    %157 = arith.mulf %147, %156 : vector<8x64xf32>
    %158 = vector.broadcast %140 : vector<1x64xf32> to vector<8x64xf32>
    %159 = arith.mulf %157, %158 : vector<8x64xf32>
    %160 = vector.broadcast %141 : vector<1x64xf32> to vector<8x64xf32>
    %161 = arith.addf %159, %160 : vector<8x64xf32>
    %c0_59 = arith.constant 0 : index
    %c0_60 = arith.constant 0 : index
    %162 = vector.load %arg12[%c0_59, %c0_60] : memref<64x256xbf16, #tpu.memory_space<vmem>>, vector<64x256xbf16>
    %163 = arith.truncf %161 : vector<8x64xf32> to vector<8x64xbf16>
    %cst_61 = arith.constant dense<0.000000e+00> : vector<8x256xf32>
    %164 = tpu.matmul %163, %162, %cst_61 {dimension_numbers = #tpu.dot_dimension_numbers<[1], [0], [0], [1], [0, 0, 1, 1], [], []>} : vector<8x64xbf16>, vector<64x256xbf16>, vector<8x256xf32> -> vector<8x256xf32>
    %c0_62 = arith.constant 0 : index
    %c0_63 = arith.constant 0 : index
    %165 = vector.load %arg13[%c0_62, %c0_63] : memref<1x256xf32, #tpu.memory_space<vmem>>, vector<1x256xf32>
    %166 = vector.broadcast %165 : vector<1x256xf32> to vector<8x256xf32>
    %167 = arith.addf %164, %166 : vector<8x256xf32>
    %cst_64 = arith.constant 1.702000e+00 : f32
    %168 = vector.broadcast %cst_64 : f32 to vector<8x256xf32>
    %169 = arith.mulf %168, %167 : vector<8x256xf32>
    %170 = arith.negf %169 : vector<8x256xf32>
    %171 = math.exp %170 : vector<8x256xf32>
    %cst_65 = arith.constant 1.000000e+00 : f32
    %172 = vector.broadcast %cst_65 : f32 to vector<8x256xf32>
    %173 = arith.addf %172, %171 : vector<8x256xf32>
    %174 = arith.divf %172, %173 : vector<8x256xf32>
    %175 = arith.mulf %167, %174 : vector<8x256xf32>
    %c0_66 = arith.constant 0 : index
    %c0_67 = arith.constant 0 : index
    %176 = vector.load %arg14[%c0_66, %c0_67] : memref<256x64xbf16, #tpu.memory_space<vmem>>, vector<256x64xbf16>
    %177 = arith.truncf %175 : vector<8x256xf32> to vector<8x256xbf16>
    %cst_68 = arith.constant dense<0.000000e+00> : vector<8x64xf32>
    %178 = tpu.matmul %177, %176, %cst_68 {dimension_numbers = #tpu.dot_dimension_numbers<[1], [0], [0], [1], [0, 0, 1, 1], [], []>} : vector<8x256xbf16>, vector<256x64xbf16>, vector<8x64xf32> -> vector<8x64xf32>
    %c0_69 = arith.constant 0 : index
    %c0_70 = arith.constant 0 : index
    %179 = vector.load %arg15[%c0_69, %c0_70] : memref<1x64xf32, #tpu.memory_space<vmem>>, vector<1x64xf32>
    %180 = vector.broadcast %179 : vector<1x64xf32> to vector<8x64xf32>
    %181 = arith.addf %178, %180 : vector<8x64xf32>
    %182 = arith.addf %139, %181 : vector<8x64xf32>
    %183 = arith.truncf %182 : vector<8x64xf32> to vector<8x64xbf16>
    %c0_71 = arith.constant 0 : index
    %c0_72 = arith.constant 0 : index
    %c0_73 = arith.constant 0 : index
    %184 = vector.load %arg16[%c0_71, %c0_72, %c0_73] : memref<1x8x64xbf16, #tpu.memory_space<vmem>>, vector<1x8x64xbf16>
    %185 = vector.shape_cast %184 : vector<1x8x64xbf16> to vector<8x64xbf16>
    %186 = vector.shape_cast %183 : vector<8x64xbf16> to vector<1x8x64xbf16>
    tpu.vector_store %arg16[%c0_71, %c0_72, %c0_73], %186 {strides = array<i32>} : memref<1x8x64xbf16, #tpu.memory_space<vmem>>, vector<1x8x64xbf16>,
    return
  }
  func.func @transform_0(%arg0: i32) -> (i32, i32, i32) {
    %c0_i32 = arith.constant 0 : i32
    %c0_i32_0 = arith.constant 0 : i32
    %c0_i32_1 = arith.constant 0 : i32
    return %arg0, %c0_i32, %c0_i32_0 : i32, i32, i32
  }
  func.func @transform_1(%arg0: i32) -> (i32, i32) {
    %c0_i32 = arith.constant 0 : i32
    %c0_i32_0 = arith.constant 0 : i32
    %c0_i32_1 = arith.constant 0 : i32
    return %c0_i32, %c0_i32_0 : i32, i32
  }
  func.func @transform_2(%arg0: i32) -> (i32, i32) {
    %c0_i32 = arith.constant 0 : i32
    %c0_i32_0 = arith.constant 0 : i32
    %c0_i32_1 = arith.constant 0 : i32
    return %c0_i32, %c0_i32_0 : i32, i32
  }
  func.func @transform_3(%arg0: i32) -> (i32, i32) {
    %c0_i32 = arith.constant 0 : i32
    %c0_i32_0 = arith.constant 0 : i32
    %c0_i32_1 = arith.constant 0 : i32
    return %c0_i32, %c0_i32_0 : i32, i32
  }
  func.func @transform_4(%arg0: i32) -> (i32, i32) {
    %c0_i32 = arith.constant 0 : i32
    %c0_i32_0 = arith.constant 0 : i32
    %c0_i32_1 = arith.constant 0 : i32
    return %c0_i32, %c0_i32_0 : i32, i32
  }
  func.func @transform_5(%arg0: i32) -> (i32, i32) {
    %c0_i32 = arith.constant 0 : i32
    %c0_i32_0 = arith.constant 0 : i32
    %c0_i32_1 = arith.constant 0 : i32
    return %c0_i32, %c0_i32_0 : i32, i32
  }
  func.func @transform_6(%arg0: i32) -> (i32, i32) {
    %c0_i32 = arith.constant 0 : i32
    %c0_i32_0 = arith.constant 0 : i32
    %c0_i32_1 = arith.constant 0 : i32
    return %c0_i32, %c0_i32_0 : i32, i32
  }
  func.func @transform_7(%arg0: i32) -> (i32, i32) {
    %c0_i32 = arith.constant 0 : i32
    %c0_i32_0 = arith.constant 0 : i32
    %c0_i32_1 = arith.constant 0 : i32
    return %c0_i32, %c0_i32_0 : i32, i32
  }
  func.func @transform_8(%arg0: i32) -> (i32, i32) {
    %c0_i32 = arith.constant 0 : i32
    %c0_i32_0 = arith.constant 0 : i32
    %c0_i32_1 = arith.constant 0 : i32
    return %c0_i32, %c0_i32_0 : i32, i32
  }
  func.func @transform_9(%arg0: i32) -> (i32, i32) {
    %c0_i32 = arith.constant 0 : i32
    %c0_i32_0 = arith.constant 0 : i32
    %c0_i32_1 = arith.constant 0 : i32
    return %c0_i32, %c0_i32_0 : i32, i32
  }
  func.func @transform_10(%arg0: i32) -> (i32, i32) {
    %c0_i32 = arith.constant 0 : i32
    %c0_i32_0 = arith.constant 0 : i32
    %c0_i32_1 = arith.constant 0 : i32
    return %c0_i32, %c0_i32_0 : i32, i32
  }
  func.func @transform_11(%arg0: i32) -> (i32, i32) {
    %c0_i32 = arith.constant 0 : i32
    %c0_i32_0 = arith.constant 0 : i32
    %c0_i32_1 = arith.constant 0 : i32
    return %c0_i32, %c0_i32_0 : i32, i32
  }
  func.func @transform_12(%arg0: i32) -> (i32, i32) {
    %c0_i32 = arith.constant 0 : i32
    %c0_i32_0 = arith.constant 0 : i32
    %c0_i32_1 = arith.constant 0 : i32
    return %c0_i32, %c0_i32_0 : i32, i32
  }
  func.func @transform_13(%arg0: i32) -> (i32, i32) {
    %c0_i32 = arith.constant 0 : i32
    %c0_i32_0 = arith.constant 0 : i32
    %c0_i32_1 = arith.constant 0 : i32
    return %c0_i32, %c0_i32_0 : i32, i32
  }
  func.func @transform_14(%arg0: i32) -> (i32, i32) {
    %c0_i32 = arith.constant 0 : i32
    %c0_i32_0 = arith.constant 0 : i32
    %c0_i32_1 = arith.constant 0 : i32
    return %c0_i32, %c0_i32_0 : i32, i32
  }
  func.func @transform_15(%arg0: i32) -> (i32, i32, i32) {
    %c0_i32 = arith.constant 0 : i32
    %c0_i32_0 = arith.constant 0 : i32
    %c0_i32_1 = arith.constant 0 : i32
    return %arg0, %c0_i32, %c0_i32_0 : i32, i32, i32
  }
}

module attributes {stable_mosaic.version = 11 : i64} {
  func.func @_post_kernel(%arg0: memref<3x64xbf16, #tpu.memory_space<vmem>>, %arg1: memref<1x64xf32, #tpu.memory_space<vmem>>, %arg2: memref<1x64xf32, #tpu.memory_space<vmem>>, %arg3: memref<64x64xbf16, #tpu.memory_space<vmem>>, %arg4: memref<3x64xf32, #tpu.memory_space<vmem>>) attributes {dimension_semantics = [], scalar_prefetch = 0 : i64, scratch_operands = 0 : i64, tpu.core_type = #tpu.core_type<tc>} {
    %c0 = arith.constant 0 : index
    %c0_0 = arith.constant 0 : index
    %0 = vector.load %arg0[%c0, %c0_0] : memref<3x64xbf16, #tpu.memory_space<vmem>>, vector<3x64xbf16>
    %1 = arith.extf %0 : vector<3x64xbf16> to vector<3x64xf32>
    %c0_1 = arith.constant 0 : index
    %c0_2 = arith.constant 0 : index
    %2 = vector.load %arg1[%c0_1, %c0_2] : memref<1x64xf32, #tpu.memory_space<vmem>>, vector<1x64xf32>
    %c0_3 = arith.constant 0 : index
    %c0_4 = arith.constant 0 : index
    %3 = vector.load %arg2[%c0_3, %c0_4] : memref<1x64xf32, #tpu.memory_space<vmem>>, vector<1x64xf32>
    %cst = arith.constant dense<0.000000e+00> : vector<3xf32>
    %4 = vector.multi_reduction <add>, %1, %cst [1] : vector<3x64xf32> to vector<3xf32>
    %5 = vector.shape_cast %4 : vector<3xf32> to vector<3x1xf32>
    %cst_5 = arith.constant 6.400000e+01 : f32
    %6 = vector.broadcast %cst_5 : f32 to vector<3x1xf32>
    %7 = arith.divf %5, %6 : vector<3x1xf32>
    %8 = vector.broadcast %7 : vector<3x1xf32> to vector<3x64xf32>
    %9 = arith.subf %1, %8 : vector<3x64xf32>
    %10 = arith.mulf %9, %9 : vector<3x64xf32>
    %cst_6 = arith.constant dense<0.000000e+00> : vector<3xf32>
    %11 = vector.multi_reduction <add>, %10, %cst_6 [1] : vector<3x64xf32> to vector<3xf32>
    %12 = vector.shape_cast %11 : vector<3xf32> to vector<3x1xf32>
    %cst_7 = arith.constant 6.400000e+01 : f32
    %13 = vector.broadcast %cst_7 : f32 to vector<3x1xf32>
    %14 = arith.divf %12, %13 : vector<3x1xf32>
    %cst_8 = arith.constant 9.99999974E-6 : f32
    %15 = vector.broadcast %cst_8 : f32 to vector<3x1xf32>
    %16 = arith.addf %14, %15 : vector<3x1xf32>
    %17 = math.rsqrt %16 : vector<3x1xf32>
    %18 = vector.broadcast %17 : vector<3x1xf32> to vector<3x64xf32>
    %19 = arith.mulf %9, %18 : vector<3x64xf32>
    %20 = vector.broadcast %2 : vector<1x64xf32> to vector<3x64xf32>
    %21 = arith.mulf %19, %20 : vector<3x64xf32>
    %22 = vector.broadcast %3 : vector<1x64xf32> to vector<3x64xf32>
    %23 = arith.addf %21, %22 : vector<3x64xf32>
    %c0_9 = arith.constant 0 : index
    %c0_10 = arith.constant 0 : index
    %24 = vector.load %arg3[%c0_9, %c0_10] : memref<64x64xbf16, #tpu.memory_space<vmem>>, vector<64x64xbf16>
    %25 = arith.truncf %23 : vector<3x64xf32> to vector<3x64xbf16>
    %cst_11 = arith.constant dense<0.000000e+00> : vector<3x64xf32>
    %26 = tpu.matmul %25, %24, %cst_11 {dimension_numbers = #tpu.dot_dimension_numbers<[1], [0], [0], [1], [0, 0, 1, 1], [], []>} : vector<3x64xbf16>, vector<64x64xbf16>, vector<3x64xf32> -> vector<3x64xf32>
    %27 = arith.mulf %26, %26 : vector<3x64xf32>
    %cst_12 = arith.constant dense<0.000000e+00> : vector<3xf32>
    %28 = vector.multi_reduction <add>, %27, %cst_12 [1] : vector<3x64xf32> to vector<3xf32>
    %29 = vector.shape_cast %28 : vector<3xf32> to vector<3x1xf32>
    %cst_13 = arith.constant 9.99999996E-13 : f32
    %30 = vector.broadcast %cst_13 : f32 to vector<3x1xf32>
    %31 = arith.addf %29, %30 : vector<3x1xf32>
    %32 = math.rsqrt %31 : vector<3x1xf32>
    %33 = vector.broadcast %32 : vector<3x1xf32> to vector<3x64xf32>
    %34 = arith.mulf %26, %33 : vector<3x64xf32>
    %c0_14 = arith.constant 0 : index
    %c0_15 = arith.constant 0 : index
    %35 = vector.load %arg4[%c0_14, %c0_15] : memref<3x64xf32, #tpu.memory_space<vmem>>, vector<3x64xf32>
    tpu.vector_store %arg4[%c0_14, %c0_15], %34 {strides = array<i32>} : memref<3x64xf32, #tpu.memory_space<vmem>>, vector<3x64xf32>,
    return
  }
}

module attributes {stable_mosaic.version = 11 : i64} {
  func.func @_logits_kernel(%arg0: memref<2x64xbf16, #tpu.memory_space<vmem>>, %arg1: memref<3x64xbf16, #tpu.memory_space<vmem>>, %arg2: memref<2x3xf32, #tpu.memory_space<vmem>>) attributes {dimension_semantics = [], scalar_prefetch = 0 : i64, scratch_operands = 0 : i64, tpu.core_type = #tpu.core_type<tc>} {
    %c0 = arith.constant 0 : index
    %c0_0 = arith.constant 0 : index
    %0 = vector.load %arg0[%c0, %c0_0] : memref<2x64xbf16, #tpu.memory_space<vmem>>, vector<2x64xbf16>
    %c0_1 = arith.constant 0 : index
    %c0_2 = arith.constant 0 : index
    %1 = vector.load %arg1[%c0_1, %c0_2] : memref<3x64xbf16, #tpu.memory_space<vmem>>, vector<3x64xbf16>
    %cst = arith.constant dense<0.000000e+00> : vector<2x3xf32>
    %2 = tpu.matmul %0, %1, %cst {dimension_numbers = #tpu.dot_dimension_numbers<[1], [1], [0], [0], [0, 0, 1, 0], [], []>} : vector<2x64xbf16>, vector<3x64xbf16>, vector<2x3xf32> -> vector<2x3xf32>
    %cst_3 = arith.constant 14.2857141 : f32
    %3 = vector.broadcast %cst_3 : f32 to vector<2x3xf32>
    %4 = arith.mulf %3, %2 : vector<2x3xf32>
    %c0_4 = arith.constant 0 : index
    %c0_5 = arith.constant 0 : index
    %5 = vector.load %arg2[%c0_4, %c0_5] : memref<2x3xf32, #tpu.memory_space<vmem>>, vector<2x3xf32>
    tpu.vector_store %arg2[%c0_4, %c0_5], %4 {strides = array<i32>} : memref<2x3xf32, #tpu.memory_space<vmem>>, vector<2x3xf32>,
    return
  }
}

</mosaic_0001>

<bundles_post_ra>
// kernel: _lambda_.10
= control target key start
LH: loop header
LB: loop body
LE: loop exit
PB: predicated region body
PF: predicated region fallthrough
CT: control target
= control target key end

     0   :  { %v134_v0 = vmov 0.0   ;;  %vm135_vm0 = vmmov 0   ;;  %vm55_vm1 = vcmask 523264   ;;  %vm99_vm2 = vcmask 779264   ;;  %s177_s1 = inlined_call_operand.vmem [shape: bf16[64,96], index: 1, kind: input, shape index: {}]   ;;  %s178_s0 = inlined_call_operand.vmem [shape: bf16[2,64], index: 0, kind: input, shape index: {}]   ;;  %s179_s2 = inlined_call_operand.vmem [shape: f32[1,96], index: 2, kind: input, shape index: {}]   ;;  %s180_s3 = inlined_call_operand.vmem [shape: f32[2,96], index: 3, kind: output, shape index: {}]  }
   0x1   :  { %116 = vmatprep.subr.bf16.mxu0 %v134_v0  ;;  %v130_v1 = vld [vmem:[%s177_s1] sm:$0xff]   ;;  %124 = vmatprep.mubr.msk.bf16.mxu0 %vm135_vm0, %v134_v0  ;;  %v131_v2 = vld [vmem:[%s177_s1 + $0x8] sm:$0xff]   ;;  %v132_v3 = vld [vmem:[%s177_s1 + $0x10] sm:$0xff]  }
   0x2   :  { %117 = vmatpush3.bf16.msra.mxu0 %v130_v1  ;;  %v133_v4 = vld [vmem:[%s177_s1 + $0x18] sm:$0xff]   ;;  %v15_v5 = vld [vmem:[%s178_s0] sm:$0x1] }
   0x3   :  { %118 = vmatprep.subr.bf16.mxu0 %v134_v0  ;;  %v105_v6 = vld [vmem:[%s179_s2] ss:$0 sm:$0xff] }
   0x6   :  { %119 = vmatpush3.bf16.msra.mxu0 %v131_v2 }
   0x7   :  { %120 = vmatprep.subr.bf16.mxu0 %v134_v0 }
   0xa   :  { %121 = vmatpush3.bf16.msra.mxu0 %v132_v3 }
   0xb   :  { %122 = vmatprep.subr.bf16.mxu0 %v134_v0 }
   0xe   :  { %123 = vmatpush3.bf16.msra.mxu0 %v133_v4 }
  0x11   :  { %125 = vmatmul.mubr.msk.bf16.vlgmr.msra.gmra.mrb[0].mxu0 %vm55_vm1, %v15_v5 }
  0xe4   :  { %v93_v7 = vpop.f32.mrb[0].mxu0 }
  0xe5   :  { %v94_v8 = vadd.f32 %v105_v6, %v93_v7  ;;  %v126_v9 = vpop.f32.mrb[1].mxu0 }
  0xe6   :  { %v96_v10 = vpop.f32.mrb[2].mxu0 }
  0xe7   :  { %100 = vst.msk [vmem:[%s180_s3] sm:$0x3] %vm99_vm2, %v94_v8  ;;  %v127_v11 = vpop.f32.mrb[3].mxu0 }

// kernel: _lambda_.15
= control target key start
LH: loop header
LB: loop body
LE: loop exit
PB: predicated region body
PF: predicated region fallthrough
CT: control target
= control target key end

     0   :  { %v195_v0 = vmov 0   ;;  %vm115_vm0 = vcmask 523264   ;;  %vm159_vm1 = vcmask 785408   ;;  %s253_s1 = inlined_call_operand.vmem [shape: bf16[192,96], index: 1, kind: input, shape index: {}]   ;;  %s254_s0 = inlined_call_operand.vmem [shape: bf16[8,192], index: 0, kind: input, shape index: {}]   ;;  %s255_s2 = inlined_call_operand.vmem [shape: f32[8,96], index: 2, kind: output, shape index: {}]  }
   0x1   :  { %119 = vmatprep.subr.bf16.mxu0 %v195_v0  ;;  %v181_v1 = vld [vmem:[%s253_s1] sm:$0xff]   ;;  %v182_v2 = vld [vmem:[%s253_s1 + $0x8] sm:$0xff]   ;;  %v183_v3 = vld [vmem:[%s253_s1 + $0x10] sm:$0xff]  }
   0x2   :  { %120 = vmatpush1.bf16.msra.mxu0 %v181_v1  ;;  %v184_v4 = vld [vmem:[%s253_s1 + $0x18] sm:$0xff]   ;;  %v12_v5 = vld [vmem:[%s254_s0] sm:$0xff]  ;;  %v186_v8 = vld [vmem:[%s253_s1 + $0x28] sm:$0xff]  }
   0x3   :  { %121 = vmatprep.subr.bf16.mxu0 %v195_v0  ;;  %v166_v6 = vcombine.high %v12_v5, %v12_v5  ;;  %v185_v7 = vld [vmem:[%s253_s1 + $0x20] sm:$0xff]   ;;  %v187_v9 = vld [vmem:[%s253_s1 + $0x30] sm:$0xff]   ;;  %v188_v10 = vld [vmem:[%s253_s1 + $0x38] sm:$0xff]   ;;  %v165_v15 = vcombine.low %v12_v5, %v12_v5 }
   0x4   :  { %v189_v11 = vld [vmem:[%s253_s1 + $0x40] sm:$0xff]   ;;  %v190_v12 = vld [vmem:[%s253_s1 + $0x48] sm:$0xff]   ;;  %v191_v13 = vld [vmem:[%s253_s1 + $0x50] sm:$0xff]  }
   0x5   :  { %179 = vmatprep.mubr.msk.bf16.mxu0 %vm115_vm0, %v166_v6  ;;  %v192_v14 = vld [vmem:[%s253_s1 + $0x58] sm:$0xff]  }
   0x6   :  { %122 = vmatpush1.bf16.msra.mxu0 %v182_v2 }
   0x7   :  { %123 = vmatprep.subr.bf16.mxu0 %v195_v0 }
   0xa   :  { %124 = vmatpush1.bf16.msra.mxu0 %v183_v3 }
   0xb   :  { %125 = vmatprep.subr.bf16.mxu0 %v195_v0 }
   0xe   :  { %126 = vmatpush1.bf16.msra.mxu0 %v184_v4 }
   0xf   :  { %127 = vmatprep.subr.bf16.mxu0 %v195_v0 }
  0x12   :  { %128 = vmatpush1.bf16.msra.mxu0 %v185_v7 }
  0x13   :  { %129 = vmatprep.subr.bf16.mxu0 %v195_v0 }
  0x16   :  { %130 = vmatpush1.bf16.msra.mxu0 %v186_v8 }
  0x17   :  { %131 = vmatprep.subr.bf16.mxu0 %v195_v0 }
  0x1a   :  { %132 = vmatpush1.bf16.msra.mxu0 %v187_v9 }
  0x1b   :  { %133 = vmatprep.subr.bf16.mxu0 %v195_v0 }
  0x1e   :  { %134 = vmatpush1.bf16.msra.mxu0 %v188_v10 }
  0x1f   :  { %135 = vmatprep.subr.bf16.mxu0 %v195_v0 }
  0x22   :  { %136 = vmatpush1.bf16.msra.mxu0 %v189_v11 }
  0x23   :  { %137 = vmatprep.subr.bf16.mxu0 %v195_v0 }
  0x26   :  { %138 = vmatpush1.bf16.msra.mxu0 %v190_v12 }
  0x27   :  { %139 = vmatprep.subr.bf16.mxu0 %v195_v0 }
  0x2a   :  { %140 = vmatpush1.bf16.msra.mxu0 %v191_v13 }
  0x2b   :  { %141 = vmatprep.subr.bf16.mxu0 %v195_v0 }
  0x2e   :  { %142 = vmatpush1.bf16.msra.mxu0 %v192_v14 }
  0x31   :  { %152 = vmatmul.mubr.bf16.vlgmr.msra.gmra.mrb[0].mxu0 %v165_v15 }
 0x104   :  { %v153_v16 = vpop.f32.mrb[0].mxu0 }
 0x105   :  { %160 = vst.msk [vmem:[%s255_s2] sm:$0xff] %vm159_vm1, %v153_v16  ;;  %v155_v17 = vpop.f32.mrb[1].mxu0 }
 0x106   :  { %v156_v18 = vpop.f32.mrb[2].mxu0 }
 0x107   :  { %v157_v19 = vpop.f32.mrb[3].mxu0 }

// kernel: _lambda_.18
= control target key start
LH: loop header
LB: loop body
LE: loop exit
PB: predicated region body
PF: predicated region fallthrough
CT: control target
= control target key end

     0   :  { %vm22_vm0 = vcmask 779264   ;;  %v201_v3 = vmov 0.0   ;;  %vm202_vm1 = vmmov 0   ;;  %vm100_vm2 = vcmask 785408   ;;  %s258_s0 = inlined_call_operand.vmem [shape: bf16[2,96], index: 0, kind: input, shape index: {}]   ;;  %s259_s3 = inlined_call_operand.vmem [shape: bf16[96,64], index: 3, kind: input, shape index: {}]   ;;  %s260_s1 = inlined_call_operand.vmem [shape: f32[1,96], index: 1, kind: input, shape index: {}]   ;;  %s261_s2 = inlined_call_operand.vmem [shape: f32[1,96], index: 2, kind: input, shape index: {}]   ;;  %s262_s4 = inlined_call_operand.vmem [shape: f32[2,64], index: 4, kind: output, shape index: {}]  }
   0x1   :  { %v18_v0 = vld [vmem:[%s258_s0] sm:$0x1]  ;;  %173 = vmatprep.subr.bf16.mxu0 %v201_v3  ;;  %v192_v10 = vld [vmem:[%s259_s3 + $0x8] sm:$0xff]   ;;  %v193_v11 = vld [vmem:[%s259_s3 + $0x10] sm:$0xff]   ;;  %185 = vmatprep.mubr.msk.bf16.mxu0 %vm202_vm1, %v201_v3  ;;  %vm145_vm3 = vcmask 517120  }
   0x2   :  { %v19_v1 = vunpack.c.l.bf16 %v18_v0  ;;  %v191_v9 = vld [vmem:[%s259_s3] sm:$0xff]   ;;  %v194_v12 = vld [vmem:[%s259_s3 + $0x18] sm:$0xff]   ;;  %v196_v14 = vld [vmem:[%s259_s3 + $0x28] sm:$0xff]  }
   0x3   :  { %174 = vmatpush3.bf16.msra.mxu0 %v191_v9  ;;  %v195_v13 = vld [vmem:[%s259_s3 + $0x20] sm:$0xff]  }
   0x4   :  { %v23_v2 = vsel %vm22_vm0, %v19_v1, 0.0  ;;  %175 = vmatprep.subr.bf16.mxu0 %v201_v3  ;;  %v157_v19 = vld [vmem:[%s260_s1] ss:$0 sm:$0xff] }
   0x5   :  { %24 = vadd.xlane.f32.xlu0 %v23_v2  ;;  %v158_v21 = vld [vmem:[%s261_s2] ss:$0 sm:$0xff] }
   0x7   :  { %176 = vmatpush3.bf16.msra.mxu0 %v192_v10 }
   0x8   :  { %177 = vmatprep.subr.bf16.mxu0 %v201_v3 }
   0xb   :  { %178 = vmatpush3.bf16.msra.mxu0 %v193_v11 }
   0xc   :  { %179 = vmatprep.subr.bf16.mxu0 %v201_v3 }
   0xf   :  { %180 = vmatpush3.bf16.msra.mxu0 %v194_v12 }
  0x10   :  { %181 = vmatprep.subr.bf16.mxu0 %v201_v3 }
  0x13   :  { %182 = vmatpush3.bf16.msra.mxu0 %v195_v13 }
  0x14   :  { %183 = vmatprep.subr.bf16.mxu0 %v201_v3 }
  0x17   :  { %184 = vmatpush3.bf16.msra.mxu0 %v196_v14 }
  0x92   :  { %v25_v4 = vpop.xlane.xlu0 %24 }
  0x93   :  { %v27_v5 = vmul.f32 0.010416667, %v25_v4 }
  0x95   :  { %v28_v6 = vsub.f32 %v19_v1, %v27_v5 }
  0x97   :  { %v29_v7 = vmul.f32 %v28_v6, %v28_v6 }
  0x99   :  { %v30_v8 = vsel %vm22_vm0, %v29_v7, 0.0 }
  0x9a   :  { %31 = vadd.xlane.f32.xlu0 %v30_v8 }
 0x127   :  { %v32_v15 = vpop.xlane.xlu0 %31 }
 0x128   :  { %v33_v16 = vmul.f32 0.010416667, %v32_v15 }
 0x12a   :  { %v34_v17 = vadd.f32 1e-05, %v33_v16 }
 0x12c   :  { %197 = vrsqrt.f32 %v34_v17 }
 0x136   :  { %v198_v18 = vpop.eup %197 }
 0x137   :  { %v36_v20 = vmul.f32 %v198_v18, %v28_v6 }
 0x139   :  { %v43_v22 = vmul.f32 %v157_v19, %v36_v20 }
 0x13b   :  { %v50_v23 = vadd.f32 %v158_v21, %v43_v22 }
 0x13d   :  { %v63_v24 = vpack.c.bf16 %v50_v23, %v50_v23 }
 0x13f   :  { %186 = vmatmul.mubr.msk.bf16.vlgmr.msra.gmra.mrb[0].mxu0 %vm100_vm2, %v63_v24 }
 0x212   :  { %v138_v25 = vpop.f32.mrb[0].mxu0 }
 0x213   :  { %v187_v26 = vpop.f32.mrb[1].mxu0  ;;  %v144_v27 = vmul.f32 %v138_v25, %v138_v25 }
 0x214   :  { %v141_v28 = vpop.f32.mrb[2].mxu0 }
 0x215   :  { %v188_v29 = vpop.f32.mrb[3].mxu0  ;;  %v146_v30 = vsel %vm145_vm3, %v144_v27, 0.0 }
 0x216   :  { %147 = vadd.xlane.f32.xlu1 %v146_v30 }
 0x2a3   :  { %v148_v31 = vpop.xlane.xlu1 %147 }
 0x2a4   :  { %v149_v32 = vadd.f32 1e-12, %v148_v31 }
 0x2a6   :  { %199 = vrsqrt.f32 %v149_v32 }
 0x2b0   :  { %v200_v33 = vpop.eup %199 }
 0x2b1   :  { %v151_v34 = vmul.f32 %v200_v33, %v138_v25 }
 0x2b3   :  { %152 = vst.msk [vmem:[%s262_s4] sm:$0x3] %vm145_vm3, %v151_v34 }

// kernel: _lambda_.17
= control target key start
LH: loop header
LB: loop body
LE: loop exit
PB: predicated region body
PF: predicated region fallthrough
CT: control target
= control target key end

     0   :  { %s2444_s29 = smov 0   ;;  %s2828_s0 = inlined_call_operand.vmem [shape: bf16[2,7,96], index: 0, kind: input, shape index: {}]   ;;  %s2829_s1 = inlined_call_operand.vmem [shape: bf16[7,96], index: 1, kind: input, shape index: {}]   ;;  %s2830_s2 = inlined_call_operand.vmem [shape: f32[1,96], index: 2, kind: input, shape index: {}, may-alias: {2,8}]   ;;  %s2831_s3 = inlined_call_operand.vmem [shape: f32[1,96], index: 3, kind: input, shape index: {}, may-alias: {3,7,9,13}]   ;;  %s2832_s4 = inlined_call_operand.vmem [shape: bf16[96,288], index: 4, kind: input, shape index: {}]   ;;  %s2833_s5 = inlined_call_operand.vmem [shape: f32[1,288], index: 5, kind: input, shape index: {}]   ;;  %s2834_s6 = inlined_call_operand.vmem [shape: bf16[96,96], index: 6, kind: input, shape index: {}]   ;;  %s2835_s7 = inlined_call_operand.vmem [shape: f32[1,96], index: 7, kind: input, shape index: {}, may-alias: {3,7,9,13}]   ;;  %s2836_s8 = inlined_call_operand.vmem [shape: f32[1,96], index: 8, kind: input, shape index: {}, may-alias: {2,8}]   ;;  %s2837_s9 = inlined_call_operand.vmem [shape: f32[1,96], index: 9, kind: input, shape index: {}, may-alias: {3,7,9,13}]   ;;  %s2838_s10 = inlined_call_operand.vmem [shape: bf16[96,384], index: 10, kind: input, shape index: {}]   ;;  %s2839_s11 = inlined_call_operand.vmem [shape: f32[1,384], index: 11, kind: input, shape index: {}]   ;;  %s2840_s12 = inlined_call_operand.vmem [shape: bf16[384,96], index: 12, kind: input, shape index: {}]   ;;  %s2841_s13 = inlined_call_operand.vmem [shape: f32[1,96], index: 13, kind: input, shape index: {}, may-alias: {3,7,9,13}]   ;;  %s2842_s14 = inlined_call_operand.vmem [shape: bf16[2,7,96], index: 14, kind: output, shape index: {}]  }
   0x1 LB: > { %s1926_s30 = sadd.s32 4294967295, %s2349_s29   ;;  %p1930_p0 = scmp.ge.s32.totalorder %s2349_s29, 1  ;;  %s2349_s29 = sphi %s2444_s29, %s24_s29  }
   0x2   : > { %p411_p1 = scmp.lt.s32.totalorder %s2349_s29, 3 }
   0x4   : > { %p412_p2 = pnand %p1930_p0, %p411_p1 }
   0x5   : > { %p455_p3 = scmp.lt.s32.totalorder (!%p412_p2), %s1926_s30, 1  ;;  %v466_v0 = vlaneseq (!%p412_p2)  ;;  %v471_v1 = vld [vmem:[%s2829_s1] sm:$0xf] (!%p412_p2)  ;;  %vm476_vm3 = vcmask (!%p412_p2), 784384   ;;  %v2233_v8 = vld [vmem:[%s2832_s4 + $0x4] ss:$12 sps:$4 sm:$0xff] (!%p412_p2)  }
   0x6   : > { %415 = sbr.rel (%p412_p2) target bundleno = 2568 (0xa08), region = 76  ;;  %v472_v3 = vunpack.c.l.bf16 (!%p412_p2), %v471_v1  ;;  %v2351_v9 = vmov (!%p412_p2), 0.0   ;;  %647 = vmatprep.subr.bf16.mxu0 (!%p412_p2), %v2233_v8  ;;  %v2235_v15 = vld [vmem:[%s2832_s4] ss:$12 sps:$4 sm:$0xff] (!%p412_p2)   ;;  %v2236_v16 = vld [vmem:[%s2832_s4 + $0x8] ss:$12 sps:$4 sm:$0xff] (!%p412_p2)  }
   0x7   : > { %v2457_v2 = vshrl.u32 (!%p412_p2), %v466_v0, 7  ;;  %2091 = vmatprep.subr.bf16.mxu1 (!%p412_p2), %v2351_v9  ;;  %648 = vmatpush1.bf16.msra.mxu0 (!%p412_p2), %v2235_v15  ;;  %v2237_v17 = vld [vmem:[%s2832_s4 + $0x1c] ss:$12 sps:$4 sm:$0xff] (!%p412_p2)   ;;  %v2239_v18 = vld [vmem:[%s2832_s4 + $0x18] ss:$12 sps:$4 sm:$0xff] (!%p412_p2)   ;;  %v2352_v27 = vmov (!%p412_p2), 0  }
   0x8   : > { %2092 = vmatpush3.bf16.msra.mxu1 (!%p412_p2), %v2236_v16  ;;  %v2240_v19 = vld [vmem:[%s2832_s4 + $0x20] ss:$12 sps:$4 sm:$0xff] (!%p412_p2)   ;;  %649 = vmatprep.subr.bf16.mxu0 (!%p412_p2), %v2237_v17  ;;  %v2243_v21 = vld [vmem:[%s2832_s4 + $0x30] ss:$12 sps:$4 sm:$0xff] (!%p412_p2)   ;;  %v2244_v22 = vld [vmem:[%s2832_s4 + $0x38] ss:$12 sps:$4 sm:$0xff] (!%p412_p2)  }
   0x9   : > { %vm468_vm0 = vcmp.ge.s32.totalorder (!%p412_p2), %v2457_v2, 5  ;;  %vm469_vm1 = vcmp.lt.s32.totalorder (!%p412_p2), %v2457_v2, 7  ;;  %2093 = vmatprep.subr.bf16.mxu1 (!%p412_p2), %v2351_v9  ;;  %v2241_v20 = vld [vmem:[%s2832_s4 + $0x34] ss:$12 sps:$4 sm:$0xff] (!%p412_p2)   ;;  %v2245_v23 = vld [vmem:[%s2832_s4 + $0x4c] ss:$12 sps:$4 sm:$0xff] (!%p412_p2)   ;;  %679 = vmatprep.mubr.bf16.mxu0 (!%p412_p2), %v2352_v27 }
   0xa   : > { %vm470_vm2 = vmand (!%p412_p2), %vm468_vm0, %vm469_vm1  ;;  %v2247_v24 = vld [vmem:[%s2832_s4 + $0x48] ss:$12 sps:$4 sm:$0xff] (!%p412_p2)   ;;  %v2248_v25 = vld [vmem:[%s2832_s4 + $0x50] ss:$12 sps:$4 sm:$0xff] (!%p412_p2)   ;;  %vm2353_vm4 = vmmov (!%p412_p2), 0   ;;  %vm643_vm5 = vcmask (!%p412_p2), 785408  }
   0xb   : > { %650 = vmatpush1.bf16.msra.mxu0 (!%p412_p2), %v2239_v18  ;;  %v2249_v26 = vld [vmem:[%s2832_s4 + $0x64] ss:$12 sps:$4 sm:$0xff] (!%p412_p2)   ;;  %2103 = vmatprep.mubr.msk.bf16.mxu1 (!%p412_p2), %vm2353_vm4, %v2351_v9  ;;  %v2251_v28 = vld [vmem:[%s2832_s4 + $0x60] ss:$12 sps:$4 sm:$0xff] (!%p412_p2)   ;;  %v2252_v29 = vld [vmem:[%s2832_s4 + $0x68] ss:$12 sps:$4 sm:$0xff] (!%p412_p2)  }
   0xc   : > { %2094 = vmatpush3.bf16.msra.mxu1 (!%p412_p2), %v2240_v19  ;;  %651 = vmatprep.subr.bf16.mxu0 (!%p412_p2), %v2241_v20  ;;  %v2253_v30 = vld [vmem:[%s2832_s4 + $0x7c] ss:$12 sps:$4 sm:$0xff] (!%p412_p2)   ;;  %v2255_v31 = vld [vmem:[%s2832_s4 + $0x78] ss:$12 sps:$4 sm:$0xff] (!%p412_p2)   ;;  %v2256_v32 = vld [vmem:[%s2832_s4 + $0x80] ss:$12 sps:$4 sm:$0xff] (!%p412_p2)  }
   0xd   : > { %s2844_s30 = smov (!%p455_p3, %s1926_s30), 1  ;;  %2095 = vmatprep.subr.bf16.mxu1 %v2351_v9  ;;  %v1933_v37 = vld [vmem:[%s2830_s2] ss:$0 sm:$0xff]  ;;  %v534_v43 = vsub.s32 0, %v2457_v2  ;;  %v538_v45 = vsub.s32 1, %v2457_v2  ;;  %s2354_s24 = smov 32  }
   0xe   : > { %s1931_s17 = sshll.u32 %s2844_s30, 2  ;;  %v1934_v39 = vld [vmem:[%s2831_s3] ss:$0 sm:$0xff]  ;;  %s2355_s25 = smov 8   ;;  %vm734_vm6 = vcmask 195584   ;;  %vm856_vm7 = vcmask 64512  }
   0xf   : > { %s458_s20 = scalar_lea.vmem %s2828_s0, %s1931_s17  ;;  %652 = vmatpush1.bf16.msra.mxu0 %v2243_v21  ;;  %v2554_v44 = vld [vmem:[%s2833_s5] sm:$0x7]  ;;  %s2356_s26 = smov 112   ;;  %vm781_vm8 = vcmask 55296   ;;  %vm802_vm9 = vcmask 1042432   ;;  %vm803_vm10 = vcmask 1043456  }
  0x10   : > { %v464_v4 = vld [vmem:[%s458_s20] sm:$0xf]  ;;  %2096 = vmatpush3.bf16.msra.mxu1 %v2244_v22  ;;  %653 = vmatprep.subr.bf16.mxu0 %v2245_v23  ;;  %v535_v46 = vrot.slane %v2554_v44, %v534_v43  ;;  %v539_v47 = vrot.slane %v2554_v44, %v538_v45  ;;  %s2357_s27 = smov 104   ;;  %s2358_s28 = smov 80   ;;  %vm798_vm11 = vcmask 56320   ;;  %vm1032_vm12 = vcmask 130048  }
  0x11   : > { %v465_v5 = vunpack.c.l.bf16 %v464_v4  ;;  %2097 = vmatprep.subr.bf16.mxu1 %v2351_v9  ;;  %s2359_s15 = smov 88   ;;  %s2360_s16 = smov 56   ;;  %vm1203_vm13 = vcmask 392192   ;;  %vm1205_vm14 = vcmask 588800   ;;  %vm1867_vm15 = vcmask 781312  }
  0x12   : > { %s2361_s18 = smov 64   ;;  %s2363_s19 = smov 16   ;;  %vm1868_vm0 = vsmask.f32 3328 }
  0x13   : > { %v2467_v6 = vsel %vm470_vm2, %v472_v3, %v465_v5  ;;  %654 = vmatpush1.bf16.msra.mxu0 %v2247_v24  ;;  %s2364_s20 = smov 120   ;;  %s2365_s21 = smov 40   ;;  %vm1869_vm1 = vmand %vm1867_vm15, %vm1868_vm0 }
  0x14   : > { %v477_v7 = vsel %vm476_vm3, %v2467_v6, 0.0  ;;  %2098 = vmatpush3.bf16.msra.mxu1 %v2248_v25  ;;  %655 = vmatprep.subr.bf16.mxu0 %v2249_v26  ;;  %s2367_s22 = smov 48   ;;  %s2368_s23 = smov 72  }
  0x15   : > { %478 = vadd.xlane.f32.xlu0 %v477_v7  ;;  %2099 = vmatprep.subr.bf16.mxu1 %v2351_v9 }
  0x17   : > { %656 = vmatpush1.bf16.msra.mxu0 %v2251_v28 }
  0x18   : > { %2100 = vmatpush3.bf16.msra.mxu1 %v2252_v29  ;;  %657 = vmatprep.subr.bf16.mxu0 %v2253_v30 }
  0x19   : > { %2101 = vmatprep.subr.bf16.mxu1 %v2351_v9 }
  0x1b   : > { %658 = vmatpush1.bf16.msra.mxu0 %v2255_v31 }
  0x1c   : > { %2102 = vmatpush3.bf16.msra.mxu1 %v2256_v32  ;;  %2119 = vmatprep.subr.bf16.mxu0 %v2351_v9 }
  0x1d   : > { %2107 = vmatprep.subr.bf16.mxu1 %v2351_v9 }
  0xa2   : > { %v479_v10 = vpop.xlane.xlu0 %478 }
  0xa3   : > { %v481_v11 = vmul.f32 0.010416667, %v479_v10 }
  0xa5   : > { %v482_v12 = vsub.f32 %v2467_v6, %v481_v11 }
  0xa7   : > { %v483_v13 = vmul.f32 %v482_v12, %v482_v12 }
  0xa9   : > { %v484_v14 = vsel %vm476_vm3, %v483_v13, 0.0 }
  0xaa   : > { %485 = vadd.xlane.f32.xlu0 %v484_v14 }
 0x137   : > { %v486_v33 = vpop.xlane.xlu0 %485 }
 0x138   : > { %v487_v34 = vmul.f32 0.010416667, %v486_v33 }
 0x13a   : > { %v488_v35 = vadd.f32 1e-05, %v487_v34 }
 0x13c   : > { %2311 = vrsqrt.f32 %v488_v35 }
 0x146   : > { %v2312_v36 = vpop.eup %2311 }
 0x147   : > { %v490_v38 = vmul.f32 %v2312_v36, %v482_v12 }
 0x149   : > { %v497_v40 = vmul.f32 %v1933_v37, %v490_v38 }
 0x14b   : > { %v504_v41 = vadd.f32 %v1934_v39, %v497_v40 }
 0x14d   : > { %v529_v42 = vpack.c.bf16 %v504_v41, %v504_v41 }
 0x14f   : > { %1953 = vmatmul.mubr.msk.bf16.vlgmr.msra.gmra.mrb[0].mxu0 %vm643_vm5, %v529_v42  ;;  %2104 = vmatmul.mubr.msk.bf16.vlgmr.msra.gmra.mrb[0].mxu1 %vm643_vm5, %v529_v42 }
 0x150   : > { %2109 = vmatprep.mubr.msk.bf16.mxu1 %vm2353_vm4, %v2351_v9  ;;  %2121 = vmatprep.mubr.msk.bf16.mxu0 %vm2353_vm4, %v2351_v9 }
 0x222   : > { %v681_v48 = vpop.f32.mrb[0].mxu0  ;;  %v2563_v49 = vpop.f32.mrb[0].mxu1 }
 0x223   : > { %v682_v50 = vadd.f32 %v681_v48, %v535_v46  ;;  %v683_v51 = vpop.f32.mrb[1].mxu0  ;;  %v2105_v52 = vpop.f32.mrb[1].mxu1 }
 0x224   : > { %v684_v53 = vadd.f32 %v683_v51, %v539_v47  ;;  %v685_v54 = vpop.f32.mrb[2].mxu0  ;;  %v725_v55 = vpop.f32.mrb[2].mxu1  ;;  %v2362_v51 = vmov 65535  }
 0x225   : > { %v686_v56 = vpop.f32.mrb[3].mxu0  ;;  %v2106_v57 = vpop.f32.mrb[3].mxu1  ;;  %v730_v58 = vpack.c.bf16 %v682_v50, %v682_v50  ;;  %v728_v60 = vmul.f32 0.20412415, %v682_v50  ;;  %v804_v52 = vsel %vm802_vm9, 4294967295, %v2362_v51 }
 0x226   : > { %v2565_v59 = vpack.c.bf16 %v684_v53, %v684_v53  ;;  %v805_v56 = vsel %vm803_vm10, %v804_v52, 0 }
 0x227   : > { %732 = vrot.lane.b32.xlu1 %v730_v58, %s2354_s24  ;;  %v729_v61 = vpack.c.bf16 %v728_v60, %v728_v60 }
 0x228   : > { %854 = vrot.lane.b32.xlu0 %v2565_v59, %s2355_s25 }
 0x22b   : > { %852 = vrot.lane.b32.xlu1 %v730_v58, %s2355_s25 }
 0x22f   : > { %966 = vrot.lane.b32.xlu1 %v2565_v59, %s2356_s26 }
 0x233   : > { %850 = vrot.lane.b32.xlu1 %v729_v61, %s2357_s27 }
 0x237   : > { %964 = vrot.lane.b32.xlu1 %v729_v61, %s2358_s28 }
 0x23b   : > { %1082 = vrot.lane.b32.xlu1 %v2565_v59, %s2359_s15  ;;  %s462_s15 = scalar_lea.vmem %s2842_s14, %s1931_s17 }
 0x23f   : > { %1080 = vrot.lane.b32.xlu1 %v729_v61, %s2360_s16 }
 0x299   : > { %v733_v62 = vpop.permute.xlu1 %732 }
 0x29a   : > { %v739_v63 = vsel %vm734_vm6, %v733_v62, 0  ;;  %v855_v0 = vpop.permute.xlu0 %854  ;;  %v542_v62 = vsub.s32 2, %v2457_v2 }
 0x29b   : > { %2108 = vmatpush3.bf16.xpose.msra.mxu1 %v739_v63 }
 0x29c   : > { %2113 = vmatprep.subr.bf16.mxu1 %v2351_v9 }
 0x29d   : > { %v853_v1 = vpop.permute.xlu1 %852 }
 0x29e   : > { %v857_v3 = vsel %vm856_vm7, %v853_v1, %v855_v0  ;;  %v543_v0 = vrot.slane %v2554_v44, %v542_v62 }
 0x29f   : > { %v862_v4 = vsel %vm734_vm6, %v857_v3, 0 }
 0x2a0   : > { %2120 = vmatpush3.bf16.xpose.msra.mxu0 %v862_v4  ;;  %v723_v3 = vadd.f32 %v2563_v49, %v543_v0 }
 0x2a1   : > { %v967_v5 = vpop.permute.xlu1 %966  ;;  %2131 = vmatprep.subr.bf16.mxu0 %v2351_v9 }
 0x2a2   : > { %2110 = vmatmul.mubr.msk.bf16.vlgmr.msra.gmra.mrb[4].mxu1 %vm734_vm6, %v729_v61  ;;  %v972_v8 = vsel %vm734_vm6, %v967_v5, 0  ;;  %v1026_v5 = vpack.c.bf16 %v723_v3, %v723_v3 }
 0x2a3   : > { %2115 = vmatprep.mubr.msk.bf16.mxu1 %vm2353_vm4, %v2351_v9 }
 0x2a5   : > { %v851_v7 = vpop.permute.xlu1 %850 }
 0x2a7   : > { %2122 = vmatmul.mubr.msk.bf16.vlgmr.msra.gmra.mrb[4].mxu0 %vm734_vm6, %v851_v7 }
 0x2a8   : > { %2132 = vmatpush3.bf16.xpose.msra.mxu0 %v972_v8  ;;  %2133 = vmatprep.mubr.msk.bf16.mxu0 %vm2353_vm4, %v2351_v9 }
 0x2a9   : > { %v965_v10 = vpop.permute.xlu1 %964  ;;  %2143 = vmatprep.subr.bf16.mxu0 %v2351_v9 }
 0x2ad   : > { %v1083_v11 = vpop.permute.xlu1 %1082 }
 0x2ae   : > { %v1088_v12 = vsel %vm734_vm6, %v1083_v11, 0 }
 0x2af   : > { %2134 = vmatmul.mubr.msk.bf16.vlgmr.msra.gmra.mrb[8].mxu0 %vm734_vm6, %v965_v10 }
 0x2b0   : > { %2144 = vmatpush3.bf16.xpose.msra.mxu0 %v1088_v12  ;;  %2145 = vmatprep.mubr.msk.bf16.mxu0 %vm2353_vm4, %v2351_v9 }
 0x2b1   : > { %2155 = vmatprep.subr.bf16.mxu0 %v2351_v9  ;;  %v1081_v13 = vpop.permute.xlu1 %1080 }
 0x2b7   : > { %2146 = vmatmul.mubr.msk.bf16.vlgmr.msra.gmra.mrb[12].mxu0 %vm734_vm6, %v1081_v13 }
 0x2b8   : > { %2167 = vmatprep.mubr.msk.bf16.mxu0 %vm2353_vm4, %v2351_v9 }
 0x375   : > { %v775_v14 = vpop.f32.mrb[4].mxu1 }
 0x376   : > { %v2111_v15 = vpop.f32.mrb[5].mxu1  ;;  %v782_v16 = vsel %vm781_vm8, %v775_v14, -inf }
 0x377   : > { %783 = vmax.xlane.f32.xlu1 %v782_v16  ;;  %v778_v17 = vpop.f32.mrb[6].mxu1 }
 0x378   : > { %v2112_v18 = vpop.f32.mrb[7].mxu1 }
 0x37a   : > { %v898_v19 = vpop.f32.mrb[4].mxu0 }
 0x37b   : > { %v2123_v20 = vpop.f32.mrb[5].mxu0  ;;  %v904_v21 = vsel %vm781_vm8, %v898_v19, -inf }
 0x37c   : > { %905 = vmax.xlane.f32.xlu0 %v904_v21  ;;  %v901_v22 = vpop.f32.mrb[6].mxu0 }
 0x37d   : > { %v2124_v23 = vpop.f32.mrb[7].mxu0 }
 0x382   : > { %v1008_v24 = vpop.f32.mrb[8].mxu0 }
 0x383   : > { %v2135_v25 = vpop.f32.mrb[9].mxu0  ;;  %v1014_v26 = vsel %vm781_vm8, %v1008_v24, -inf }
 0x384   : > { %1015 = vmax.xlane.f32.xlu0 %v1014_v26  ;;  %v1011_v28 = vpop.f32.mrb[10].mxu0 }
 0x385   : > { %v2136_v29 = vpop.f32.mrb[11].mxu0 }
 0x38a   : > { %v1124_v30 = vpop.f32.mrb[12].mxu0 }
 0x38b   : > { %v2147_v31 = vpop.f32.mrb[13].mxu0  ;;  %v1130_v32 = vsel %vm781_vm8, %v1124_v30, -inf }
 0x38c   : > { %v1127_v33 = vpop.f32.mrb[14].mxu0  ;;  %1131 = vmax.xlane.f32.xlu1 %v1130_v32 }
 0x38d   : > { %v2148_v34 = vpop.f32.mrb[15].mxu0 }
 0x38e   : > { %v2258_v34 = vld [vmem:[%s2834_s6 + $0x8] sm:$0xff]  }
 0x39d   : > { %796 = vrot.lane.b32.xlu1 %v2565_v59, %s2361_s18 }
 0x404   : > { %v784_v35 = vpop.xlane.xlu1 %783 }
 0x405   : > { %v785_v36 = vsub.f32 %v775_v14, %v784_v35 }
 0x407   : > { %v786_v37 = vmul.f32 1.442695, %v785_v36  ;;  %v2260_v36 = vld [vmem:[%s2834_s6 + $0x18] sm:$0xff]  }
 0x409   : > { %2313 = vpow2.f32 %v786_v37  ;;  %v906_v38 = vpop.xlane.xlu0 %905  ;;  %v2261_v37 = vld [vmem:[%s2834_s6 + $0x20] sm:$0xff]  }
 0x40a   : > { %v907_v39 = vsub.f32 %v898_v19, %v906_v38 }
 0x40c   : > { %v908_v40 = vmul.f32 1.442695, %v907_v39 }
 0x40e   : > { %2315 = vpow2.f32 %v908_v40 }
 0x411   : > { %v1016_v41 = vpop.xlane.xlu0 %1015 }
 0x412   : > { %v1017_v42 = vsub.f32 %v1008_v24, %v1016_v41 }
 0x413   : > { %v2314_v46 = vpop.eup %2313 }
 0x414   : > { %v1018_v47 = vmul.f32 1.442695, %v1017_v42  ;;  %v788_v48 = vsel %vm781_vm8, %v2314_v46, 0.0  ;;  %v2262_v42 = vld [vmem:[%s2834_s6 + $0x28] sm:$0xff]  }
 0x415   : > { %789 = vadd.xlane.f32.xlu0 %v788_v48 }
 0x416   : > { %2317 = vpow2.f32 %v1018_v47 }
 0x418   : > { %v2316_v50 = vpop.eup %2315 }
 0x419   : > { %v1132_v53 = vpop.xlane.xlu1 %1131  ;;  %v910_v54 = vsel %vm781_vm8, %v2316_v50, 0.0 }
 0x41a   : > { %v1133_v55 = vsub.f32 %v1124_v30, %v1132_v53  ;;  %911 = vadd.xlane.f32.xlu1 %v910_v54  ;;  %v2257_v30 = vld [vmem:[%s2834_s6] sm:$0xff]  }
 0x41b   : > { %2156 = vmatpush3.bf16.msra.mxu0 %v2257_v30  ;;  %v2286_v30 = vld [vmem:[%s2838_s10 + $0x80] ss:$12 sps:$4 sm:$0xff]  }
 0x41c   : > { %v1134_v57 = vmul.f32 1.442695, %v1133_v55  ;;  %2157 = vmatprep.subr.bf16.mxu0 %v2351_v9 }
 0x41d   : > { %v797_v58 = vpop.permute.xlu1 %796 }
 0x41e   : > { %2319 = vpow2.f32 %v1134_v57  ;;  %v807_v60 = vand.u32 %v805_v56, %v797_v58 }
 0x41f   : > { %2158 = vmatpush3.bf16.msra.mxu0 %v2258_v34 }
 0x420   : > { %v2318_v61 = vpop.eup %2317  ;;  %2114 = vmatpush3.bf16.msra.mxu1 %v807_v60  ;;  %2159 = vmatprep.subr.bf16.mxu0 %v2351_v9 }
 0x421   : > { %v1020_v63 = vsel %vm781_vm8, %v2318_v61, 0.0  ;;  %2125 = vmatprep.subr.bf16.mxu1 %v2351_v9 }
 0x422   : > { %1021 = vadd.xlane.f32.xlu0 %v1020_v63 }
 0x428   : > { %v2320_v1 = vpop.eup %2319 }
 0x429   : > { %v1136_v4 = vsel %vm781_vm8, %v2320_v1, 0.0 }
 0x42a   : > { %1137 = vadd.xlane.f32.xlu0 %v1136_v4 }
 0x42b   : > { %1028 = vrot.lane.b32.xlu1 %v2565_v59, %s2363_s19 }
 0x42f   : > { %1030 = vrot.lane.b32.xlu1 %v1026_v5, %s2363_s19  ;;  %s2366_s19 = smov 24  }
 0x433   : > { %1142 = vrot.lane.b32.xlu1 %v1026_v5, %s2364_s20 }
 0x440   : > { %916 = vrot.lane.b32.xlu0 %v2565_v59, %s2365_s21 }
 0x4a2   : > { %v790_v7 = vpop.xlane.xlu0 %789 }
 0x4a3   : > { %2321 = vrcp.f32 %v790_v7 }
 0x4a7   : > { %v912_v8 = vpop.xlane.xlu1 %911 }
 0x4a8   : > { %2323 = vrcp.f32 %v912_v8 }
 0x4ab   : > { %v1029_v12 = vpop.permute.xlu1 %1028 }
 0x4ad   : > { %v2322_v44 = vpop.eup %2321 }
 0x4ae   : > { %v792_v10 = vmul.f32 %v2322_v44, %v2314_v46 }
 0x4af   : > { %v1022_v11 = vpop.xlane.xlu0 %1021  ;;  %v1031_v59 = vpop.permute.xlu1 %1030 }
 0x4b0   : > { %v793_v49 = vpack.c.bf16 %v792_v10, %v792_v10  ;;  %2325 = vrcp.f32 %v1022_v11  ;;  %v1033_v18 = vsel %vm1032_vm12, %v1029_v12, %v1031_v59  ;;  %v2263_v10 = vld [vmem:[%s2838_s10] ss:$12 sps:$4 sm:$0xff]   ;;  %v2266_v59 = vld [vmem:[%s2838_s10 + $0x8] ss:$12 sps:$4 sm:$0xff]  }
 0x4b1   : > { %v1038_v21 = vand.u32 %v1033_v18, %v805_v56  ;;  %v2273_v18 = vld [vmem:[%s2838_s10 + $0x34] ss:$12 sps:$4 sm:$0xff]  }
 0x4b2   : > { %2116 = vmatmul.mubr.msk.bf16.vlgmr.msra.gmra.mrb[8].mxu1 %vm798_vm11, %v793_v49  ;;  %v2324_v14 = vpop.eup %2323  ;;  %v2265_v49 = vld [vmem:[%s2838_s10 + $0x4] ss:$12 sps:$4 sm:$0xff]  }
 0x4b3   : > { %2127 = vmatprep.mubr.msk.bf16.mxu1 %vm2353_vm4, %v2351_v9  ;;  %v914_v15 = vmul.f32 %v2324_v14, %v2316_v50  ;;  %v1143_v23 = vpop.permute.xlu1 %1142 }
 0x4b4   : > { %v1148_v26 = vand.u32 %v1143_v23, %v805_v56  ;;  %v2278_v23 = vld [vmem:[%s2838_s10 + $0x50] ss:$12 sps:$4 sm:$0xff]  }
 0x4b5   : > { %v915_v19 = vpack.c.bf16 %v914_v15, %v914_v15  ;;  %v2269_v15 = vld [vmem:[%s2838_s10 + $0x1c] ss:$12 sps:$4 sm:$0xff]  }
 0x4b7   : > { %v1138_v13 = vpop.xlane.xlu0 %1137 }
 0x4b8   : > { %2327 = vrcp.f32 %v1138_v13 }
 0x4ba   : > { %v2326_v20 = vpop.eup %2325 }
 0x4bb   : > { %v917_v16 = vpop.permute.xlu0 %916  ;;  %v1024_v22 = vmul.f32 %v2326_v20, %v2318_v61  ;;  %v2274_v20 = vld [vmem:[%s2838_s10 + $0x38] ss:$12 sps:$4 sm:$0xff]  }
 0x4bc   : > { %v922_v17 = vand.u32 %v917_v16, %v805_v56  ;;  %v2267_v16 = vld [vmem:[%s2838_s10 + $0x18] ss:$12 sps:$4 sm:$0xff]  }
 0x4bd   : > { %v1025_v24 = vpack.c.bf16 %v1024_v22, %v1024_v22  ;;  %v2275_v22 = vld [vmem:[%s2838_s10 + $0x48] ss:$12 sps:$4 sm:$0xff]  }
 0x4be   : > { %2126 = vmatpush3.bf16.msra.mxu1 %v922_v17  ;;  %v2270_v17 = vld [vmem:[%s2838_s10 + $0x20] ss:$12 sps:$4 sm:$0xff]  }
 0x4bf   : > { %2137 = vmatprep.subr.bf16.mxu1 %v2351_v9 }
 0x4c1   : > { %2128 = vmatmul.mubr.msk.bf16.vlgmr.msra.gmra.mrb[12].mxu1 %vm798_vm11, %v915_v19  ;;  %v2271_v19 = vld [vmem:[%s2838_s10 + $0x30] ss:$12 sps:$4 sm:$0xff]  }
 0x4c2   : > { %2138 = vmatpush3.bf16.msra.mxu1 %v1038_v21  ;;  %2139 = vmatprep.mubr.msk.bf16.mxu1 %vm2353_vm4, %v2351_v9  ;;  %v2328_v25 = vpop.eup %2327  ;;  %v2277_v21 = vld [vmem:[%s2838_s10 + $0x4c] ss:$12 sps:$4 sm:$0xff]  }
 0x4c3   : > { %2149 = vmatprep.subr.bf16.mxu1 %v2351_v9  ;;  %v1140_v28 = vmul.f32 %v2328_v25, %v2320_v1  ;;  %v1970_v1 = vld [vmem:[%s2835_s7] ss:$0 sm:$0xff] }
 0x4c4   : > { %v2279_v25 = vld [vmem:[%s2838_s10 + $0x60] ss:$12 sps:$4 sm:$0xff]  }
 0x4c5   : > { %v1141_v29 = vpack.c.bf16 %v1140_v28, %v1140_v28  ;;  %v2283_v28 = vld [vmem:[%s2838_s10 + $0x78] ss:$12 sps:$4 sm:$0xff]  }
 0x4c9   : > { %2140 = vmatmul.mubr.msk.bf16.vlgmr.msra.gmra.mrb[16].mxu1 %vm798_vm11, %v1025_v24  ;;  %v2281_v24 = vld [vmem:[%s2838_s10 + $0x64] ss:$12 sps:$4 sm:$0xff]  }
 0x4ca   : > { %2150 = vmatpush3.bf16.msra.mxu1 %v1148_v26  ;;  %2151 = vmatprep.mubr.msk.bf16.mxu1 %vm2353_vm4, %v2351_v9  ;;  %v2282_v26 = vld [vmem:[%s2838_s10 + $0x68] ss:$12 sps:$4 sm:$0xff]  }
 0x4cb   : > { %1478 = vmatprep.subr.bf16.mxu1 %v2265_v49 }
 0x4d1   : > { %2152 = vmatmul.mubr.msk.bf16.vlgmr.msra.gmra.mrb[20].mxu1 %vm798_vm11, %v1141_v29  ;;  %v2285_v29 = vld [vmem:[%s2838_s10 + $0x7c] ss:$12 sps:$4 sm:$0xff]  }
 0x4d2   : > { %1510 = vmatprep.mubr.bf16.mxu1 %v2352_v27  ;;  %v2259_v27 = vld [vmem:[%s2834_s6 + $0x10] sm:$0xff]   ;;  %1479 = vmatpush1.bf16.msra.mxu1 %v2263_v10 }
 0x4d3   : > { %2160 = vmatpush3.bf16.msra.mxu0 %v2259_v27  ;;  %1480 = vmatprep.subr.bf16.mxu1 %v2269_v15 }
 0x4d4   : > { %2161 = vmatprep.subr.bf16.mxu0 %v2351_v9 }
 0x4d6   : > { %1481 = vmatpush1.bf16.msra.mxu1 %v2267_v16 }
 0x4d7   : > { %2162 = vmatpush3.bf16.msra.mxu0 %v2260_v36  ;;  %1482 = vmatprep.subr.bf16.mxu1 %v2273_v18  ;;  %v1972_v36 = vld [vmem:[%s2837_s9] ss:$0 sm:$0xff] }
 0x4d8   : > { %2163 = vmatprep.subr.bf16.mxu0 %v2351_v9 }
 0x4da   : > { %1483 = vmatpush1.bf16.msra.mxu1 %v2271_v19 }
 0x4db   : > { %2164 = vmatpush3.bf16.msra.mxu0 %v2261_v37  ;;  %1484 = vmatprep.subr.bf16.mxu1 %v2277_v21 }
 0x4dc   : > { %2165 = vmatprep.subr.bf16.mxu0 %v2351_v9 }
 0x4de   : > { %1485 = vmatpush1.bf16.msra.mxu1 %v2275_v22 }
 0x4df   : > { %2166 = vmatpush3.bf16.msra.mxu0 %v2262_v42  ;;  %1486 = vmatprep.subr.bf16.mxu1 %v2281_v24  ;;  %v2289_v42 = vld [vmem:[%s2840_s12] sm:$0xff]  }
 0x4e0   : > { %2171 = vmatprep.subr.bf16.mxu0 %v2351_v9 }
 0x4e2   : > { %1487 = vmatpush1.bf16.msra.mxu1 %v2279_v25 }
 0x4e3   : > { %1488 = vmatprep.subr.bf16.mxu1 %v2285_v29 }
 0x4e6   : > { %1489 = vmatpush1.bf16.msra.mxu1 %v2283_v28 }
 0x585   : > { %v843_v31 = vpop.f32.mrb[8].mxu1 }
 0x586   : > { %v2117_v32 = vpop.f32.mrb[9].mxu1 }
 0x587   : > { %v846_v33 = vpop.f32.mrb[10].mxu1 }
 0x588   : > { %v2118_v35 = vpop.f32.mrb[11].mxu1 }
 0x589   : > { %v1971_v35 = vld [vmem:[%s2836_s8] ss:$0 sm:$0xff] }
 0x594   : > { %v958_v38 = vpop.f32.mrb[12].mxu1 }
 0x595   : > { %1191 = vrot.lane.b32.xlu0 %v958_v38, %s2366_s19  ;;  %v2129_v39 = vpop.f32.mrb[13].mxu1 }
 0x596   : > { %v961_v40 = vpop.f32.mrb[14].mxu1 }
 0x597   : > { %v2130_v41 = vpop.f32.mrb[15].mxu1  ;;  %v2287_v40 = vld [vmem:[%s2840_s12 + $0x80] sm:$0xff]  }
 0x598   : > { %v2288_v41 = vld [vmem:[%s2840_s12 + $0x40] sm:$0xff]  }
 0x599   : > { %2060 = vmatprep.subr.bf16.mxu1 %v2288_v41  ;;  %v1996_v41 = vld [vmem:[%s2841_s13] ss:$0 sm:$0xff] }
 0x59c   : > { %v1074_v46 = vpop.f32.mrb[16].mxu1 }
 0x59d   : > { %1195 = vrot.lane.b32.xlu1 %v1074_v46, %s2367_s22  ;;  %v2141_v47 = vpop.f32.mrb[17].mxu1  ;;  %v2290_v46 = vld [vmem:[%s2840_s12 + $0x88] sm:$0xff]  }
 0x59e   : > { %v1077_v48 = vpop.f32.mrb[18].mxu1  ;;  %v2291_v47 = vld [vmem:[%s2840_s12 + $0x48] sm:$0xff]  }
 0x59f   : > { %v2142_v50 = vpop.f32.mrb[19].mxu1  ;;  %v2292_v48 = vld [vmem:[%s2840_s12 + $0x8] sm:$0xff]  }
 0x5a0   : > { %v2293_v50 = vld [vmem:[%s2840_s12 + $0x90] sm:$0xff]  }
 0x5a4   : > { %v1184_v51 = vpop.f32.mrb[20].mxu1 }
 0x5a5   : > { %1199 = vrot.lane.b32.xlu0 %v1184_v51, %s2368_s23  ;;  %v2153_v52 = vpop.f32.mrb[21].mxu1  ;;  %v2294_v51 = vld [vmem:[%s2840_s12 + $0x50] sm:$0xff]  }
 0x5a6   : > { %v1187_v53 = vpop.f32.mrb[22].mxu1  ;;  %v2295_v52 = vld [vmem:[%s2840_s12 + $0x10] sm:$0xff]  }
 0x5a7   : > { %v2154_v54 = vpop.f32.mrb[23].mxu1  ;;  %v2296_v53 = vld [vmem:[%s2840_s12 + $0x98] sm:$0xff]  }
 0x5a8   : > { %v2297_v54 = vld [vmem:[%s2840_s12 + $0x58] sm:$0xff]  }
 0x607   : > { %v1192_v55 = vpop.permute.xlu0 %1191 }
 0x608   : > { %v1202_v57 = vsel %vm734_vm6, %v843_v31, %v1192_v55  ;;  %v2298_v55 = vld [vmem:[%s2840_s12 + $0x18] sm:$0xff]  }
 0x60f   : > { %v1196_v56 = vpop.permute.xlu1 %1195 }
 0x610   : > { %v1204_v58 = vsel %vm1203_vm13, %v1202_v57, %v1196_v56  ;;  %v2299_v56 = vld [vmem:[%s2840_s12 + $0xa0] sm:$0xff]  }
 0x611   : > { %v2300_v57 = vld [vmem:[%s2840_s12 + $0x60] sm:$0xff]  }
 0x617   : > { %v1200_v60 = vpop.permute.xlu0 %1199 }
 0x618   : > { %v1206_v61 = vsel %vm1205_vm14, %v1204_v58, %v1200_v60  ;;  %v2301_v58 = vld [vmem:[%s2840_s12 + $0x20] sm:$0xff]   ;;  %v2302_v60 = vld [vmem:[%s2840_s12 + $0xa8] sm:$0xff]  }
 0x619   : > { %v1219_v63 = vpack.c.bf16 %v1206_v61, %v1206_v61  ;;  %v2303_v61 = vld [vmem:[%s2840_s12 + $0x68] sm:$0xff]  }
 0x61b   : > { %2168 = vmatmul.mubr.msk.bf16.vlgmr.msra.gmra.mrb[16].mxu0 %vm643_vm5, %v1219_v63  ;;  %v2304_v63 = vld [vmem:[%s2840_s12 + $0x28] sm:$0xff]  }
 0x61c   : > { %2183 = vmatprep.mubr.msk.bf16.mxu0 %vm2353_vm4, %v2351_v9  ;;  %2172 = vmatpush3.bf16.msra.mxu0 %v2266_v59 }
 0x61d   : > { %2173 = vmatprep.subr.bf16.mxu0 %v2351_v9 }
 0x620   : > { %2174 = vmatpush3.bf16.msra.mxu0 %v2270_v17 }
 0x621   : > { %2175 = vmatprep.subr.bf16.mxu0 %v2351_v9 }
 0x624   : > { %2176 = vmatpush3.bf16.msra.mxu0 %v2274_v20 }
 0x625   : > { %2177 = vmatprep.subr.bf16.mxu0 %v2351_v9 }
 0x628   : > { %2178 = vmatpush3.bf16.msra.mxu0 %v2278_v23 }
 0x629   : > { %2179 = vmatprep.subr.bf16.mxu0 %v2351_v9 }
 0x62c   : > { %2180 = vmatpush3.bf16.msra.mxu0 %v2282_v26 }
 0x62d   : > { %2181 = vmatprep.subr.bf16.mxu0 %v2351_v9 }
 0x630   : > { %2182 = vmatpush3.bf16.msra.mxu0 %v2286_v30 }
 0x631   : > { %2187 = vmatprep.subr.bf16.mxu0 %v2351_v9 }
 0x6ee   : > { %v1293_v0 = vpop.f32.mrb[16].mxu0 }
 0x6ef   : > { %v1299_v3 = vadd.f32 %v1293_v0, %v2467_v6  ;;  %v2169_v4 = vpop.f32.mrb[17].mxu0  ;;  %v2305_v0 = vld [vmem:[%s2840_s12 + $0xb0] sm:$0xff]  }
 0x6f0   : > { %v1296_v5 = vpop.f32.mrb[18].mxu0  ;;  %v2308_v4 = vld [vmem:[%s2840_s12 + $0xb8] sm:$0xff]  }
 0x6f1   : > { %v2652_v7 = vadd.f32 %v1970_v1, %v1299_v3  ;;  %v2170_v8 = vpop.f32.mrb[19].mxu0  ;;  %v2306_v1 = vld [vmem:[%s2840_s12 + $0x70] sm:$0xff]   ;;  %v2309_v5 = vld [vmem:[%s2840_s12 + $0x78] sm:$0xff]  }
 0x6f2   : > { %v2307_v3 = vld [vmem:[%s2840_s12 + $0x30] sm:$0xff]   ;;  %v2310_v8 = vld [vmem:[%s2840_s12 + $0x38] sm:$0xff]  }
 0x6f3   : > { %v1310_v44 = vsel %vm476_vm3, %v2652_v7, 0.0 }
 0x6f4   : > { %1311 = vadd.xlane.f32.xlu1 %v1310_v44 }
 0x781   : > { %v1312_v6 = vpop.xlane.xlu1 %1311 }
 0x782   : > { %v1313_v11 = vmul.f32 0.010416667, %v1312_v6 }
 0x784   : > { %v1314_v12 = vsub.f32 %v2652_v7, %v1313_v11 }
 0x786   : > { %v1315_v13 = vmul.f32 %v1314_v12, %v1314_v12 }
 0x788   : > { %v1316_v14 = vsel %vm476_vm3, %v1315_v13, 0.0 }
 0x789   : > { %1317 = vadd.xlane.f32.xlu0 %v1316_v14 }
 0x816   : > { %v1318_v31 = vpop.xlane.xlu0 %1317 }
 0x817   : > { %v1319_v32 = vmul.f32 0.010416667, %v1318_v31 }
 0x819   : > { %v1320_v33 = vadd.f32 1e-05, %v1319_v32 }
 0x81b   : > { %2329 = vrsqrt.f32 %v1320_v33 }
 0x825   : > { %v2330_v34 = vpop.eup %2329 }
 0x826   : > { %v1322_v27 = vmul.f32 %v2330_v34, %v1314_v12 }
 0x828   : > { %v1329_v37 = vmul.f32 %v1971_v35, %v1322_v27 }
 0x82a   : > { %v1336_v38 = vadd.f32 %v1972_v36, %v1329_v37 }
 0x82c   : > { %v1361_v39 = vpack.c.bf16 %v1336_v38, %v1336_v38 }
 0x82e   : > { %1991 = vmatmul.mubr.msk.bf16.vlgmr.msra.gmra.mrb[24].mxu1 %vm643_vm5, %v1361_v39  ;;  %2184 = vmatmul.mubr.msk.bf16.vlgmr.msra.gmra.mrb[20].mxu0 %vm643_vm5, %v1361_v39 }
 0x82f   : > { %2203 = vmatprep.mubr.msk.bf16.mxu0 %vm2353_vm4, %v2351_v9  ;;  %2188 = vmatpush3.bf16.msra.mxu0 %v2287_v40 }
 0x830   : > { %2189 = vmatprep.subr.bf16.mxu0 %v2351_v9  ;;  %2061 = vmatpush3.bf16.msra.mxu1 %v2289_v42 }
 0x831   : > { %2062 = vmatprep.subr.bf16.mxu1 %v2291_v47 }
 0x833   : > { %2190 = vmatpush3.bf16.msra.mxu0 %v2290_v46 }
 0x834   : > { %2191 = vmatprep.subr.bf16.mxu0 %v2351_v9  ;;  %2063 = vmatpush3.bf16.msra.mxu1 %v2292_v48 }
 0x835   : > { %2064 = vmatprep.subr.bf16.mxu1 %v2294_v51 }
 0x837   : > { %2192 = vmatpush3.bf16.msra.mxu0 %v2293_v50 }
 0x838   : > { %2193 = vmatprep.subr.bf16.mxu0 %v2351_v9  ;;  %2065 = vmatpush3.bf16.msra.mxu1 %v2295_v52 }
 0x839   : > { %2066 = vmatprep.subr.bf16.mxu1 %v2297_v54  ;;  %v1870_v54 = vld [vmem:[%s462_s15] sm:$0xf] }
 0x83b   : > { %2194 = vmatpush3.bf16.msra.mxu0 %v2296_v53 }
 0x83c   : > { %2195 = vmatprep.subr.bf16.mxu0 %v2351_v9  ;;  %2067 = vmatpush3.bf16.msra.mxu1 %v2298_v55 }
 0x83d   : > { %2068 = vmatprep.subr.bf16.mxu1 %v2300_v57 }
 0x83f   : > { %2196 = vmatpush3.bf16.msra.mxu0 %v2299_v56 }
 0x840   : > { %2197 = vmatprep.subr.bf16.mxu0 %v2351_v9  ;;  %2069 = vmatpush3.bf16.msra.mxu1 %v2301_v58 }
 0x841   : > { %2070 = vmatprep.subr.bf16.mxu1 %v2303_v61 }
 0x843   : > { %2198 = vmatpush3.bf16.msra.mxu0 %v2302_v60 }
 0x844   : > { %2199 = vmatprep.subr.bf16.mxu0 %v2351_v9  ;;  %2071 = vmatpush3.bf16.msra.mxu1 %v2304_v63 }
 0x845   : > { %2072 = vmatprep.subr.bf16.mxu1 %v2306_v1 }
 0x847   : > { %2200 = vmatpush3.bf16.msra.mxu0 %v2305_v0 }
 0x848   : > { %2201 = vmatprep.subr.bf16.mxu0 %v2351_v9  ;;  %2073 = vmatpush3.bf16.msra.mxu1 %v2307_v3  ;;  %v1362_v9 = vld [vmem:[%s2839_s11] sm:$0x7] }
 0x849   : > { %2074 = vmatprep.subr.bf16.mxu1 %v2309_v5  ;;  %v1367_v44 = vrot.slane %v1362_v9, %v534_v43  ;;  %v1375_v10 = vrot.slane %v1362_v9, %v542_v62  ;;  %v1371_v49 = vrot.slane %v1362_v9, %v538_v45 }
 0x84b   : > { %2202 = vmatpush3.bf16.msra.mxu0 %v2308_v4 }
 0x84c   : > { %2075 = vmatpush3.bf16.msra.mxu1 %v2310_v8 }
 0x901   : > { %v1512_v6 = vpop.f32.mrb[24].mxu1  ;;  %v1553_v11 = vpop.f32.mrb[20].mxu0 }
 0x902   : > { %v1513_v12 = vadd.f32 %v1512_v6, %v1367_v44  ;;  %v1554_v13 = vadd.f32 %v1553_v11, %v1375_v10  ;;  %v1514_v14 = vpop.f32.mrb[25].mxu1  ;;  %v2185_v59 = vpop.f32.mrb[21].mxu0 }
 0x903   : > { %v1515_v15 = vadd.f32 %v1514_v14, %v1371_v49  ;;  %v1516_v16 = vpop.f32.mrb[26].mxu1  ;;  %v1556_v17 = vpop.f32.mrb[22].mxu0 }
 0x904   : > { %v1993_v18 = vmul.f32 -1.702, %v1513_v12  ;;  %v1995_v19 = vmul.f32 -1.702, %v1554_v13  ;;  %v1517_v20 = vpop.f32.mrb[27].mxu1  ;;  %v2186_v21 = vpop.f32.mrb[23].mxu0 }
 0x905   : > { %v1994_v43 = vmul.f32 -1.702, %v1515_v15 }
 0x906   : > { %v1565_v22 = vmul.f32 1.442695, %v1993_v18  ;;  %v1569_v23 = vmul.f32 1.442695, %v1995_v19 }
 0x907   : > { %v1567_v62 = vmul.f32 1.442695, %v1994_v43 }
 0x908   : > { %2331 = vpow2.f32 %v1565_v22 }
 0x909   : > { %2333 = vpow2.f32 %v1569_v23 }
 0x90a   : > { %2335 = vpow2.f32 %v1567_v62 }
 0x912   : > { %v2332_v2 = vpop.eup %2331 }
 0x913   : > { %v2334_v45 = vpop.eup %2333  ;;  %v1571_v24 = vadd.f32 1.0, %v2332_v2 }
 0x914   : > { %v2336_v25 = vpop.eup %2335  ;;  %v1573_v26 = vadd.f32 1.0, %v2334_v45 }
 0x915   : > { %2337 = vrcp.f32 %v1571_v24  ;;  %v1572_v28 = vadd.f32 1.0, %v2336_v25 }
 0x916   : > { %2339 = vrcp.f32 %v1573_v26 }
 0x917   : > { %2341 = vrcp.f32 %v1572_v28 }
 0x91f   : > { %v2338_v29 = vpop.eup %2337 }
 0x920   : > { %v2340_v30 = vpop.eup %2339  ;;  %v1580_v32 = vmul.f32 %v2338_v29, %v1513_v12 }
 0x921   : > { %v2342_v31 = vpop.eup %2341  ;;  %v1582_v33 = vmul.f32 %v2340_v30, %v1554_v13 }
 0x922   : > { %v1581_v34 = vmul.f32 %v2342_v31, %v1515_v15  ;;  %v1631_v36 = vpack.c.bf16 %v1580_v32, %v1580_v32 }
 0x923   : > { %v1633_v35 = vpack.c.bf16 %v1582_v33, %v1582_v33 }
 0x924   : > { %v1632_v27 = vpack.c.bf16 %v1581_v34, %v1581_v34 }
 0x925   : > { %2204 = vmatmul.mubr.bf16.vlgmr.msra.gmra.mrb[24].mxu0 %v1633_v35 }
 0x926   : > { %1817 = vmatprep.mubr.bf16.mxu1 %v1632_v27 }
 0x927   : > { %1818 = vmatmul.mubr.bf16.vlgmr.msra.gmra.mrb[28].mxu1 %v1631_v36 }
 0x9f8   : > { %v1859_v37 = vpop.f32.mrb[24].mxu0 }
 0x9f9   : > { %v2205_v38 = vpop.f32.mrb[25].mxu0 }
 0x9fa   : > { %v2076_v39 = vpop.f32.mrb[28].mxu1  ;;  %v1862_v40 = vpop.f32.mrb[26].mxu0 }
 0x9fb   : > { %v2077_v42 = vpop.f32.mrb[29].mxu1  ;;  %v2206_v46 = vpop.f32.mrb[27].mxu0 }
 0x9fc   : > { %v2078_v47 = vadd.f32 %v2077_v42, %v2076_v39  ;;  %v2079_v48 = vpop.f32.mrb[30].mxu1 }
 0x9fd   : > { %v2080_v50 = vpop.f32.mrb[31].mxu1 }
 0x9fe   : > { %v1820_v51 = vadd.f32 %v2078_v47, %v1996_v41 }
 0xa00   : > { %v1860_v52 = vadd.f32 %v1859_v37, %v1820_v51 }
 0xa02   : > { %v1865_v53 = vadd.f32 %v1860_v52, %v2652_v7 }
 0xa04   : > { %v1866_v55 = vpack.c.bf16 %v1865_v53, %v1865_v53 }
 0xa06   : > { %v1871_v56 = vsel %vm1869_vm1, %v1866_v55, %v1870_v54 }
 0xa07   : > { %1872 = vst [vmem:[%s462_s15] sm:$0xf] %v1871_v56 }
 0xa08 PF: > { %s24_s29 = sadd.s32 1, %s2349_s29  }
 0xa09   : > { %p21_p4 = scmp.ge.s32.totalorder %s24_s29, 4  }
 0xa0b   :  { %23 = sbr.rel (!%p21_p4) target bundleno = 1 (0x1), region = 106 }

// kernel: _lambda_.16
= control target key start
LH: loop header
LB: loop body
LE: loop exit
PB: predicated region body
PF: predicated region fallthrough
CT: control target
= control target key end

     0   :  { %s2501_s18 = smov 0   ;;  %s2894_s0 = inlined_call_operand.vmem [shape: bf16[2,7,96], index: 0, kind: input, shape index: {}]   ;;  %s2895_s1 = inlined_call_operand.vmem [shape: f32[1,96], index: 1, kind: input, shape index: {}, may-alias: {1,3,9}]   ;;  %s2896_s2 = inlined_call_operand.vmem [shape: f32[1,96], index: 2, kind: input, shape index: {}, may-alias: {2,4,8,10,14}]   ;;  %s2897_s3 = inlined_call_operand.vmem [shape: f32[1,96], index: 3, kind: input, shape index: {}, may-alias: {1,3,9}]   ;;  %s2898_s4 = inlined_call_operand.vmem [shape: f32[1,96], index: 4, kind: input, shape index: {}, may-alias: {2,4,8,10,14}]   ;;  %s2899_s5 = inlined_call_operand.vmem [shape: bf16[96,288], index: 5, kind: input, shape index: {}]   ;;  %s2900_s6 = inlined_call_operand.vmem [shape: f32[1,288], index: 6, kind: input, shape index: {}]   ;;  %s2901_s7 = inlined_call_operand.vmem [shape: bf16[96,96], index: 7, kind: input, shape index: {}]   ;;  %s2902_s8 = inlined_call_operand.vmem [shape: f32[1,96], index: 8, kind: input, shape index: {}, may-alias: {2,4,8,10,14}]   ;;  %s2903_s9 = inlined_call_operand.vmem [shape: f32[1,96], index: 9, kind: input, shape index: {}, may-alias: {1,3,9}]   ;;  %s2904_s10 = inlined_call_operand.vmem [shape: f32[1,96], index: 10, kind: input, shape index: {}, may-alias: {2,4,8,10,14}]   ;;  %s2905_s11 = inlined_call_operand.vmem [shape: bf16[96,384], index: 11, kind: input, shape index: {}]   ;;  %s2906_s12 = inlined_call_operand.vmem [shape: f32[1,384], index: 12, kind: input, shape index: {}]   ;;  %s2907_s13 = inlined_call_operand.vmem [shape: bf16[384,96], index: 13, kind: input, shape index: {}]   ;;  %s2908_s14 = inlined_call_operand.vmem [shape: f32[1,96], index: 14, kind: input, shape index: {}, may-alias: {2,4,8,10,14}]   ;;  %s2909_s15 = inlined_call_operand.vmem [shape: bf16[2,7,96], index: 15, kind: output, shape index: {}]  }
   0x1 LB: > { %s1974_s19 = sadd.s32 4294967295, %s2401_s18   ;;  %p1978_p0 = scmp.ge.s32.totalorder %s2401_s18, 1  ;;  %s2401_s18 = sphi %s2501_s18, %s25_s18  }
   0x2   : > { %p436_p1 = scmp.lt.s32.totalorder %s2401_s18, 3 }
   0x4   : > { %p437_p2 = pnand %p1978_p0, %p436_p1 }
   0x5   : > { %p482_p3 = scmp.lt.s32.totalorder (!%p437_p2), %s1974_s19, 1  ;;  %vm495_vm0 = vcmask (!%p437_p2), 784384   ;;  %v1981_v12 = vld [vmem:[%s2895_s1] ss:$0 sm:$0xff] (!%p437_p2)  ;;  %v2283_v18 = vld [vmem:[%s2899_s5 + $0x4] ss:$12 sps:$4 sm:$0xff] (!%p437_p2)   ;;  %v580_v53 = vlaneseq (!%p437_p2) }
   0x6   : > { %440 = sbr.rel (%p437_p2) target bundleno = 2880 (0xb40), region = 80  ;;  %v1982_v14 = vld [vmem:[%s2896_s2] ss:$0 sm:$0xff] (!%p437_p2)  ;;  %v2403_v19 = vmov (!%p437_p2), 0.0   ;;  %695 = vmatprep.subr.bf16.mxu0 (!%p437_p2), %v2283_v18  ;;  %v2286_v26 = vld [vmem:[%s2899_s5 + $0x8] ss:$12 sps:$4 sm:$0xff] (!%p437_p2)  }
   0x7   : > { %2141 = vmatprep.subr.bf16.mxu1 (!%p437_p2), %v2403_v19  ;;  %v2285_v25 = vld [vmem:[%s2899_s5] ss:$12 sps:$4 sm:$0xff] (!%p437_p2)   ;;  %v2287_v27 = vld [vmem:[%s2899_s5 + $0x1c] ss:$12 sps:$4 sm:$0xff] (!%p437_p2)   ;;  %v2289_v28 = vld [vmem:[%s2899_s5 + $0x18] ss:$12 sps:$4 sm:$0xff] (!%p437_p2)  }
   0x8   : > { %696 = vmatpush1.bf16.msra.mxu0 (!%p437_p2), %v2285_v25  ;;  %2142 = vmatpush3.bf16.msra.mxu1 (!%p437_p2), %v2286_v26  ;;  %v2290_v29 = vld [vmem:[%s2899_s5 + $0x20] ss:$12 sps:$4 sm:$0xff] (!%p437_p2)   ;;  %v2293_v31 = vld [vmem:[%s2899_s5 + $0x30] ss:$12 sps:$4 sm:$0xff] (!%p437_p2)   ;;  %v2294_v32 = vld [vmem:[%s2899_s5 + $0x38] ss:$12 sps:$4 sm:$0xff] (!%p437_p2)  }
   0x9   : > { %2143 = vmatprep.subr.bf16.mxu1 (!%p437_p2), %v2403_v19  ;;  %697 = vmatprep.subr.bf16.mxu0 (!%p437_p2), %v2287_v27  ;;  %v2291_v30 = vld [vmem:[%s2899_s5 + $0x34] ss:$12 sps:$4 sm:$0xff] (!%p437_p2)   ;;  %v2295_v33 = vld [vmem:[%s2899_s5 + $0x4c] ss:$12 sps:$4 sm:$0xff] (!%p437_p2)   ;;  %v2298_v35 = vld [vmem:[%s2899_s5 + $0x50] ss:$12 sps:$4 sm:$0xff] (!%p437_p2)  }
   0xa   : > { %v2297_v34 = vld [vmem:[%s2899_s5 + $0x48] ss:$12 sps:$4 sm:$0xff] (!%p437_p2)   ;;  %v2299_v36 = vld [vmem:[%s2899_s5 + $0x64] ss:$12 sps:$4 sm:$0xff] (!%p437_p2)   ;;  %v2404_v37 = vmov (!%p437_p2), 0   ;;  %vm2405_vm1 = vmmov (!%p437_p2), 0  }
   0xb   : > { %727 = vmatprep.mubr.bf16.mxu0 (!%p437_p2), %v2404_v37  ;;  %2153 = vmatprep.mubr.msk.bf16.mxu1 (!%p437_p2), %vm2405_vm1, %v2403_v19  ;;  %v2301_v38 = vld [vmem:[%s2899_s5 + $0x60] ss:$12 sps:$4 sm:$0xff] (!%p437_p2)   ;;  %v2302_v39 = vld [vmem:[%s2899_s5 + $0x68] ss:$12 sps:$4 sm:$0xff] (!%p437_p2)   ;;  %v2305_v41 = vld [vmem:[%s2899_s5 + $0x78] ss:$12 sps:$4 sm:$0xff] (!%p437_p2)  }
   0xc   : > { %698 = vmatpush1.bf16.msra.mxu0 (!%p437_p2), %v2289_v28  ;;  %2144 = vmatpush3.bf16.msra.mxu1 (!%p437_p2), %v2290_v29  ;;  %v2303_v40 = vld [vmem:[%s2899_s5 + $0x7c] ss:$12 sps:$4 sm:$0xff] (!%p437_p2)   ;;  %v2306_v42 = vld [vmem:[%s2899_s5 + $0x80] ss:$12 sps:$4 sm:$0xff] (!%p437_p2)   ;;  %vm691_vm2 = vcmask (!%p437_p2), 785408   ;;  %v2608_v54 = vshrl.u32 (!%p437_p2), %v580_v53, 7 }
   0xd   : > { %s2911_s19 = smov (!%p482_p3, %s1974_s19), 1  ;;  %2145 = vmatprep.subr.bf16.mxu1 %v2403_v19  ;;  %699 = vmatprep.subr.bf16.mxu0 %v2291_v30  ;;  %v1983_v47 = vld [vmem:[%s2897_s3] ss:$0 sm:$0xff]  ;;  %s2406_s22 = smov 8   ;;  %vm782_vm3 = vcmask 195584   ;;  %vm904_vm4 = vcmask 64512  }
   0xe   : > { %s1979_s20 = sshll.u32 %s2911_s19, 2  ;;  %v1984_v49 = vld [vmem:[%s2898_s4] ss:$0 sm:$0xff]  ;;  %v582_v55 = vsub.s32 0, %v2608_v54  ;;  %v586_v57 = vsub.s32 1, %v2608_v54  ;;  %s2408_s24 = smov 112  }
   0xf   : > { %s485_s23 = scalar_lea.vmem %s2894_s0, %s1979_s20  ;;  %v2614_v56 = vld [vmem:[%s2900_s6] sm:$0x7]  ;;  %s2409_s25 = smov 88   ;;  %vm829_vm5 = vcmask 55296   ;;  %vm850_vm6 = vcmask 1042432   ;;  %vm851_vm7 = vcmask 1043456  }
  0x10   : > { %v491_v0 = vld [vmem:[%s485_s23] sm:$0xf]  ;;  %700 = vmatpush1.bf16.msra.mxu0 %v2293_v31  ;;  %2146 = vmatpush3.bf16.msra.mxu1 %v2294_v32  ;;  %v583_v58 = vrot.slane %v2614_v56, %v582_v55  ;;  %v587_v59 = vrot.slane %v2614_v56, %v586_v57  ;;  %s2407_s23 = smov 32   ;;  %s2410_s26 = smov 104   ;;  %vm846_vm8 = vcmask 56320   ;;  %vm1080_vm9 = vcmask 130048  }
  0x11   : > { %v492_v1 = vunpack.c.l.bf16 %v491_v0  ;;  %701 = vmatprep.subr.bf16.mxu0 %v2295_v33  ;;  %2147 = vmatprep.subr.bf16.mxu1 %v2403_v19  ;;  %s2411_s27 = smov 80   ;;  %s2412_s28 = smov 56   ;;  %vm1251_vm10 = vcmask 392192   ;;  %vm1253_vm11 = vcmask 588800   ;;  %vm1915_vm12 = vcmask 781312  }
  0x12   : > { %s2413_s29 = smov 64   ;;  %s2415_s30 = smov 16   ;;  %vm1916_vm13 = vsmask.f32 3328 }
  0x13   : > { %v496_v2 = vsel %vm495_vm0, %v492_v1, 0.0  ;;  %s2416_s16 = smov 120   ;;  %s2417_s17 = smov 40   ;;  %vm1917_vm14 = vmand %vm1915_vm12, %vm1916_vm13 }
  0x14   : > { %497 = vadd.xlane.f32.xlu0 %v496_v2  ;;  %702 = vmatpush1.bf16.msra.mxu0 %v2297_v34 }
  0x15   : > { %2148 = vmatpush3.bf16.msra.mxu1 %v2298_v35  ;;  %703 = vmatprep.subr.bf16.mxu0 %v2299_v36 }
  0x16   : > { %2149 = vmatprep.subr.bf16.mxu1 %v2403_v19 }
  0x18   : > { %704 = vmatpush1.bf16.msra.mxu0 %v2301_v38 }
  0x19   : > { %2150 = vmatpush3.bf16.msra.mxu1 %v2302_v39  ;;  %705 = vmatprep.subr.bf16.mxu0 %v2303_v40 }
  0x1a   : > { %2151 = vmatprep.subr.bf16.mxu1 %v2403_v19 }
  0x1c   : > { %706 = vmatpush1.bf16.msra.mxu0 %v2305_v41 }
  0x1d   : > { %2152 = vmatpush3.bf16.msra.mxu1 %v2306_v42  ;;  %2169 = vmatprep.subr.bf16.mxu0 %v2403_v19 }
  0x1e   : > { %2157 = vmatprep.subr.bf16.mxu1 %v2403_v19 }
  0xa1   : > { %v498_v3 = vpop.xlane.xlu0 %497 }
  0xa2   : > { %v500_v4 = vmul.f32 0.010416667, %v498_v3 }
  0xa4   : > { %v501_v5 = vsub.f32 %v492_v1, %v500_v4 }
  0xa6   : > { %v502_v6 = vmul.f32 %v501_v5, %v501_v5 }
  0xa8   : > { %v503_v7 = vsel %vm495_vm0, %v502_v6, 0.0 }
  0xa9   : > { %504 = vadd.xlane.f32.xlu0 %v503_v7 }
 0x136   : > { %v505_v8 = vpop.xlane.xlu0 %504 }
 0x137   : > { %v506_v9 = vmul.f32 0.010416667, %v505_v8 }
 0x139   : > { %v507_v10 = vadd.f32 1e-05, %v506_v9 }
 0x13b   : > { %2361 = vrsqrt.f32 %v507_v10 }
 0x145   : > { %v2362_v11 = vpop.eup %2361 }
 0x146   : > { %v509_v13 = vmul.f32 %v2362_v11, %v501_v5 }
 0x148   : > { %v516_v15 = vmul.f32 %v1981_v12, %v509_v13 }
 0x14a   : > { %v2525_v16 = vadd.f32 %v1982_v14, %v516_v15 }
 0x14c   : > { %v526_v17 = vsel %vm495_vm0, %v2525_v16, 0.0 }
 0x14d   : > { %527 = vadd.xlane.f32.xlu1 %v526_v17 }
 0x1da   : > { %v528_v20 = vpop.xlane.xlu1 %527 }
 0x1db   : > { %v529_v21 = vmul.f32 0.010416667, %v528_v20 }
 0x1dd   : > { %v530_v22 = vsub.f32 %v2525_v16, %v529_v21 }
 0x1df   : > { %v531_v23 = vmul.f32 %v530_v22, %v530_v22 }
 0x1e1   : > { %v532_v24 = vsel %vm495_vm0, %v531_v23, 0.0 }
 0x1e2   : > { %533 = vadd.xlane.f32.xlu1 %v532_v24 }
 0x26f   : > { %v534_v43 = vpop.xlane.xlu1 %533 }
 0x270   : > { %v535_v44 = vmul.f32 0.010416667, %v534_v43 }
 0x272   : > { %v536_v45 = vadd.f32 1e-05, %v535_v44 }
 0x274   : > { %2363 = vrsqrt.f32 %v536_v45 }
 0x27e   : > { %v2364_v46 = vpop.eup %2363 }
 0x27f   : > { %v538_v48 = vmul.f32 %v2364_v46, %v530_v22 }
 0x281   : > { %v545_v50 = vmul.f32 %v1983_v47, %v538_v48 }
 0x283   : > { %v552_v51 = vadd.f32 %v1984_v49, %v545_v50  ;;  %v2414_v49 = vmov 65535  }
 0x284   : > { %v852_v50 = vsel %vm850_vm6, 4294967295, %v2414_v49 }
 0x285   : > { %v577_v52 = vpack.c.bf16 %v552_v51, %v552_v51  ;;  %v2655_v53 = vsel %vm851_vm7, %v852_v50, 0 }
 0x287   : > { %2003 = vmatmul.mubr.msk.bf16.vlgmr.msra.gmra.mrb[0].mxu0 %vm691_vm2, %v577_v52  ;;  %2154 = vmatmul.mubr.msk.bf16.vlgmr.msra.gmra.mrb[0].mxu1 %vm691_vm2, %v577_v52 }
 0x288   : > { %2159 = vmatprep.mubr.msk.bf16.mxu1 %vm2405_vm1, %v2403_v19  ;;  %2171 = vmatprep.mubr.msk.bf16.mxu0 %vm2405_vm1, %v2403_v19 }
 0x35a   : > { %v729_v60 = vpop.f32.mrb[0].mxu0  ;;  %v2623_v61 = vpop.f32.mrb[0].mxu1 }
 0x35b   : > { %v730_v62 = vadd.f32 %v729_v60, %v583_v58  ;;  %v731_v63 = vpop.f32.mrb[1].mxu0  ;;  %v2155_v0 = vpop.f32.mrb[1].mxu1 }
 0x35c   : > { %v733_v1 = vpop.f32.mrb[2].mxu0  ;;  %v773_v2 = vpop.f32.mrb[2].mxu1  ;;  %v732_v4 = vadd.f32 %v731_v63, %v587_v59 }
 0x35d   : > { %v778_v3 = vpack.c.bf16 %v730_v62, %v730_v62  ;;  %v734_v5 = vpop.f32.mrb[3].mxu0  ;;  %v2156_v6 = vpop.f32.mrb[3].mxu1  ;;  %v776_v7 = vmul.f32 0.20412415, %v730_v62 }
 0x35e   : > { %v2625_v8 = vpack.c.bf16 %v732_v4, %v732_v4 }
 0x35f   : > { %900 = vrot.lane.b32.xlu1 %v778_v3, %s2406_s22  ;;  %780 = vrot.lane.b32.xlu0 %v778_v3, %s2407_s23  ;;  %v777_v9 = vpack.c.bf16 %v776_v7, %v776_v7  ;;  %s2420_s23 = smov 72  }
 0x363   : > { %902 = vrot.lane.b32.xlu1 %v2625_v8, %s2406_s22  ;;  %1014 = vrot.lane.b32.xlu0 %v2625_v8, %s2408_s24  ;;  %s2419_s22 = smov 48   ;;  %s489_s24 = scalar_lea.vmem %s2909_s15, %s1979_s20 }
 0x367   : > { %1130 = vrot.lane.b32.xlu0 %v2625_v8, %s2409_s25  ;;  %898 = vrot.lane.b32.xlu1 %v777_v9, %s2410_s26 }
 0x36b   : > { %1012 = vrot.lane.b32.xlu1 %v777_v9, %s2411_s27 }
 0x36f   : > { %1128 = vrot.lane.b32.xlu1 %v777_v9, %s2412_s28 }
 0x3d1   : > { %v901_v10 = vpop.permute.xlu1 %900  ;;  %v781_v11 = vpop.permute.xlu0 %780 }
 0x3d2   : > { %v787_v12 = vsel %vm782_vm3, %v781_v11, 0 }
 0x3d3   : > { %2158 = vmatpush3.bf16.xpose.msra.mxu1 %v787_v12 }
 0x3d4   : > { %2163 = vmatprep.subr.bf16.mxu1 %v2403_v19 }
 0x3d5   : > { %v903_v13 = vpop.permute.xlu1 %902  ;;  %v1015_v17 = vpop.permute.xlu0 %1014 }
 0x3d6   : > { %v905_v14 = vsel %vm904_vm4, %v901_v10, %v903_v13  ;;  %v1020_v20 = vsel %vm782_vm3, %v1015_v17, 0  ;;  %v590_v10 = vsub.s32 2, %v2608_v54 }
 0x3d7   : > { %v910_v15 = vsel %vm782_vm3, %v905_v14, 0 }
 0x3d8   : > { %2170 = vmatpush3.bf16.xpose.msra.mxu0 %v910_v15  ;;  %v591_v12 = vrot.slane %v2614_v56, %v590_v10 }
 0x3d9   : > { %2181 = vmatprep.subr.bf16.mxu0 %v2403_v19  ;;  %v899_v18 = vpop.permute.xlu1 %898  ;;  %v1131_v21 = vpop.permute.xlu0 %1130 }
 0x3da   : > { %2160 = vmatmul.mubr.msk.bf16.vlgmr.msra.gmra.mrb[4].mxu1 %vm782_vm3, %v777_v9  ;;  %v1136_v23 = vsel %vm782_vm3, %v1131_v21, 0  ;;  %v771_v14 = vadd.f32 %v2623_v61, %v591_v12 }
 0x3db   : > { %2165 = vmatprep.mubr.msk.bf16.mxu1 %vm2405_vm1, %v2403_v19 }
 0x3dc   : > { %v1074_v17 = vpack.c.bf16 %v771_v14, %v771_v14 }
 0x3dd   : > { %v1013_v22 = vpop.permute.xlu1 %1012 }
 0x3df   : > { %2172 = vmatmul.mubr.msk.bf16.vlgmr.msra.gmra.mrb[4].mxu0 %vm782_vm3, %v899_v18 }
 0x3e0   : > { %2182 = vmatpush3.bf16.xpose.msra.mxu0 %v1020_v20  ;;  %2183 = vmatprep.mubr.msk.bf16.mxu0 %vm2405_vm1, %v2403_v19 }
 0x3e1   : > { %2193 = vmatprep.subr.bf16.mxu0 %v2403_v19  ;;  %v1129_v24 = vpop.permute.xlu1 %1128 }
 0x3e7   : > { %2184 = vmatmul.mubr.msk.bf16.vlgmr.msra.gmra.mrb[8].mxu0 %vm782_vm3, %v1013_v22 }
 0x3e8   : > { %2194 = vmatpush3.bf16.xpose.msra.mxu0 %v1136_v23  ;;  %2195 = vmatprep.mubr.msk.bf16.mxu0 %vm2405_vm1, %v2403_v19 }
 0x3e9   : > { %2205 = vmatprep.subr.bf16.mxu0 %v2403_v19 }
 0x3ef   : > { %2196 = vmatmul.mubr.msk.bf16.vlgmr.msra.gmra.mrb[12].mxu0 %vm782_vm3, %v1129_v24 }
 0x3f0   : > { %2217 = vmatprep.mubr.msk.bf16.mxu0 %vm2405_vm1, %v2403_v19 }
 0x4ad   : > { %v823_v25 = vpop.f32.mrb[4].mxu1 }
 0x4ae   : > { %v2161_v26 = vpop.f32.mrb[5].mxu1  ;;  %v830_v27 = vsel %vm829_vm5, %v823_v25, -inf }
 0x4af   : > { %831 = vmax.xlane.f32.xlu0 %v830_v27  ;;  %v826_v28 = vpop.f32.mrb[6].mxu1 }
 0x4b0   : > { %v2162_v29 = vpop.f32.mrb[7].mxu1 }
 0x4b2   : > { %v946_v30 = vpop.f32.mrb[4].mxu0 }
 0x4b3   : > { %v2173_v31 = vpop.f32.mrb[5].mxu0  ;;  %v952_v32 = vsel %vm829_vm5, %v946_v30, -inf }
 0x4b4   : > { %953 = vmax.xlane.f32.xlu1 %v952_v32  ;;  %v949_v33 = vpop.f32.mrb[6].mxu0 }
 0x4b5   : > { %v2174_v34 = vpop.f32.mrb[7].mxu0 }
 0x4ba   : > { %v1056_v35 = vpop.f32.mrb[8].mxu0 }
 0x4bb   : > { %v2185_v36 = vpop.f32.mrb[9].mxu0  ;;  %v1062_v38 = vsel %vm829_vm5, %v1056_v35, -inf }
 0x4bc   : > { %v1059_v39 = vpop.f32.mrb[10].mxu0  ;;  %1063 = vmax.xlane.f32.xlu0 %v1062_v38 }
 0x4bd   : > { %v2186_v40 = vpop.f32.mrb[11].mxu0 }
 0x4c2   : > { %v1172_v41 = vpop.f32.mrb[12].mxu0 }
 0x4c3   : > { %v2197_v42 = vpop.f32.mrb[13].mxu0  ;;  %v1178_v43 = vsel %vm829_vm5, %v1172_v41, -inf }
 0x4c4   : > { %v1175_v44 = vpop.f32.mrb[14].mxu0  ;;  %1179 = vmax.xlane.f32.xlu0 %v1178_v43 }
 0x4c5   : > { %844 = vrot.lane.b32.xlu1 %v2625_v8, %s2413_s29  ;;  %v2198_v45 = vpop.f32.mrb[15].mxu0 }
 0x4c6   : > { %v2308_v45 = vld [vmem:[%s2901_s7 + $0x8] sm:$0xff]  }
 0x53c   : > { %v832_v46 = vpop.xlane.xlu0 %831 }
 0x53d   : > { %v833_v47 = vsub.f32 %v823_v25, %v832_v46 }
 0x53f   : > { %v834_v48 = vmul.f32 1.442695, %v833_v47  ;;  %v2310_v47 = vld [vmem:[%s2901_s7 + $0x18] sm:$0xff]  }
 0x541   : > { %2365 = vpow2.f32 %v834_v48  ;;  %v954_v51 = vpop.xlane.xlu1 %953  ;;  %v2311_v48 = vld [vmem:[%s2901_s7 + $0x20] sm:$0xff]  }
 0x542   : > { %v955_v52 = vsub.f32 %v946_v30, %v954_v51 }
 0x544   : > { %v956_v58 = vmul.f32 1.442695, %v955_v52 }
 0x545   : > { %v845_v59 = vpop.permute.xlu1 %844 }
 0x546   : > { %2367 = vpow2.f32 %v956_v58  ;;  %v855_v60 = vand.u32 %v2655_v53, %v845_v59 }
 0x548   : > { %2164 = vmatpush3.bf16.msra.mxu1 %v855_v60 }
 0x549   : > { %v1064_v62 = vpop.xlane.xlu0 %1063  ;;  %2175 = vmatprep.subr.bf16.mxu1 %v2403_v19 }
 0x54a   : > { %v1065_v63 = vsub.f32 %v1056_v35, %v1064_v62 }
 0x54b   : > { %v2366_v0 = vpop.eup %2365 }
 0x54c   : > { %v1066_v1 = vmul.f32 1.442695, %v1065_v63  ;;  %v836_v2 = vsel %vm829_vm5, %v2366_v0, 0.0 }
 0x54d   : > { %837 = vadd.xlane.f32.xlu0 %v836_v2 }
 0x54e   : > { %2369 = vpow2.f32 %v1066_v1 }
 0x550   : > { %v2368_v3 = vpop.eup %2367 }
 0x551   : > { %v1180_v4 = vpop.xlane.xlu0 %1179  ;;  %v958_v5 = vsel %vm829_vm5, %v2368_v3, 0.0 }
 0x552   : > { %v1181_v6 = vsub.f32 %v1172_v41, %v1180_v4  ;;  %959 = vadd.xlane.f32.xlu1 %v958_v5  ;;  %v2307_v41 = vld [vmem:[%s2901_s7] sm:$0xff]  }
 0x553   : > { %2206 = vmatpush3.bf16.msra.mxu0 %v2307_v41  ;;  %v2336_v41 = vld [vmem:[%s2905_s11 + $0x80] ss:$12 sps:$4 sm:$0xff]  }
 0x554   : > { %v1182_v7 = vmul.f32 1.442695, %v1181_v6  ;;  %2207 = vmatprep.subr.bf16.mxu0 %v2403_v19 }
 0x556   : > { %2371 = vpow2.f32 %v1182_v7 }
 0x557   : > { %2208 = vmatpush3.bf16.msra.mxu0 %v2308_v45 }
 0x558   : > { %v2370_v9 = vpop.eup %2369  ;;  %2209 = vmatprep.subr.bf16.mxu0 %v2403_v19 }
 0x559   : > { %v1068_v11 = vsel %vm829_vm5, %v2370_v9, 0.0 }
 0x55a   : > { %1069 = vadd.xlane.f32.xlu0 %v1068_v11 }
 0x560   : > { %v2372_v13 = vpop.eup %2371 }
 0x561   : > { %v1184_v15 = vsel %vm829_vm5, %v2372_v13, 0.0 }
 0x562   : > { %1185 = vadd.xlane.f32.xlu0 %v1184_v15 }
 0x563   : > { %1076 = vrot.lane.b32.xlu1 %v2625_v8, %s2415_s30 }
 0x567   : > { %1078 = vrot.lane.b32.xlu1 %v1074_v17, %s2415_s30 }
 0x56b   : > { %1190 = vrot.lane.b32.xlu1 %v1074_v17, %s2416_s16  ;;  %s2418_s16 = smov 24  }
 0x578   : > { %964 = vrot.lane.b32.xlu0 %v2625_v8, %s2417_s17 }
 0x5da   : > { %v838_v18 = vpop.xlane.xlu0 %837 }
 0x5db   : > { %2373 = vrcp.f32 %v838_v18 }
 0x5df   : > { %v960_v20 = vpop.xlane.xlu1 %959 }
 0x5e0   : > { %2375 = vrcp.f32 %v960_v20 }
 0x5e3   : > { %v1077_v23 = vpop.permute.xlu1 %1076 }
 0x5e5   : > { %v2374_v56 = vpop.eup %2373 }
 0x5e6   : > { %v840_v21 = vmul.f32 %v2374_v56, %v2366_v0 }
 0x5e7   : > { %v1070_v22 = vpop.xlane.xlu0 %1069  ;;  %v1079_v8 = vpop.permute.xlu1 %1078 }
 0x5e8   : > { %v841_v61 = vpack.c.bf16 %v840_v21, %v840_v21  ;;  %2377 = vrcp.f32 %v1070_v22  ;;  %v1081_v29 = vsel %vm1080_vm9, %v1077_v23, %v1079_v8  ;;  %v2313_v21 = vld [vmem:[%s2905_s11] ss:$12 sps:$4 sm:$0xff]   ;;  %v2316_v8 = vld [vmem:[%s2905_s11 + $0x8] ss:$12 sps:$4 sm:$0xff]  }
 0x5e9   : > { %v1086_v32 = vand.u32 %v1081_v29, %v2655_v53  ;;  %v2323_v29 = vld [vmem:[%s2905_s11 + $0x34] ss:$12 sps:$4 sm:$0xff]  }
 0x5ea   : > { %2166 = vmatmul.mubr.msk.bf16.vlgmr.msra.gmra.mrb[8].mxu1 %vm846_vm8, %v841_v61  ;;  %v2376_v25 = vpop.eup %2375  ;;  %v2315_v61 = vld [vmem:[%s2905_s11 + $0x4] ss:$12 sps:$4 sm:$0xff]  }
 0x5eb   : > { %2177 = vmatprep.mubr.msk.bf16.mxu1 %vm2405_vm1, %v2403_v19  ;;  %v962_v26 = vmul.f32 %v2376_v25, %v2368_v3  ;;  %v1191_v34 = vpop.permute.xlu1 %1190 }
 0x5ec   : > { %v1196_v38 = vand.u32 %v1191_v34, %v2655_v53  ;;  %v2328_v34 = vld [vmem:[%s2905_s11 + $0x50] ss:$12 sps:$4 sm:$0xff]  }
 0x5ed   : > { %v963_v30 = vpack.c.bf16 %v962_v26, %v962_v26  ;;  %v2319_v26 = vld [vmem:[%s2905_s11 + $0x1c] ss:$12 sps:$4 sm:$0xff]  }
 0x5ef   : > { %v1186_v24 = vpop.xlane.xlu0 %1185 }
 0x5f0   : > { %2379 = vrcp.f32 %v1186_v24 }
 0x5f2   : > { %v2378_v31 = vpop.eup %2377 }
 0x5f3   : > { %v965_v27 = vpop.permute.xlu0 %964  ;;  %v1072_v33 = vmul.f32 %v2378_v31, %v2370_v9  ;;  %v2324_v31 = vld [vmem:[%s2905_s11 + $0x38] ss:$12 sps:$4 sm:$0xff]  }
 0x5f4   : > { %v970_v28 = vand.u32 %v965_v27, %v2655_v53  ;;  %v2312_v53 = vld [vmem:[%s2901_s7 + $0x28] sm:$0xff]   ;;  %v2317_v27 = vld [vmem:[%s2905_s11 + $0x18] ss:$12 sps:$4 sm:$0xff]  }
 0x5f5   : > { %v1073_v35 = vpack.c.bf16 %v1072_v33, %v1072_v33  ;;  %v2325_v33 = vld [vmem:[%s2905_s11 + $0x48] ss:$12 sps:$4 sm:$0xff]  }
 0x5f6   : > { %2176 = vmatpush3.bf16.msra.mxu1 %v970_v28  ;;  %v2320_v28 = vld [vmem:[%s2905_s11 + $0x20] ss:$12 sps:$4 sm:$0xff]  }
 0x5f7   : > { %2187 = vmatprep.subr.bf16.mxu1 %v2403_v19 }
 0x5f9   : > { %2178 = vmatmul.mubr.msk.bf16.vlgmr.msra.gmra.mrb[12].mxu1 %vm846_vm8, %v963_v30  ;;  %v2321_v30 = vld [vmem:[%s2905_s11 + $0x30] ss:$12 sps:$4 sm:$0xff]  }
 0x5fa   : > { %2188 = vmatpush3.bf16.msra.mxu1 %v1086_v32  ;;  %2189 = vmatprep.mubr.msk.bf16.mxu1 %vm2405_vm1, %v2403_v19  ;;  %v2380_v36 = vpop.eup %2379  ;;  %v2327_v32 = vld [vmem:[%s2905_s11 + $0x4c] ss:$12 sps:$4 sm:$0xff]  }
 0x5fb   : > { %2199 = vmatprep.subr.bf16.mxu1 %v2403_v19  ;;  %v1188_v39 = vmul.f32 %v2380_v36, %v2372_v13  ;;  %v2020_v13 = vld [vmem:[%s2902_s8] ss:$0 sm:$0xff] }
 0x5fc   : > { %v2329_v36 = vld [vmem:[%s2905_s11 + $0x60] ss:$12 sps:$4 sm:$0xff]  }
 0x5fd   : > { %v1189_v40 = vpack.c.bf16 %v1188_v39, %v1188_v39  ;;  %v2333_v39 = vld [vmem:[%s2905_s11 + $0x78] ss:$12 sps:$4 sm:$0xff]  }
 0x601   : > { %2190 = vmatmul.mubr.msk.bf16.vlgmr.msra.gmra.mrb[16].mxu1 %vm846_vm8, %v1073_v35  ;;  %v2331_v35 = vld [vmem:[%s2905_s11 + $0x64] ss:$12 sps:$4 sm:$0xff]  }
 0x602   : > { %2200 = vmatpush3.bf16.msra.mxu1 %v1196_v38  ;;  %2201 = vmatprep.mubr.msk.bf16.mxu1 %vm2405_vm1, %v2403_v19  ;;  %v2332_v38 = vld [vmem:[%s2905_s11 + $0x68] ss:$12 sps:$4 sm:$0xff]  }
 0x603   : > { %1526 = vmatprep.subr.bf16.mxu1 %v2315_v61 }
 0x609   : > { %2202 = vmatmul.mubr.msk.bf16.vlgmr.msra.gmra.mrb[20].mxu1 %vm846_vm8, %v1189_v40  ;;  %v2335_v40 = vld [vmem:[%s2905_s11 + $0x7c] ss:$12 sps:$4 sm:$0xff]  }
 0x60a   : > { %1558 = vmatprep.mubr.bf16.mxu1 %v2404_v37  ;;  %v2309_v37 = vld [vmem:[%s2901_s7 + $0x10] sm:$0xff]   ;;  %1527 = vmatpush1.bf16.msra.mxu1 %v2313_v21 }
 0x60b   : > { %2210 = vmatpush3.bf16.msra.mxu0 %v2309_v37  ;;  %1528 = vmatprep.subr.bf16.mxu1 %v2319_v26 }
 0x60c   : > { %2211 = vmatprep.subr.bf16.mxu0 %v2403_v19 }
 0x60e   : > { %1529 = vmatpush1.bf16.msra.mxu1 %v2317_v27 }
 0x60f   : > { %2212 = vmatpush3.bf16.msra.mxu0 %v2310_v47  ;;  %1530 = vmatprep.subr.bf16.mxu1 %v2323_v29  ;;  %v2022_v47 = vld [vmem:[%s2904_s10] ss:$0 sm:$0xff] }
 0x610   : > { %2213 = vmatprep.subr.bf16.mxu0 %v2403_v19 }
 0x612   : > { %1531 = vmatpush1.bf16.msra.mxu1 %v2321_v30 }
 0x613   : > { %2214 = vmatpush3.bf16.msra.mxu0 %v2311_v48  ;;  %1532 = vmatprep.subr.bf16.mxu1 %v2327_v32 }
 0x614   : > { %2215 = vmatprep.subr.bf16.mxu0 %v2403_v19 }
 0x616   : > { %1533 = vmatpush1.bf16.msra.mxu1 %v2325_v33 }
 0x617   : > { %2216 = vmatpush3.bf16.msra.mxu0 %v2312_v53  ;;  %1534 = vmatprep.subr.bf16.mxu1 %v2331_v35  ;;  %v2339_v53 = vld [vmem:[%s2907_s13] sm:$0xff]  }
 0x618   : > { %2221 = vmatprep.subr.bf16.mxu0 %v2403_v19 }
 0x61a   : > { %1535 = vmatpush1.bf16.msra.mxu1 %v2329_v36 }
 0x61b   : > { %1536 = vmatprep.subr.bf16.mxu1 %v2335_v40 }
 0x61e   : > { %1537 = vmatpush1.bf16.msra.mxu1 %v2333_v39 }
 0x6bd   : > { %v891_v42 = vpop.f32.mrb[8].mxu1 }
 0x6be   : > { %v2167_v43 = vpop.f32.mrb[9].mxu1 }
 0x6bf   : > { %v894_v44 = vpop.f32.mrb[10].mxu1 }
 0x6c0   : > { %v2168_v46 = vpop.f32.mrb[11].mxu1 }
 0x6c1   : > { %v2021_v46 = vld [vmem:[%s2903_s9] ss:$0 sm:$0xff] }
 0x6cc   : > { %v1006_v49 = vpop.f32.mrb[12].mxu1 }
 0x6cd   : > { %1239 = vrot.lane.b32.xlu1 %v1006_v49, %s2418_s16  ;;  %v2179_v50 = vpop.f32.mrb[13].mxu1 }
 0x6ce   : > { %v1009_v51 = vpop.f32.mrb[14].mxu1 }
 0x6cf   : > { %v2180_v52 = vpop.f32.mrb[15].mxu1  ;;  %v2337_v51 = vld [vmem:[%s2907_s13 + $0x80] sm:$0xff]  }
 0x6d0   : > { %v2338_v52 = vld [vmem:[%s2907_s13 + $0x40] sm:$0xff]  }
 0x6d1   : > { %2110 = vmatprep.subr.bf16.mxu1 %v2338_v52  ;;  %v2046_v52 = vld [vmem:[%s2908_s14] ss:$0 sm:$0xff] }
 0x6d4   : > { %v1122_v58 = vpop.f32.mrb[16].mxu1 }
 0x6d5   : > { %1243 = vrot.lane.b32.xlu0 %v1122_v58, %s2419_s22  ;;  %v2191_v59 = vpop.f32.mrb[17].mxu1  ;;  %v2340_v58 = vld [vmem:[%s2907_s13 + $0x88] sm:$0xff]  }
 0x6d6   : > { %v1125_v60 = vpop.f32.mrb[18].mxu1  ;;  %v2341_v59 = vld [vmem:[%s2907_s13 + $0x48] sm:$0xff]  }
 0x6d7   : > { %v2192_v62 = vpop.f32.mrb[19].mxu1  ;;  %v2342_v60 = vld [vmem:[%s2907_s13 + $0x8] sm:$0xff]  }
 0x6d8   : > { %v2343_v62 = vld [vmem:[%s2907_s13 + $0x90] sm:$0xff]  }
 0x6dc   : > { %v1232_v63 = vpop.f32.mrb[20].mxu1 }
 0x6dd   : > { %1247 = vrot.lane.b32.xlu1 %v1232_v63, %s2420_s23  ;;  %v2203_v0 = vpop.f32.mrb[21].mxu1  ;;  %v2344_v63 = vld [vmem:[%s2907_s13 + $0x50] sm:$0xff]  }
 0x6de   : > { %v1235_v1 = vpop.f32.mrb[22].mxu1  ;;  %v2345_v0 = vld [vmem:[%s2907_s13 + $0x10] sm:$0xff]  }
 0x6df   : > { %v2204_v2 = vpop.f32.mrb[23].mxu1  ;;  %v2346_v1 = vld [vmem:[%s2907_s13 + $0x98] sm:$0xff]  }
 0x6e0   : > { %v2347_v2 = vld [vmem:[%s2907_s13 + $0x58] sm:$0xff]  }
 0x73f   : > { %v1240_v3 = vpop.permute.xlu1 %1239 }
 0x740   : > { %v1250_v5 = vsel %vm782_vm3, %v891_v42, %v1240_v3  ;;  %v2348_v3 = vld [vmem:[%s2907_s13 + $0x18] sm:$0xff]  }
 0x747   : > { %v1244_v4 = vpop.permute.xlu0 %1243 }
 0x748   : > { %v1252_v6 = vsel %vm1251_vm10, %v1250_v5, %v1244_v4  ;;  %v2349_v4 = vld [vmem:[%s2907_s13 + $0xa0] sm:$0xff]  }
 0x749   : > { %v2350_v5 = vld [vmem:[%s2907_s13 + $0x60] sm:$0xff]  }
 0x74f   : > { %v1248_v7 = vpop.permute.xlu1 %1247 }
 0x750   : > { %v1254_v9 = vsel %vm1253_vm11, %v1252_v6, %v1248_v7  ;;  %v2351_v6 = vld [vmem:[%s2907_s13 + $0x20] sm:$0xff]   ;;  %v2352_v7 = vld [vmem:[%s2907_s13 + $0xa8] sm:$0xff]  }
 0x751   : > { %v1267_v11 = vpack.c.bf16 %v1254_v9, %v1254_v9  ;;  %v2353_v9 = vld [vmem:[%s2907_s13 + $0x68] sm:$0xff]  }
 0x753   : > { %2218 = vmatmul.mubr.msk.bf16.vlgmr.msra.gmra.mrb[16].mxu0 %vm691_vm2, %v1267_v11  ;;  %v2354_v11 = vld [vmem:[%s2907_s13 + $0x28] sm:$0xff]  }
 0x754   : > { %2233 = vmatprep.mubr.msk.bf16.mxu0 %vm2405_vm1, %v2403_v19  ;;  %2222 = vmatpush3.bf16.msra.mxu0 %v2316_v8 }
 0x755   : > { %2223 = vmatprep.subr.bf16.mxu0 %v2403_v19 }
 0x758   : > { %2224 = vmatpush3.bf16.msra.mxu0 %v2320_v28 }
 0x759   : > { %2225 = vmatprep.subr.bf16.mxu0 %v2403_v19 }
 0x75c   : > { %2226 = vmatpush3.bf16.msra.mxu0 %v2324_v31 }
 0x75d   : > { %2227 = vmatprep.subr.bf16.mxu0 %v2403_v19 }
 0x760   : > { %2228 = vmatpush3.bf16.msra.mxu0 %v2328_v34 }
 0x761   : > { %2229 = vmatprep.subr.bf16.mxu0 %v2403_v19 }
 0x764   : > { %2230 = vmatpush3.bf16.msra.mxu0 %v2332_v38 }
 0x765   : > { %2231 = vmatprep.subr.bf16.mxu0 %v2403_v19 }
 0x768   : > { %2232 = vmatpush3.bf16.msra.mxu0 %v2336_v41 }
 0x769   : > { %2237 = vmatprep.subr.bf16.mxu0 %v2403_v19 }
 0x826   : > { %v1341_v12 = vpop.f32.mrb[16].mxu0 }
 0x827   : > { %v1347_v14 = vadd.f32 %v1341_v12, %v2525_v16  ;;  %v2219_v15 = vpop.f32.mrb[17].mxu0  ;;  %v2355_v12 = vld [vmem:[%s2907_s13 + $0xb0] sm:$0xff]  }
 0x828   : > { %v1344_v17 = vpop.f32.mrb[18].mxu0  ;;  %v2358_v15 = vld [vmem:[%s2907_s13 + $0xb8] sm:$0xff]  }
 0x829   : > { %v2718_v18 = vadd.f32 %v2020_v13, %v1347_v14  ;;  %v2220_v20 = vpop.f32.mrb[19].mxu0  ;;  %v2356_v13 = vld [vmem:[%s2907_s13 + $0x70] sm:$0xff]   ;;  %v2359_v17 = vld [vmem:[%s2907_s13 + $0x78] sm:$0xff]  }
 0x82a   : > { %v2357_v14 = vld [vmem:[%s2907_s13 + $0x30] sm:$0xff]   ;;  %v2360_v20 = vld [vmem:[%s2907_s13 + $0x38] sm:$0xff]  }
 0x82b   : > { %v1358_v56 = vsel %vm495_vm0, %v2718_v18, 0.0 }
 0x82c   : > { %1359 = vadd.xlane.f32.xlu0 %v1358_v56 }
 0x8b9   : > { %v1360_v16 = vpop.xlane.xlu0 %1359 }
 0x8ba   : > { %v1361_v22 = vmul.f32 0.010416667, %v1360_v16 }
 0x8bc   : > { %v1362_v23 = vsub.f32 %v2718_v18, %v1361_v22 }
 0x8be   : > { %v1363_v24 = vmul.f32 %v1362_v23, %v1362_v23 }
 0x8c0   : > { %v1364_v25 = vsel %vm495_vm0, %v1363_v24, 0.0 }
 0x8c1   : > { %1365 = vadd.xlane.f32.xlu1 %v1364_v25 }
 0x94e   : > { %v1366_v42 = vpop.xlane.xlu1 %1365 }
 0x94f   : > { %v1367_v43 = vmul.f32 0.010416667, %v1366_v42 }
 0x951   : > { %v1368_v44 = vadd.f32 1e-05, %v1367_v43 }
 0x953   : > { %2381 = vrsqrt.f32 %v1368_v44 }
 0x95d   : > { %v2382_v45 = vpop.eup %2381 }
 0x95e   : > { %v1370_v37 = vmul.f32 %v2382_v45, %v1362_v23 }
 0x960   : > { %v1377_v48 = vmul.f32 %v2021_v46, %v1370_v37 }
 0x962   : > { %v1384_v49 = vadd.f32 %v2022_v47, %v1377_v48 }
 0x964   : > { %v1409_v50 = vpack.c.bf16 %v1384_v49, %v1384_v49 }
 0x966   : > { %2041 = vmatmul.mubr.msk.bf16.vlgmr.msra.gmra.mrb[24].mxu1 %vm691_vm2, %v1409_v50  ;;  %2234 = vmatmul.mubr.msk.bf16.vlgmr.msra.gmra.mrb[20].mxu0 %vm691_vm2, %v1409_v50 }
 0x967   : > { %2253 = vmatprep.mubr.msk.bf16.mxu0 %vm2405_vm1, %v2403_v19  ;;  %2238 = vmatpush3.bf16.msra.mxu0 %v2337_v51 }
 0x968   : > { %2239 = vmatprep.subr.bf16.mxu0 %v2403_v19  ;;  %2111 = vmatpush3.bf16.msra.mxu1 %v2339_v53 }
 0x969   : > { %2112 = vmatprep.subr.bf16.mxu1 %v2341_v59 }
 0x96b   : > { %2240 = vmatpush3.bf16.msra.mxu0 %v2340_v58 }
 0x96c   : > { %2241 = vmatprep.subr.bf16.mxu0 %v2403_v19  ;;  %2113 = vmatpush3.bf16.msra.mxu1 %v2342_v60 }
 0x96d   : > { %2114 = vmatprep.subr.bf16.mxu1 %v2344_v63 }
 0x96f   : > { %2242 = vmatpush3.bf16.msra.mxu0 %v2343_v62 }
 0x970   : > { %2243 = vmatprep.subr.bf16.mxu0 %v2403_v19  ;;  %2115 = vmatpush3.bf16.msra.mxu1 %v2345_v0 }
 0x971   : > { %2116 = vmatprep.subr.bf16.mxu1 %v2347_v2  ;;  %v1918_v2 = vld [vmem:[%s489_s24] sm:$0xf] }
 0x973   : > { %2244 = vmatpush3.bf16.msra.mxu0 %v2346_v1 }
 0x974   : > { %2245 = vmatprep.subr.bf16.mxu0 %v2403_v19  ;;  %2117 = vmatpush3.bf16.msra.mxu1 %v2348_v3 }
 0x975   : > { %2118 = vmatprep.subr.bf16.mxu1 %v2350_v5 }
 0x977   : > { %2246 = vmatpush3.bf16.msra.mxu0 %v2349_v4 }
 0x978   : > { %2247 = vmatprep.subr.bf16.mxu0 %v2403_v19  ;;  %2119 = vmatpush3.bf16.msra.mxu1 %v2351_v6 }
 0x979   : > { %2120 = vmatprep.subr.bf16.mxu1 %v2353_v9 }
 0x97b   : > { %2248 = vmatpush3.bf16.msra.mxu0 %v2352_v7 }
 0x97c   : > { %2249 = vmatprep.subr.bf16.mxu0 %v2403_v19  ;;  %2121 = vmatpush3.bf16.msra.mxu1 %v2354_v11 }
 0x97d   : > { %2122 = vmatprep.subr.bf16.mxu1 %v2356_v13 }
 0x97f   : > { %2250 = vmatpush3.bf16.msra.mxu0 %v2355_v12 }
 0x980   : > { %2251 = vmatprep.subr.bf16.mxu0 %v2403_v19  ;;  %2123 = vmatpush3.bf16.msra.mxu1 %v2357_v14  ;;  %v1410_v19 = vld [vmem:[%s2906_s12] sm:$0x7] }
 0x981   : > { %2124 = vmatprep.subr.bf16.mxu1 %v2359_v17  ;;  %v1415_v56 = vrot.slane %v1410_v19, %v582_v55  ;;  %v1423_v21 = vrot.slane %v1410_v19, %v590_v10  ;;  %v1419_v61 = vrot.slane %v1410_v19, %v586_v57 }
 0x983   : > { %2252 = vmatpush3.bf16.msra.mxu0 %v2358_v15 }
 0x984   : > { %2125 = vmatpush3.bf16.msra.mxu1 %v2360_v20 }
 0xa39   : > { %v1560_v16 = vpop.f32.mrb[24].mxu1  ;;  %v1601_v22 = vpop.f32.mrb[20].mxu0 }
 0xa3a   : > { %v1561_v23 = vadd.f32 %v1560_v16, %v1415_v56  ;;  %v1602_v24 = vadd.f32 %v1601_v22, %v1423_v21  ;;  %v1562_v25 = vpop.f32.mrb[25].mxu1  ;;  %v2235_v8 = vpop.f32.mrb[21].mxu0 }
 0xa3b   : > { %v1563_v26 = vadd.f32 %v1562_v25, %v1419_v61  ;;  %v1564_v27 = vpop.f32.mrb[26].mxu1  ;;  %v1604_v28 = vpop.f32.mrb[22].mxu0 }
 0xa3c   : > { %v2043_v29 = vmul.f32 -1.702, %v1561_v23  ;;  %v2045_v30 = vmul.f32 -1.702, %v1602_v24  ;;  %v1565_v31 = vpop.f32.mrb[27].mxu1  ;;  %v2236_v32 = vpop.f32.mrb[23].mxu0 }
 0xa3d   : > { %v2044_v55 = vmul.f32 -1.702, %v1563_v26 }
 0xa3e   : > { %v1613_v33 = vmul.f32 1.442695, %v2043_v29  ;;  %v1617_v34 = vmul.f32 1.442695, %v2045_v30 }
 0xa3f   : > { %v1615_v10 = vmul.f32 1.442695, %v2044_v55 }
 0xa40   : > { %2383 = vpow2.f32 %v1613_v33 }
 0xa41   : > { %2385 = vpow2.f32 %v1617_v34 }
 0xa42   : > { %2387 = vpow2.f32 %v1615_v10 }
 0xa4a   : > { %v2384_v54 = vpop.eup %2383 }
 0xa4b   : > { %v2386_v57 = vpop.eup %2385  ;;  %v1619_v35 = vadd.f32 1.0, %v2384_v54 }
 0xa4c   : > { %v2388_v36 = vpop.eup %2387  ;;  %v1621_v38 = vadd.f32 1.0, %v2386_v57 }
 0xa4d   : > { %2389 = vrcp.f32 %v1619_v35  ;;  %v1620_v39 = vadd.f32 1.0, %v2388_v36 }
 0xa4e   : > { %2391 = vrcp.f32 %v1621_v38 }
 0xa4f   : > { %2393 = vrcp.f32 %v1620_v39 }
 0xa57   : > { %v2390_v40 = vpop.eup %2389 }
 0xa58   : > { %v2392_v41 = vpop.eup %2391  ;;  %v1628_v43 = vmul.f32 %v2390_v40, %v1561_v23 }
 0xa59   : > { %v2394_v42 = vpop.eup %2393  ;;  %v1630_v44 = vmul.f32 %v2392_v41, %v1602_v24 }
 0xa5a   : > { %v1629_v45 = vmul.f32 %v2394_v42, %v1563_v26  ;;  %v1679_v47 = vpack.c.bf16 %v1628_v43, %v1628_v43 }
 0xa5b   : > { %v1681_v46 = vpack.c.bf16 %v1630_v44, %v1630_v44 }
 0xa5c   : > { %v1680_v37 = vpack.c.bf16 %v1629_v45, %v1629_v45 }
 0xa5d   : > { %2254 = vmatmul.mubr.bf16.vlgmr.msra.gmra.mrb[24].mxu0 %v1681_v46 }
 0xa5e   : > { %1865 = vmatprep.mubr.bf16.mxu1 %v1680_v37 }
 0xa5f   : > { %1866 = vmatmul.mubr.bf16.vlgmr.msra.gmra.mrb[28].mxu1 %v1679_v47 }
 0xb30   : > { %v1907_v48 = vpop.f32.mrb[24].mxu0 }
 0xb31   : > { %v2255_v49 = vpop.f32.mrb[25].mxu0 }
 0xb32   : > { %v2126_v50 = vpop.f32.mrb[28].mxu1  ;;  %v1910_v51 = vpop.f32.mrb[26].mxu0 }
 0xb33   : > { %v2127_v53 = vpop.f32.mrb[29].mxu1  ;;  %v2256_v58 = vpop.f32.mrb[27].mxu0 }
 0xb34   : > { %v2128_v59 = vadd.f32 %v2127_v53, %v2126_v50  ;;  %v2129_v60 = vpop.f32.mrb[30].mxu1 }
 0xb35   : > { %v2130_v62 = vpop.f32.mrb[31].mxu1 }
 0xb36   : > { %v1868_v63 = vadd.f32 %v2128_v59, %v2046_v52 }
 0xb38   : > { %v1908_v0 = vadd.f32 %v1907_v48, %v1868_v63 }
 0xb3a   : > { %v1913_v1 = vadd.f32 %v1908_v0, %v2718_v18 }
 0xb3c   : > { %v1914_v3 = vpack.c.bf16 %v1913_v1, %v1913_v1 }
 0xb3e   : > { %v1919_v4 = vsel %vm1917_vm14, %v1914_v3, %v1918_v2 }
 0xb3f   : > { %1920 = vst [vmem:[%s489_s24] sm:$0xf] %v1919_v4 }
 0xb40 PF: > { %s25_s18 = sadd.s32 1, %s2401_s18  }
 0xb41   : > { %p22_p4 = scmp.ge.s32.totalorder %s25_s18, 4  }
 0xb43   :  { %24 = sbr.rel (!%p22_p4) target bundleno = 1 (0x1), region = 110 }

// kernel: _lambda_.12
= control target key start
LH: loop header
LB: loop body
LE: loop exit
PB: predicated region body
PF: predicated region fallthrough
CT: control target
= control target key end

     0   :  { %s1885_s29 = smov 0   ;;  %s2148_s0 = inlined_call_operand.vmem [shape: bf16[3,8,64], index: 0, kind: input, shape index: {}]   ;;  %s2149_s1 = inlined_call_operand.vmem [shape: f32[8,8], index: 1, kind: input, shape index: {}]   ;;  %s2150_s2 = inlined_call_operand.vmem [shape: f32[1,64], index: 2, kind: input, shape index: {}, may-alias: {2,8}]   ;;  %s2151_s3 = inlined_call_operand.vmem [shape: f32[1,64], index: 3, kind: input, shape index: {}, may-alias: {3,7,9,13}]   ;;  %s2152_s4 = inlined_call_operand.vmem [shape: bf16[64,192], index: 4, kind: input, shape index: {}]   ;;  %s2153_s5 = inlined_call_operand.vmem [shape: f32[1,192], index: 5, kind: input, shape index: {}]   ;;  %s2154_s6 = inlined_call_operand.vmem [shape: bf16[64,64], index: 6, kind: input, shape index: {}]   ;;  %s2155_s7 = inlined_call_operand.vmem [shape: f32[1,64], index: 7, kind: input, shape index: {}, may-alias: {3,7,9,13}]   ;;  %s2156_s8 = inlined_call_operand.vmem [shape: f32[1,64], index: 8, kind: input, shape index: {}, may-alias: {2,8}]   ;;  %s2157_s9 = inlined_call_operand.vmem [shape: f32[1,64], index: 9, kind: input, shape index: {}, may-alias: {3,7,9,13}]   ;;  %s2158_s10 = inlined_call_operand.vmem [shape: bf16[64,256], index: 10, kind: input, shape index: {}]   ;;  %s2159_s11 = inlined_call_operand.vmem [shape: f32[1,256], index: 11, kind: input, shape index: {}]   ;;  %s2160_s12 = inlined_call_operand.vmem [shape: bf16[256,64], index: 12, kind: input, shape index: {}]   ;;  %s2161_s13 = inlined_call_operand.vmem [shape: f32[1,64], index: 13, kind: input, shape index: {}, may-alias: {3,7,9,13}]   ;;  %s2162_s14 = inlined_call_operand.vmem [shape: bf16[3,8,64], index: 14, kind: output, shape index: {}]  }
   0x1 LB: > { %s1535_s30 = sadd.s32 4294967295, %s1798_s29   ;;  %p1539_p0 = scmp.ge.s32.totalorder %s1798_s29, 1  ;;  %s1798_s29 = sphi %s1885_s29, %s24_s29  }
   0x2   : > { %p411_p1 = scmp.lt.s32.totalorder %s1798_s29, 4 }
   0x4   : > { %p412_p2 = pnand %p1539_p0, %p411_p1 }
   0x5   : > { %p455_p3 = scmp.lt.s32.totalorder (!%p412_p2), %s1535_s30, 2  ;;  %vm468_vm0 = vcmask (!%p412_p2), 523264   ;;  %v1720_v8 = vld [vmem:[%s2152_s4 + $0x4] ss:$8 sps:$4 sm:$0xff] (!%p412_p2)   ;;  %v1722_v9 = vld [vmem:[%s2152_s4] ss:$8 sps:$4 sm:$0xff] (!%p412_p2)   ;;  %v508_v27 = vlaneseq (!%p412_p2) }
   0x6   : > { %415 = sbr.rel (%p412_p2) target bundleno = 2595 (0xa23), region = 76  ;;  %v1723_v10 = vld [vmem:[%s2152_s4 + $0x14] ss:$8 sps:$4 sm:$0xff] (!%p412_p2)   ;;  %561 = vmatprep.subr.bf16.mxu1 (!%p412_p2), %v1720_v8  ;;  %v1725_v11 = vld [vmem:[%s2152_s4 + $0x10] ss:$8 sps:$4 sm:$0xff] (!%p412_p2)   ;;  %v1800_v12 = vmov (!%p412_p2), 0  }
   0x7   : > { %562 = vmatpush1.bf16.msra.mxu1 (!%p412_p2), %v1722_v9  ;;  %593 = vmatprep.mubr.bf16.mxu1 (!%p412_p2), %v1800_v12  ;;  %v1726_v13 = vld [vmem:[%s2152_s4 + $0x24] ss:$8 sps:$4 sm:$0xff] (!%p412_p2)   ;;  %v1728_v14 = vld [vmem:[%s2152_s4 + $0x20] ss:$8 sps:$4 sm:$0xff] (!%p412_p2)   ;;  %v1729_v15 = vld [vmem:[%s2152_s4 + $0x34] ss:$8 sps:$4 sm:$0xff] (!%p412_p2)  }
   0x8   : > { %563 = vmatprep.subr.bf16.mxu1 (!%p412_p2), %v1723_v10  ;;  %v1731_v16 = vld [vmem:[%s2152_s4 + $0x30] ss:$8 sps:$4 sm:$0xff] (!%p412_p2)   ;;  %v1542_v21 = vld [vmem:[%s2150_s2] ss:$0 sm:$0xff] (!%p412_p2)  ;;  %v1939_v28 = vshrl.u32 (!%p412_p2), %v508_v27, 7  ;;  %v1801_v29 = vmov (!%p412_p2), 0.0  }
   0x9   : > { %v1543_v23 = vld [vmem:[%s2151_s3] ss:$0 sm:$0xff] (!%p412_p2)  ;;  %1654 = vmatprep.subr.bf16.mxu0 (!%p412_p2), %v1801_v29  ;;  %vm1802_vm1 = vmmov (!%p412_p2), 0   ;;  %s1803_s28 = smov (!%p412_p2), 64   ;;  %s1804_s16 = smov (!%p412_p2), 112   ;;  %vm609_vm2 = vcmask (!%p412_p2), 130048  }
   0xa   : > { %v510_v30 = vsub.s32 (!%p412_p2), 0, %v1939_v28  ;;  %v506_v31 = vld [vmem:[%s2153_s5] sm:$0x3] (!%p412_p2)  ;;  %1656 = vmatprep.mubr.msk.bf16.mxu0 (!%p412_p2), %vm1802_vm1, %v1801_v29  ;;  %s1805_s17 = smov (!%p412_p2), 48   ;;  %s1807_s19 = smov (!%p412_p2), 96   ;;  %v514_v41 = vsub.s32 (!%p412_p2), 1, %v1939_v28 }
   0xb   : > { %564 = vmatpush1.bf16.msra.mxu1 (!%p412_p2), %v1725_v11  ;;  %s1808_s20 = smov (!%p412_p2), 16   ;;  %s1809_s21 = smov (!%p412_p2), 80   ;;  %vm673_vm3 = vcmask (!%p412_p2), 1043456   ;;  %v605_v57 = vld [vmem:[%s2149_s1] sm:$0xff] (!%p412_p2)  ;;  %vm656_vm4 = vcmask (!%p412_p2), 64512   ;;  %vm1062_vm5 = vcmask (!%p412_p2), 261120  }
   0xc   : > { %565 = vmatprep.subr.bf16.mxu1 (!%p412_p2), %v1726_v13  ;;  %v511_v32 = vrot.slane (!%p412_p2), %v506_v31, %v510_v30  ;;  %v515_v42 = vrot.slane (!%p412_p2), %v506_v31, %v514_v41  ;;  %vm1064_vm6 = vcmask (!%p412_p2), 392192   ;;  %vm1480_vm7 = vcmask (!%p412_p2), 519168  }
   0xd   : > { %s2164_s30 = smov (!%p455_p3, %s1535_s30), 2 }
   0xe   : > { %s1540_s15 = sshll.u32 %s2164_s30, 2 }
   0xf   : > { %s458_s18 = scalar_lea.vmem %s2148_s0, %s1540_s15  ;;  %566 = vmatpush1.bf16.msra.mxu1 %v1728_v14  ;;  %s462_s27 = scalar_lea.vmem %s2162_s14, %s1540_s15 }
  0x10   : > { %v464_v0 = vld [vmem:[%s458_s18] sm:$0xf]  ;;  %567 = vmatprep.subr.bf16.mxu1 %v1729_v15  ;;  %s1806_s18 = smov 32  }
  0x11   : > { %v1901_v1 = vunpack.c.l.bf16 %v464_v0 }
  0x13   : > { %v469_v2 = vsel %vm468_vm0, %v1901_v1, 0.0  ;;  %568 = vmatpush1.bf16.msra.mxu1 %v1731_v16 }
  0x14   : > { %470 = vadd.xlane.f32.xlu0 %v469_v2  ;;  %1642 = vmatprep.subr.bf16.mxu1 %v1801_v29 }
  0xa1   : > { %v471_v3 = vpop.xlane.xlu0 %470 }
  0xa2   : > { %v473_v4 = vmul.f32 0.015625, %v471_v3 }
  0xa4   : > { %v474_v5 = vsub.f32 %v1901_v1, %v473_v4 }
  0xa6   : > { %v475_v6 = vmul.f32 %v474_v5, %v474_v5 }
  0xa8   : > { %v476_v7 = vsel %vm468_vm0, %v475_v6, 0.0 }
  0xa9   : > { %477 = vadd.xlane.f32.xlu0 %v476_v7 }
 0x136   : > { %v478_v17 = vpop.xlane.xlu0 %477 }
 0x137   : > { %v479_v18 = vmul.f32 0.015625, %v478_v17 }
 0x139   : > { %v480_v19 = vadd.f32 1e-05, %v479_v18 }
 0x13b   : > { %1764 = vrsqrt.f32 %v480_v19 }
 0x145   : > { %v1765_v20 = vpop.eup %1764 }
 0x146   : > { %v482_v22 = vmul.f32 %v1765_v20, %v474_v5 }
 0x148   : > { %v489_v24 = vmul.f32 %v1542_v21, %v482_v22 }
 0x14a   : > { %v496_v25 = vadd.f32 %v1543_v23, %v489_v24 }
 0x14c   : > { %v505_v26 = vpack.c.bf16 %v496_v25, %v496_v25 }
 0x14e   : > { %1552 = vmatmul.mubr.msk.bf16.vlgmr.msra.gmra.mrb[0].mxu1 %vm468_vm0, %v505_v26 }
 0x14f   : > { %1644 = vmatprep.mubr.msk.bf16.mxu1 %vm1802_vm1, %v1801_v29 }
 0x221   : > { %v595_v33 = vpop.f32.mrb[0].mxu1 }
 0x222   : > { %v596_v34 = vadd.f32 %v595_v33, %v511_v32  ;;  %v597_v35 = vpop.f32.mrb[1].mxu1 }
 0x223   : > { %v599_v36 = vpop.f32.mrb[2].mxu1  ;;  %v598_v44 = vadd.f32 %v597_v35, %v515_v42 }
 0x224   : > { %v602_v37 = vmul.f32 0.25, %v596_v34  ;;  %v604_v38 = vpack.c.bf16 %v596_v34, %v596_v34  ;;  %v600_v39 = vpop.f32.mrb[3].mxu1 }
 0x225   : > { %v1964_v47 = vpack.c.bf16 %v598_v44, %v598_v44 }
 0x226   : > { %v603_v40 = vpack.c.bf16 %v602_v37, %v602_v37  ;;  %607 = vrot.lane.b32.xlu1 %v604_v38, %s1803_s28 }
 0x227   : > { %v675_v50 = vsel %vm673_vm3, %v1964_v47, 0 }
 0x228   : > { %718 = vrot.lane.b32.xlu0 %v603_v40, %s1804_s16 }
 0x22a   : > { %720 = vrot.lane.b32.xlu1 %v604_v38, %s1805_s17 }
 0x22e   : > { %831 = vrot.lane.b32.xlu1 %v604_v38, %s1806_s18 }
 0x232   : > { %829 = vrot.lane.b32.xlu1 %v603_v40, %s1807_s19 }
 0x236   : > { %941 = vrot.lane.b32.xlu1 %v604_v38, %s1808_s20 }
 0x23a   : > { %939 = vrot.lane.b32.xlu1 %v603_v40, %s1809_s21 }
 0x298   : > { %v608_v43 = vpop.permute.xlu1 %607 }
 0x299   : > { %v614_v45 = vsel %vm609_vm2, %v608_v43, 0 }
 0x29a   : > { %1643 = vmatpush3.bf16.xpose.msra.mxu1 %v614_v45  ;;  %v719_v51 = vpop.permute.xlu0 %718 }
 0x29b   : > { %1648 = vmatprep.subr.bf16.mxu1 %v1801_v29 }
 0x29c   : > { %v721_v46 = vpop.permute.xlu1 %720 }
 0x29d   : > { %v726_v48 = vsel %vm609_vm2, %v721_v46, 0 }
 0x29e   : > { %1655 = vmatpush3.bf16.xpose.msra.mxu0 %v726_v48 }
 0x29f   : > { %1666 = vmatprep.subr.bf16.mxu0 %v1801_v29 }
 0x2a0   : > { %v832_v49 = vpop.permute.xlu1 %831 }
 0x2a1   : > { %1645 = vmatmul.mubr.msk.bf16.vlgmr.msra.gmra.mrb[4].mxu1 %vm609_vm2, %v603_v40  ;;  %v837_v53 = vsel %vm609_vm2, %v832_v49, 0 }
 0x2a2   : > { %1649 = vmatpush3.bf16.msra.mxu1 %v675_v50  ;;  %1650 = vmatprep.mubr.msk.bf16.mxu1 %vm1802_vm1, %v1801_v29 }
 0x2a3   : > { %1660 = vmatprep.subr.bf16.mxu1 %v1801_v29 }
 0x2a4   : > { %v830_v52 = vpop.permute.xlu1 %829 }
 0x2a5   : > { %1657 = vmatmul.mubr.msk.bf16.vlgmr.msra.gmra.mrb[0].mxu0 %vm609_vm2, %v719_v51 }
 0x2a6   : > { %1667 = vmatpush3.bf16.xpose.msra.mxu0 %v837_v53  ;;  %1668 = vmatprep.mubr.msk.bf16.mxu0 %vm1802_vm1, %v1801_v29 }
 0x2a7   : > { %1678 = vmatprep.subr.bf16.mxu0 %v1801_v29 }
 0x2a8   : > { %v942_v54 = vpop.permute.xlu1 %941 }
 0x2a9   : > { %v947_v55 = vsel %vm609_vm2, %v942_v54, 0 }
 0x2ac   : > { %v940_v56 = vpop.permute.xlu1 %939 }
 0x2ad   : > { %1669 = vmatmul.mubr.msk.bf16.vlgmr.msra.gmra.mrb[4].mxu0 %vm609_vm2, %v830_v52 }
 0x2ae   : > { %1679 = vmatpush3.bf16.xpose.msra.mxu0 %v947_v55  ;;  %1680 = vmatprep.mubr.msk.bf16.mxu0 %vm1802_vm1, %v1801_v29 }
 0x2af   : > { %1690 = vmatprep.subr.bf16.mxu0 %v1801_v29 }
 0x2b5   : > { %1681 = vmatmul.mubr.msk.bf16.vlgmr.msra.gmra.mrb[8].mxu0 %vm609_vm2, %v940_v56 }
 0x2b6   : > { %1698 = vmatprep.mubr.msk.bf16.mxu0 %vm1802_vm1, %v1801_v29 }
 0x374   : > { %v650_v58 = vpop.f32.mrb[4].mxu1 }
 0x375   : > { %v651_v59 = vadd.f32 %v650_v58, %v605_v57  ;;  %v1646_v60 = vpop.f32.mrb[5].mxu1 }
 0x376   : > { %v653_v61 = vpop.f32.mrb[6].mxu1 }
 0x377   : > { %v1647_v62 = vpop.f32.mrb[7].mxu1  ;;  %v657_v63 = vsel %vm656_vm4, %v651_v59, -inf }
 0x378   : > { %v762_v0 = vpop.f32.mrb[0].mxu0  ;;  %658 = vmax.xlane.f32.xlu1 %v657_v63 }
 0x379   : > { %v763_v2 = vadd.f32 %v762_v0, %v605_v57  ;;  %v1658_v3 = vpop.f32.mrb[1].mxu0 }
 0x37a   : > { %v765_v4 = vpop.f32.mrb[2].mxu0  ;;  %v1732_v3 = vld [vmem:[%s2154_s6] sm:$0xff]  }
 0x37b   : > { %v1659_v5 = vpop.f32.mrb[3].mxu0  ;;  %v768_v6 = vsel %vm656_vm4, %v763_v2, -inf  ;;  %1691 = vmatpush3.bf16.msra.mxu0 %v1732_v3  ;;  %v1751_v3 = vld [vmem:[%s2160_s12 + $0x8] sm:$0xff]  }
 0x37c   : > { %769 = vmax.xlane.f32.xlu0 %v768_v6  ;;  %1692 = vmatprep.subr.bf16.mxu0 %v1801_v29 }
 0x380   : > { %v873_v7 = vpop.f32.mrb[4].mxu0 }
 0x381   : > { %v874_v8 = vadd.f32 %v873_v7, %v605_v57  ;;  %v1670_v9 = vpop.f32.mrb[5].mxu0 }
 0x382   : > { %v876_v10 = vpop.f32.mrb[6].mxu0 }
 0x383   : > { %v1671_v11 = vpop.f32.mrb[7].mxu0  ;;  %v879_v13 = vsel %vm656_vm4, %v874_v8, -inf }
 0x384   : > { %880 = vmax.xlane.f32.xlu1 %v879_v13  ;;  %v1734_v13 = vld [vmem:[%s2154_s6 + $0x10] sm:$0xff]  }
 0x388   : > { %v983_v14 = vpop.f32.mrb[8].mxu0 }
 0x389   : > { %v984_v15 = vadd.f32 %v983_v14, %v605_v57  ;;  %v1682_v16 = vpop.f32.mrb[9].mxu0  ;;  %v1735_v14 = vld [vmem:[%s2154_s6 + $0x18] sm:$0xff]  }
 0x38a   : > { %v986_v17 = vpop.f32.mrb[10].mxu0 }
 0x38b   : > { %v1683_v18 = vpop.f32.mrb[11].mxu0  ;;  %v989_v19 = vsel %vm656_vm4, %v984_v15, -inf }
 0x38c   : > { %990 = vmax.xlane.f32.xlu0 %v989_v19 }
 0x405   : > { %v659_v20 = vpop.xlane.xlu1 %658 }
 0x406   : > { %v660_v21 = vsub.f32 %v651_v59, %v659_v20 }
 0x408   : > { %v661_v22 = vmul.f32 1.442695, %v660_v21 }
 0x409   : > { %v770_v23 = vpop.xlane.xlu0 %769 }
 0x40a   : > { %1766 = vpow2.f32 %v661_v22  ;;  %v771_v24 = vsub.f32 %v763_v2, %v770_v23 }
 0x40c   : > { %v772_v25 = vmul.f32 1.442695, %v771_v24 }
 0x40e   : > { %1768 = vpow2.f32 %v772_v25 }
 0x411   : > { %v881_v38 = vpop.xlane.xlu1 %880 }
 0x412   : > { %v882_v39 = vsub.f32 %v874_v8, %v881_v38 }
 0x414   : > { %v1767_v26 = vpop.eup %1766  ;;  %v883_v40 = vmul.f32 1.442695, %v882_v39 }
 0x415   : > { %v663_v27 = vsel %vm656_vm4, %v1767_v26, 0.0 }
 0x416   : > { %664 = vadd.xlane.f32.xlu1 %v663_v27 }
 0x418   : > { %v1769_v31 = vpop.eup %1768 }
 0x419   : > { %v991_v32 = vpop.xlane.xlu0 %990  ;;  %v774_v33 = vsel %vm656_vm4, %v1769_v31, 0.0 }
 0x41a   : > { %v992_v34 = vsub.f32 %v984_v15, %v991_v32  ;;  %775 = vadd.xlane.f32.xlu0 %v774_v33  ;;  %v1566_v33 = vld [vmem:[%s2155_s7] ss:$0 sm:$0xff] }
 0x41c   : > { %v993_v35 = vmul.f32 1.442695, %v992_v34 }
 0x41e   : > { %1770 = vpow2.f32 %v993_v35 }
 0x41f   : > { %1772 = vpow2.f32 %v883_v40 }
 0x427   : > { %781 = vrot.lane.b32.xlu1 %v1964_v47, %s1804_s16 }
 0x428   : > { %v1771_v36 = vpop.eup %1770 }
 0x429   : > { %v995_v37 = vsel %vm656_vm4, %v1771_v36, 0.0  ;;  %v1773_v42 = vpop.eup %1772 }
 0x42a   : > { %996 = vadd.xlane.f32.xlu0 %v995_v37  ;;  %v885_v43 = vsel %vm656_vm4, %v1773_v42, 0.0 }
 0x440   : > { %891 = vrot.lane.b32.xlu0 %v1964_v47, %s1807_s19 }
 0x44b   : > { %886 = vadd.xlane.f32.xlu1 %v885_v43 }
 0x45c   : > { %1001 = vrot.lane.b32.xlu1 %v1964_v47, %s1809_s21 }
 0x4a3   : > { %v665_v44 = vpop.xlane.xlu1 %664 }
 0x4a4   : > { %1774 = vrcp.f32 %v665_v44 }
 0x4a7   : > { %v776_v45 = vpop.xlane.xlu0 %775  ;;  %v782_v49 = vpop.permute.xlu1 %781 }
 0x4a8   : > { %1776 = vrcp.f32 %v776_v45  ;;  %v787_v52 = vsel %vm673_vm3, %v782_v49, 0  ;;  %v1739_v49 = vld [vmem:[%s2158_s10 + $0x10] ss:$8 sps:$4 sm:$0xff]  }
 0x4ae   : > { %v1775_v46 = vpop.eup %1774 }
 0x4af   : > { %v667_v48 = vmul.f32 %v1775_v46, %v1767_v26  ;;  %v1736_v46 = vld [vmem:[%s2158_s10] ss:$8 sps:$4 sm:$0xff]  }
 0x4b1   : > { %v668_v50 = vpack.c.bf16 %v667_v48, %v667_v48  ;;  %v1741_v48 = vld [vmem:[%s2158_s10 + $0x14] ss:$8 sps:$4 sm:$0xff]  }
 0x4b2   : > { %v1777_v51 = vpop.eup %1776 }
 0x4b3   : > { %1651 = vmatmul.mubr.msk.bf16.vlgmr.msra.gmra.mrb[8].mxu1 %vm656_vm4, %v668_v50  ;;  %v778_v53 = vmul.f32 %v1777_v51, %v1769_v31  ;;  %v1744_v50 = vld [vmem:[%s2158_s10 + $0x24] ss:$8 sps:$4 sm:$0xff]   ;;  %v1742_v51 = vld [vmem:[%s2158_s10 + $0x20] ss:$8 sps:$4 sm:$0xff]  }
 0x4b4   : > { %1661 = vmatpush3.bf16.msra.mxu1 %v787_v52  ;;  %1662 = vmatprep.mubr.msk.bf16.mxu1 %vm1802_vm1, %v1801_v29  ;;  %v1745_v52 = vld [vmem:[%s2158_s10 + $0x30] ss:$8 sps:$4 sm:$0xff]  }
 0x4b5   : > { %1672 = vmatprep.subr.bf16.mxu1 %v1801_v29  ;;  %v779_v54 = vpack.c.bf16 %v778_v53, %v778_v53  ;;  %v1747_v53 = vld [vmem:[%s2158_s10 + $0x34] ss:$8 sps:$4 sm:$0xff]  }
 0x4b7   : > { %v997_v47 = vpop.xlane.xlu0 %996 }
 0x4bb   : > { %v892_v55 = vpop.permute.xlu0 %891  ;;  %1663 = vmatmul.mubr.msk.bf16.vlgmr.msra.gmra.mrb[12].mxu1 %vm656_vm4, %v779_v54 }
 0x4bc   : > { %v897_v56 = vsel %vm673_vm3, %v892_v55, 0  ;;  %1674 = vmatprep.mubr.msk.bf16.mxu1 %vm1802_vm1, %v1801_v29 }
 0x4bd   : > { %1673 = vmatpush3.bf16.msra.mxu1 %v897_v56 }
 0x4be   : > { %1684 = vmatprep.subr.bf16.mxu1 %v1801_v29 }
 0x4d8   : > { %v887_v57 = vpop.xlane.xlu1 %886 }
 0x4d9   : > { %1778 = vrcp.f32 %v887_v57  ;;  %v1567_v57 = vld [vmem:[%s2156_s8] ss:$0 sm:$0xff] }
 0x4da   : > { %1780 = vrcp.f32 %v997_v47 }
 0x4dc   : > { %v1002_v60 = vpop.permute.xlu1 %1001 }
 0x4dd   : > { %v1007_v63 = vsel %vm673_vm3, %v1002_v60, 0 }
 0x4e3   : > { %v1779_v58 = vpop.eup %1778 }
 0x4e4   : > { %v889_v59 = vmul.f32 %v1779_v58, %v1773_v42  ;;  %v1781_v62 = vpop.eup %1780 }
 0x4e5   : > { %v999_v0 = vmul.f32 %v1781_v62, %v1771_v36 }
 0x4e6   : > { %v890_v61 = vpack.c.bf16 %v889_v59, %v889_v59  ;;  %v1568_v59 = vld [vmem:[%s2157_s9] ss:$0 sm:$0xff] }
 0x4e7   : > { %v1000_v2 = vpack.c.bf16 %v999_v0, %v999_v0  ;;  %v1749_v0 = vld [vmem:[%s2160_s12] sm:$0xff]  }
 0x4e8   : > { %1675 = vmatmul.mubr.msk.bf16.vlgmr.msra.gmra.mrb[16].mxu1 %vm656_vm4, %v890_v61 }
 0x4e9   : > { %1685 = vmatpush3.bf16.msra.mxu1 %v1007_v63  ;;  %1686 = vmatprep.mubr.msk.bf16.mxu1 %vm1802_vm1, %v1801_v29  ;;  %v1748_v63 = vld [vmem:[%s2160_s12 + $0x40] sm:$0xff]  }
 0x4f0   : > { %1687 = vmatmul.mubr.msk.bf16.vlgmr.msra.gmra.mrb[20].mxu1 %vm656_vm4, %v1000_v2  ;;  %v1750_v2 = vld [vmem:[%s2160_s12 + $0x48] sm:$0xff]  }
 0x4f1   : > { %1276 = vmatprep.mubr.bf16.mxu1 %v1800_v12  ;;  %v1733_v12 = vld [vmem:[%s2154_s6 + $0x8] sm:$0xff]  }
 0x4f2   : > { %1693 = vmatpush3.bf16.msra.mxu0 %v1733_v12  ;;  %v1760_v12 = vld [vmem:[%s2160_s12 + $0x70] sm:$0xff]  }
 0x4f3   : > { %1694 = vmatprep.subr.bf16.mxu0 %v1801_v29 }
 0x4f6   : > { %1695 = vmatpush3.bf16.msra.mxu0 %v1734_v13  ;;  %v1761_v13 = vld [vmem:[%s2160_s12 + $0x30] sm:$0xff]  }
 0x4f7   : > { %1696 = vmatprep.subr.bf16.mxu0 %v1801_v29 }
 0x4fa   : > { %1697 = vmatpush3.bf16.msra.mxu0 %v1735_v14  ;;  %v1762_v14 = vld [vmem:[%s2160_s12 + $0x78] sm:$0xff]  }
 0x4fb   : > { %1620 = vmatprep.subr.bf16.mxu0 %v1748_v63 }
 0x586   : > { %v711_v4 = vpop.f32.mrb[8].mxu1 }
 0x587   : > { %v1652_v5 = vpop.f32.mrb[9].mxu1 }
 0x588   : > { %v714_v6 = vpop.f32.mrb[10].mxu1  ;;  %v1753_v5 = vld [vmem:[%s2160_s12 + $0x10] sm:$0xff]  }
 0x589   : > { %v1653_v7 = vpop.f32.mrb[11].mxu1  ;;  %v1754_v6 = vld [vmem:[%s2160_s12 + $0x58] sm:$0xff]  }
 0x58a   : > { %v1755_v7 = vld [vmem:[%s2160_s12 + $0x18] sm:$0xff]  }
 0x58e   : > { %v823_v8 = vpop.f32.mrb[12].mxu1 }
 0x58f   : > { %1050 = vrot.lane.b32.xlu1 %v823_v8, %s1808_s20  ;;  %v1664_v9 = vpop.f32.mrb[13].mxu1  ;;  %v1756_v8 = vld [vmem:[%s2160_s12 + $0x60] sm:$0xff]  }
 0x590   : > { %v826_v10 = vpop.f32.mrb[14].mxu1  ;;  %v1757_v9 = vld [vmem:[%s2160_s12 + $0x20] sm:$0xff]  }
 0x591   : > { %v1665_v11 = vpop.f32.mrb[15].mxu1  ;;  %v1758_v10 = vld [vmem:[%s2160_s12 + $0x68] sm:$0xff]  }
 0x592   : > { %v1759_v11 = vld [vmem:[%s2160_s12 + $0x28] sm:$0xff]  }
 0x5bb   : > { %v933_v15 = vpop.f32.mrb[16].mxu1 }
 0x5bc   : > { %1054 = vrot.lane.b32.xlu0 %v933_v15, %s1806_s18  ;;  %v1676_v16 = vpop.f32.mrb[17].mxu1  ;;  %v1763_v15 = vld [vmem:[%s2160_s12 + $0x38] sm:$0xff]  }
 0x5bd   : > { %v936_v17 = vpop.f32.mrb[18].mxu1  ;;  %v1189_v16 = vld [vmem:[%s2159_s11] sm:$0x3] }
 0x5be   : > { %v1677_v18 = vpop.f32.mrb[19].mxu1  ;;  %v1194_v17 = vrot.slane %v1189_v16, %v510_v30 }
 0x5bf   : > { %v1198_v18 = vrot.slane %v1189_v16, %v514_v41 }
 0x5c3   : > { %v1043_v19 = vpop.f32.mrb[20].mxu1 }
 0x5c4   : > { %1058 = vrot.lane.b32.xlu1 %v1043_v19, %s1805_s17  ;;  %v1688_v20 = vpop.f32.mrb[21].mxu1 }
 0x5c5   : > { %v1046_v21 = vpop.f32.mrb[22].mxu1 }
 0x5c6   : > { %v1689_v22 = vpop.f32.mrb[23].mxu1 }
 0x601   : > { %v1051_v23 = vpop.permute.xlu1 %1050 }
 0x602   : > { %v1061_v24 = vsel %vm609_vm2, %v711_v4, %v1051_v23  ;;  %v1752_v4 = vld [vmem:[%s2160_s12 + $0x50] sm:$0xff]  }
 0x62e   : > { %v1055_v29 = vpop.permute.xlu0 %1054 }
 0x62f   : > { %v1063_v25 = vsel %vm1062_vm5, %v1061_v24, %v1055_v29 }
 0x636   : > { %v1059_v26 = vpop.permute.xlu1 %1058 }
 0x637   : > { %v1065_v27 = vsel %vm1064_vm6, %v1063_v25, %v1059_v26 }
 0x638   : > { %v1074_v31 = vpack.c.bf16 %v1065_v27, %v1065_v27 }
 0x63a   : > { %1699 = vmatmul.mubr.msk.bf16.vlgmr.msra.gmra.mrb[12].mxu0 %vm468_vm0, %v1074_v31 }
 0x63b   : > { %1621 = vmatpush3.bf16.msra.mxu0 %v1749_v0 }
 0x63c   : > { %1622 = vmatprep.subr.bf16.mxu0 %v1750_v2 }
 0x63f   : > { %1623 = vmatpush3.bf16.msra.mxu0 %v1751_v3 }
 0x640   : > { %1624 = vmatprep.subr.bf16.mxu0 %v1752_v4 }
 0x643   : > { %1625 = vmatpush3.bf16.msra.mxu0 %v1753_v5 }
 0x644   : > { %1626 = vmatprep.subr.bf16.mxu0 %v1754_v6 }
 0x647   : > { %1627 = vmatpush3.bf16.msra.mxu0 %v1755_v7 }
 0x648   : > { %1628 = vmatprep.subr.bf16.mxu0 %v1756_v8 }
 0x64b   : > { %1629 = vmatpush3.bf16.msra.mxu0 %v1757_v9 }
 0x64c   : > { %1630 = vmatprep.subr.bf16.mxu0 %v1758_v10 }
 0x64f   : > { %1631 = vmatpush3.bf16.msra.mxu0 %v1759_v11 }
 0x650   : > { %1632 = vmatprep.subr.bf16.mxu0 %v1760_v12 }
 0x653   : > { %1633 = vmatpush3.bf16.msra.mxu0 %v1761_v13 }
 0x654   : > { %1634 = vmatprep.subr.bf16.mxu0 %v1762_v14 }
 0x657   : > { %1635 = vmatpush3.bf16.msra.mxu0 %v1763_v15 }
 0x70d   : > { %v1136_v32 = vpop.f32.mrb[12].mxu0 }
 0x70e   : > { %v1142_v34 = vadd.f32 %v1136_v32, %v1901_v1  ;;  %v1700_v35 = vpop.f32.mrb[13].mxu0  ;;  %v1738_v1 = vld [vmem:[%s2158_s10 + $0x4] ss:$8 sps:$4 sm:$0xff]  }
 0x70f   : > { %v1139_v36 = vpop.f32.mrb[14].mxu0  ;;  %1244 = vmatprep.subr.bf16.mxu1 %v1738_v1 }
 0x710   : > { %v2044_v37 = vadd.f32 %v1566_v33, %v1142_v34  ;;  %v1701_v38 = vpop.f32.mrb[15].mxu0  ;;  %1245 = vmatpush1.bf16.msra.mxu1 %v1736_v46 }
 0x711   : > { %1246 = vmatprep.subr.bf16.mxu1 %v1741_v48 }
 0x712   : > { %v1153_v39 = vsel %vm468_vm0, %v2044_v37, 0.0 }
 0x713   : > { %1154 = vadd.xlane.f32.xlu0 %v1153_v39 }
 0x714   : > { %1247 = vmatpush1.bf16.msra.mxu1 %v1739_v49 }
 0x715   : > { %1248 = vmatprep.subr.bf16.mxu1 %v1744_v50 }
 0x718   : > { %1249 = vmatpush1.bf16.msra.mxu1 %v1742_v51 }
 0x719   : > { %1250 = vmatprep.subr.bf16.mxu1 %v1747_v53 }
 0x71c   : > { %1251 = vmatpush1.bf16.msra.mxu1 %v1745_v52 }
 0x7a0   : > { %v1155_v40 = vpop.xlane.xlu0 %1154 }
 0x7a1   : > { %v1156_v42 = vmul.f32 0.015625, %v1155_v40  ;;  %v1580_v40 = vld [vmem:[%s2161_s13] ss:$0 sm:$0xff] }
 0x7a3   : > { %v1157_v43 = vsub.f32 %v2044_v37, %v1156_v42 }
 0x7a5   : > { %v1158_v44 = vmul.f32 %v1157_v43, %v1157_v43 }
 0x7a7   : > { %v1159_v45 = vsel %vm468_vm0, %v1158_v44, 0.0 }
 0x7a8   : > { %1160 = vadd.xlane.f32.xlu1 %v1159_v45 }
 0x835   : > { %v1161_v47 = vpop.xlane.xlu1 %1160 }
 0x836   : > { %v1162_v54 = vmul.f32 0.015625, %v1161_v47 }
 0x838   : > { %v1163_v55 = vadd.f32 1e-05, %v1162_v54 }
 0x83a   : > { %1782 = vrsqrt.f32 %v1163_v55 }
 0x844   : > { %v1783_v56 = vpop.eup %1782 }
 0x845   : > { %v1165_v58 = vmul.f32 %v1783_v56, %v1157_v43 }
 0x847   : > { %v1172_v60 = vmul.f32 %v1567_v57, %v1165_v58 }
 0x849   : > { %v1179_v61 = vadd.f32 %v1568_v59, %v1172_v60 }
 0x84b   : > { %v1188_v62 = vpack.c.bf16 %v1179_v61, %v1179_v61 }
 0x84d   : > { %1577 = vmatmul.mubr.msk.bf16.vlgmr.msra.gmra.mrb[24].mxu1 %vm468_vm0, %v1188_v62 }
 0x920   : > { %v1278_v19 = vpop.f32.mrb[24].mxu1 }
 0x921   : > { %v1279_v20 = vadd.f32 %v1278_v19, %v1194_v17  ;;  %v1280_v21 = vpop.f32.mrb[25].mxu1 }
 0x922   : > { %v1281_v22 = vadd.f32 %v1280_v21, %v1198_v18  ;;  %v1282_v23 = vpop.f32.mrb[26].mxu1 }
 0x923   : > { %v1578_v29 = vmul.f32 -1.702, %v1279_v20  ;;  %v1283_v24 = vpop.f32.mrb[27].mxu1 }
 0x924   : > { %v1579_v25 = vmul.f32 -1.702, %v1281_v22 }
 0x925   : > { %v1289_v26 = vmul.f32 1.442695, %v1578_v29 }
 0x926   : > { %v1291_v27 = vmul.f32 1.442695, %v1579_v25 }
 0x927   : > { %1784 = vpow2.f32 %v1289_v26 }
 0x928   : > { %1786 = vpow2.f32 %v1291_v27 }
 0x931   : > { %v1785_v31 = vpop.eup %1784 }
 0x932   : > { %v1787_v32 = vpop.eup %1786  ;;  %v1293_v33 = vadd.f32 1.0, %v1785_v31 }
 0x933   : > { %v1294_v34 = vadd.f32 1.0, %v1787_v32 }
 0x934   : > { %1788 = vrcp.f32 %v1293_v33 }
 0x935   : > { %1790 = vrcp.f32 %v1294_v34 }
 0x93e   : > { %v1789_v28 = vpop.eup %1788 }
 0x93f   : > { %v1791_v30 = vpop.eup %1790  ;;  %v1299_v41 = vmul.f32 %v1789_v28, %v1279_v20 }
 0x940   : > { %v1300_v35 = vmul.f32 %v1791_v30, %v1281_v22 }
 0x941   : > { %v1333_v38 = vpack.c.bf16 %v1299_v41, %v1299_v41 }
 0x942   : > { %v1334_v36 = vpack.c.bf16 %v1300_v35, %v1300_v35 }
 0x944   : > { %1470 = vmatprep.mubr.bf16.mxu0 %v1334_v36 }
 0x945   : > { %1471 = vmatmul.mubr.bf16.vlgmr.msra.gmra.mrb[16].mxu0 %v1333_v38 }
 0xa18   : > { %v1636_v39 = vpop.f32.mrb[16].mxu0 }
 0xa19   : > { %v1637_v42 = vpop.f32.mrb[17].mxu0 }
 0xa1a   : > { %v1638_v43 = vadd.f32 %v1637_v42, %v1636_v39  ;;  %v1639_v44 = vpop.f32.mrb[18].mxu0 }
 0xa1b   : > { %v1640_v45 = vpop.f32.mrb[19].mxu0 }
 0xa1c   : > { %v1473_v1 = vadd.f32 %v1638_v43, %v1580_v40 }
 0xa1e   : > { %v1478_v46 = vadd.f32 %v1473_v1, %v2044_v37 }
 0xa20   : > { %v1479_v48 = vpack.c.bf16 %v1478_v46, %v1478_v46 }
 0xa22   : > { %1481 = vst.msk [vmem:[%s462_s27] sm:$0xf] %vm1480_vm7, %v1479_v48 }
 0xa23 PF: > { %s24_s29 = sadd.s32 1, %s1798_s29  }
 0xa24   : > { %p21_p4 = scmp.ge.s32.totalorder %s24_s29, 5  }
 0xa26   :  { %23 = sbr.rel (!%p21_p4) target bundleno = 1 (0x1), region = 106 }

// kernel: _lambda_.13
= control target key start
LH: loop header
LB: loop body
LE: loop exit
PB: predicated region body
PF: predicated region fallthrough
CT: control target
= control target key end

     0   :  { %s1925_s18 = smov 0   ;;  %s2193_s0 = inlined_call_operand.vmem [shape: bf16[3,8,64], index: 0, kind: input, shape index: {}]   ;;  %s2194_s1 = inlined_call_operand.vmem [shape: f32[8,8], index: 1, kind: input, shape index: {}]   ;;  %s2195_s2 = inlined_call_operand.vmem [shape: bf16[8,64], index: 2, kind: input, shape index: {}]   ;;  %s2196_s3 = inlined_call_operand.vmem [shape: f32[1,64], index: 3, kind: input, shape index: {}, may-alias: {3,9}]   ;;  %s2197_s4 = inlined_call_operand.vmem [shape: f32[1,64], index: 4, kind: input, shape index: {}, may-alias: {4,8,10,14}]   ;;  %s2198_s5 = inlined_call_operand.vmem [shape: bf16[64,192], index: 5, kind: input, shape index: {}]   ;;  %s2199_s6 = inlined_call_operand.vmem [shape: f32[1,192], index: 6, kind: input, shape index: {}]   ;;  %s2200_s7 = inlined_call_operand.vmem [shape: bf16[64,64], index: 7, kind: input, shape index: {}]   ;;  %s2201_s8 = inlined_call_operand.vmem [shape: f32[1,64], index: 8, kind: input, shape index: {}, may-alias: {4,8,10,14}]   ;;  %s2202_s9 = inlined_call_operand.vmem [shape: f32[1,64], index: 9, kind: input, shape index: {}, may-alias: {3,9}]   ;;  %s2203_s10 = inlined_call_operand.vmem [shape: f32[1,64], index: 10, kind: input, shape index: {}, may-alias: {4,8,10,14}]   ;;  %s2204_s11 = inlined_call_operand.vmem [shape: bf16[64,256], index: 11, kind: input, shape index: {}]   ;;  %s2205_s12 = inlined_call_operand.vmem [shape: f32[1,256], index: 12, kind: input, shape index: {}]   ;;  %s2206_s13 = inlined_call_operand.vmem [shape: bf16[256,64], index: 13, kind: input, shape index: {}]   ;;  %s2207_s14 = inlined_call_operand.vmem [shape: f32[1,64], index: 14, kind: input, shape index: {}, may-alias: {4,8,10,14}]   ;;  %s2208_s15 = inlined_call_operand.vmem [shape: bf16[3,8,64], index: 15, kind: output, shape index: {}]  }
   0x1 LB: > { %s1570_s19 = sadd.s32 4294967295, %s1833_s18   ;;  %p1574_p0 = scmp.ge.s32.totalorder %s1833_s18, 1  ;;  %s1833_s18 = sphi %s1925_s18, %s25_s18  }
   0x2   : > { %p436_p1 = scmp.lt.s32.totalorder %s1833_s18, 4 }
   0x4   : > { %p437_p2 = pnand %p1574_p0, %p436_p1 }
   0x5   : > { %p482_p3 = scmp.lt.s32.totalorder (!%p437_p2), %s1570_s19, 2  ;;  %v493_v0 = vlaneseq (!%p437_p2)  ;;  %v498_v1 = vld [vmem:[%s2195_s2] sm:$0xf] (!%p437_p2)  ;;  %vm503_vm3 = vcmask (!%p437_p2), 523264   ;;  %v1755_v13 = vld [vmem:[%s2198_s5 + $0x4] ss:$8 sps:$4 sm:$0xff] (!%p437_p2)  }
   0x6   : > { %440 = sbr.rel (%p437_p2) target bundleno = 2596 (0xa24), region = 80  ;;  %v499_v3 = vunpack.c.l.bf16 (!%p437_p2), %v498_v1  ;;  %v1757_v14 = vld [vmem:[%s2198_s5] ss:$8 sps:$4 sm:$0xff] (!%p437_p2)   ;;  %v1758_v15 = vld [vmem:[%s2198_s5 + $0x14] ss:$8 sps:$4 sm:$0xff] (!%p437_p2)   ;;  %596 = vmatprep.subr.bf16.mxu1 (!%p437_p2), %v1755_v13  ;;  %v1835_v17 = vmov (!%p437_p2), 0  }
   0x7   : > { %v1938_v2 = vshrl.u32 (!%p437_p2), %v493_v0, 7  ;;  %597 = vmatpush1.bf16.msra.mxu1 (!%p437_p2), %v1757_v14  ;;  %v1760_v16 = vld [vmem:[%s2198_s5 + $0x10] ss:$8 sps:$4 sm:$0xff] (!%p437_p2)   ;;  %628 = vmatprep.mubr.bf16.mxu1 (!%p437_p2), %v1835_v17  ;;  %v1761_v18 = vld [vmem:[%s2198_s5 + $0x24] ss:$8 sps:$4 sm:$0xff] (!%p437_p2)   ;;  %v1836_v32 = vmov (!%p437_p2), 0.0  }
   0x8   : > { %598 = vmatprep.subr.bf16.mxu1 (!%p437_p2), %v1758_v15  ;;  %v1763_v19 = vld [vmem:[%s2198_s5 + $0x20] ss:$8 sps:$4 sm:$0xff] (!%p437_p2)   ;;  %v1764_v20 = vld [vmem:[%s2198_s5 + $0x34] ss:$8 sps:$4 sm:$0xff] (!%p437_p2)   ;;  %v1766_v21 = vld [vmem:[%s2198_s5 + $0x30] ss:$8 sps:$4 sm:$0xff] (!%p437_p2)   ;;  %1689 = vmatprep.subr.bf16.mxu0 (!%p437_p2), %v1836_v32 }
   0x9   : > { %vm495_vm0 = vcmp.ge.s32.totalorder (!%p437_p2), %v1938_v2, 1  ;;  %vm496_vm1 = vcmp.lt.s32.totalorder (!%p437_p2), %v1938_v2, 3  ;;  %v1577_v26 = vld [vmem:[%s2196_s3] ss:$0 sm:$0xff] (!%p437_p2)  ;;  %v545_v33 = vsub.s32 (!%p437_p2), 0, %v1938_v2  ;;  %vm1837_vm4 = vmmov (!%p437_p2), 0  }
   0xa   : > { %vm497_vm2 = vmand (!%p437_p2), %vm495_vm0, %vm496_vm1  ;;  %v1578_v28 = vld [vmem:[%s2197_s4] ss:$0 sm:$0xff] (!%p437_p2)  ;;  %1691 = vmatprep.mubr.msk.bf16.mxu0 (!%p437_p2), %vm1837_vm4, %v1836_v32  ;;  %s1838_s24 = smov (!%p437_p2), 64   ;;  %s1840_s26 = smov (!%p437_p2), 48   ;;  %v549_v44 = vsub.s32 (!%p437_p2), 1, %v1938_v2  ;;  %vm644_vm5 = vcmask (!%p437_p2), 130048  }
   0xb   : > { %599 = vmatpush1.bf16.msra.mxu1 (!%p437_p2), %v1760_v16  ;;  %v541_v34 = vld [vmem:[%s2199_s6] sm:$0x3] (!%p437_p2)  ;;  %s1841_s27 = smov (!%p437_p2), 32   ;;  %s1842_s28 = smov (!%p437_p2), 96   ;;  %vm708_vm6 = vcmask (!%p437_p2), 1043456   ;;  %vm691_vm7 = vcmask (!%p437_p2), 64512  }
   0xc   : > { %600 = vmatprep.subr.bf16.mxu1 (!%p437_p2), %v1761_v18  ;;  %v546_v35 = vrot.slane (!%p437_p2), %v541_v34, %v545_v33  ;;  %s1843_s29 = smov (!%p437_p2), 16   ;;  %s1844_s30 = smov (!%p437_p2), 80   ;;  %v550_v45 = vrot.slane (!%p437_p2), %v541_v34, %v549_v44  ;;  %v640_v60 = vld [vmem:[%s2194_s1] sm:$0xff] (!%p437_p2)  ;;  %vm1097_vm8 = vcmask (!%p437_p2), 261120   ;;  %vm1099_vm9 = vcmask (!%p437_p2), 392192  }
   0xd   : > { %s2210_s19 = smov (!%p482_p3, %s1570_s19), 2  ;;  %vm1515_vm10 = vcmask 519168  }
   0xe   : > { %s1575_s22 = sshll.u32 %s2210_s19, 2 }
   0xf   : > { %s485_s25 = scalar_lea.vmem %s2193_s0, %s1575_s22  ;;  %601 = vmatpush1.bf16.msra.mxu1 %v1763_v19 }
  0x10   : > { %v491_v4 = vld [vmem:[%s485_s25] sm:$0xf]  ;;  %602 = vmatprep.subr.bf16.mxu1 %v1764_v20  ;;  %s1839_s25 = smov 112  }
  0x11   : > { %v492_v5 = vunpack.c.l.bf16 %v491_v4 }
  0x13   : > { %v1948_v6 = vsel %vm497_vm2, %v499_v3, %v492_v5  ;;  %603 = vmatpush1.bf16.msra.mxu1 %v1766_v21 }
  0x14   : > { %v504_v7 = vsel %vm503_vm3, %v1948_v6, 0.0  ;;  %1677 = vmatprep.subr.bf16.mxu1 %v1836_v32 }
  0x15   : > { %505 = vadd.xlane.f32.xlu0 %v504_v7 }
  0xa2   : > { %v506_v8 = vpop.xlane.xlu0 %505 }
  0xa3   : > { %v508_v9 = vmul.f32 0.015625, %v506_v8 }
  0xa5   : > { %v509_v10 = vsub.f32 %v1948_v6, %v508_v9 }
  0xa7   : > { %v510_v11 = vmul.f32 %v509_v10, %v509_v10 }
  0xa9   : > { %v511_v12 = vsel %vm503_vm3, %v510_v11, 0.0 }
  0xaa   : > { %512 = vadd.xlane.f32.xlu0 %v511_v12 }
 0x137   : > { %v513_v22 = vpop.xlane.xlu0 %512 }
 0x138   : > { %v514_v23 = vmul.f32 0.015625, %v513_v22 }
 0x13a   : > { %v515_v24 = vadd.f32 1e-05, %v514_v23 }
 0x13c   : > { %1799 = vrsqrt.f32 %v515_v24 }
 0x146   : > { %v1800_v25 = vpop.eup %1799 }
 0x147   : > { %v517_v27 = vmul.f32 %v1800_v25, %v509_v10 }
 0x149   : > { %v524_v29 = vmul.f32 %v1577_v26, %v517_v27 }
 0x14b   : > { %v531_v30 = vadd.f32 %v1578_v28, %v524_v29 }
 0x14d   : > { %v540_v31 = vpack.c.bf16 %v531_v30, %v531_v30 }
 0x14f   : > { %1587 = vmatmul.mubr.msk.bf16.vlgmr.msra.gmra.mrb[0].mxu1 %vm503_vm3, %v540_v31 }
 0x150   : > { %1679 = vmatprep.mubr.msk.bf16.mxu1 %vm1837_vm4, %v1836_v32 }
 0x222   : > { %v630_v36 = vpop.f32.mrb[0].mxu1 }
 0x223   : > { %v631_v37 = vadd.f32 %v630_v36, %v546_v35  ;;  %v632_v38 = vpop.f32.mrb[1].mxu1 }
 0x224   : > { %v634_v39 = vpop.f32.mrb[2].mxu1  ;;  %v633_v47 = vadd.f32 %v632_v38, %v550_v45 }
 0x225   : > { %v637_v40 = vmul.f32 0.25, %v631_v37  ;;  %v639_v41 = vpack.c.bf16 %v631_v37, %v631_v37  ;;  %v635_v42 = vpop.f32.mrb[3].mxu1 }
 0x226   : > { %v2009_v50 = vpack.c.bf16 %v633_v47, %v633_v47 }
 0x227   : > { %v638_v43 = vpack.c.bf16 %v637_v40, %v637_v40  ;;  %642 = vrot.lane.b32.xlu1 %v639_v41, %s1838_s24 }
 0x228   : > { %v710_v53 = vsel %vm708_vm6, %v2009_v50, 0 }
 0x229   : > { %753 = vrot.lane.b32.xlu0 %v638_v43, %s1839_s25 }
 0x22b   : > { %755 = vrot.lane.b32.xlu1 %v639_v41, %s1840_s26 }
 0x22f   : > { %866 = vrot.lane.b32.xlu1 %v639_v41, %s1841_s27 }
 0x233   : > { %864 = vrot.lane.b32.xlu1 %v638_v43, %s1842_s28 }
 0x237   : > { %976 = vrot.lane.b32.xlu1 %v639_v41, %s1843_s29 }
 0x23b   : > { %974 = vrot.lane.b32.xlu1 %v638_v43, %s1844_s30 }
 0x299   : > { %v643_v46 = vpop.permute.xlu1 %642 }
 0x29a   : > { %v649_v48 = vsel %vm644_vm5, %v643_v46, 0 }
 0x29b   : > { %1678 = vmatpush3.bf16.xpose.msra.mxu1 %v649_v48  ;;  %v754_v54 = vpop.permute.xlu0 %753 }
 0x29c   : > { %1683 = vmatprep.subr.bf16.mxu1 %v1836_v32 }
 0x29d   : > { %v756_v49 = vpop.permute.xlu1 %755 }
 0x29e   : > { %v761_v51 = vsel %vm644_vm5, %v756_v49, 0 }
 0x29f   : > { %1690 = vmatpush3.bf16.xpose.msra.mxu0 %v761_v51 }
 0x2a0   : > { %1701 = vmatprep.subr.bf16.mxu0 %v1836_v32 }
 0x2a1   : > { %v867_v52 = vpop.permute.xlu1 %866 }
 0x2a2   : > { %1680 = vmatmul.mubr.msk.bf16.vlgmr.msra.gmra.mrb[4].mxu1 %vm644_vm5, %v638_v43  ;;  %v872_v56 = vsel %vm644_vm5, %v867_v52, 0 }
 0x2a3   : > { %1684 = vmatpush3.bf16.msra.mxu1 %v710_v53  ;;  %1685 = vmatprep.mubr.msk.bf16.mxu1 %vm1837_vm4, %v1836_v32 }
 0x2a4   : > { %1695 = vmatprep.subr.bf16.mxu1 %v1836_v32 }
 0x2a5   : > { %v865_v55 = vpop.permute.xlu1 %864 }
 0x2a6   : > { %1692 = vmatmul.mubr.msk.bf16.vlgmr.msra.gmra.mrb[0].mxu0 %vm644_vm5, %v754_v54 }
 0x2a7   : > { %1702 = vmatpush3.bf16.xpose.msra.mxu0 %v872_v56  ;;  %1703 = vmatprep.mubr.msk.bf16.mxu0 %vm1837_vm4, %v1836_v32 }
 0x2a8   : > { %1713 = vmatprep.subr.bf16.mxu0 %v1836_v32 }
 0x2a9   : > { %v977_v57 = vpop.permute.xlu1 %976 }
 0x2aa   : > { %v982_v58 = vsel %vm644_vm5, %v977_v57, 0 }
 0x2ad   : > { %v975_v59 = vpop.permute.xlu1 %974 }
 0x2ae   : > { %1704 = vmatmul.mubr.msk.bf16.vlgmr.msra.gmra.mrb[4].mxu0 %vm644_vm5, %v865_v55 }
 0x2af   : > { %1714 = vmatpush3.bf16.xpose.msra.mxu0 %v982_v58  ;;  %1715 = vmatprep.mubr.msk.bf16.mxu0 %vm1837_vm4, %v1836_v32 }
 0x2b0   : > { %1725 = vmatprep.subr.bf16.mxu0 %v1836_v32 }
 0x2b6   : > { %1716 = vmatmul.mubr.msk.bf16.vlgmr.msra.gmra.mrb[8].mxu0 %vm644_vm5, %v975_v59 }
 0x2b7   : > { %1733 = vmatprep.mubr.msk.bf16.mxu0 %vm1837_vm4, %v1836_v32 }
 0x375   : > { %v685_v61 = vpop.f32.mrb[4].mxu1 }
 0x376   : > { %v686_v62 = vadd.f32 %v685_v61, %v640_v60  ;;  %v1681_v63 = vpop.f32.mrb[5].mxu1 }
 0x377   : > { %v688_v0 = vpop.f32.mrb[6].mxu1 }
 0x378   : > { %v1682_v1 = vpop.f32.mrb[7].mxu1  ;;  %v692_v3 = vsel %vm691_vm7, %v686_v62, -inf }
 0x379   : > { %v797_v4 = vpop.f32.mrb[0].mxu0  ;;  %693 = vmax.xlane.f32.xlu1 %v692_v3 }
 0x37a   : > { %v798_v5 = vadd.f32 %v797_v4, %v640_v60  ;;  %v1693_v7 = vpop.f32.mrb[1].mxu0 }
 0x37b   : > { %v800_v8 = vpop.f32.mrb[2].mxu0  ;;  %v1767_v7 = vld [vmem:[%s2200_s7] sm:$0xff]  }
 0x37c   : > { %v1694_v9 = vpop.f32.mrb[3].mxu0  ;;  %v803_v10 = vsel %vm691_vm7, %v798_v5, -inf  ;;  %1726 = vmatpush3.bf16.msra.mxu0 %v1767_v7  ;;  %v1786_v7 = vld [vmem:[%s2206_s13 + $0x8] sm:$0xff]  }
 0x37d   : > { %804 = vmax.xlane.f32.xlu0 %v803_v10  ;;  %1727 = vmatprep.subr.bf16.mxu0 %v1836_v32 }
 0x381   : > { %v908_v11 = vpop.f32.mrb[4].mxu0 }
 0x382   : > { %v909_v12 = vadd.f32 %v908_v11, %v640_v60  ;;  %v1705_v13 = vpop.f32.mrb[5].mxu0 }
 0x383   : > { %v911_v14 = vpop.f32.mrb[6].mxu0 }
 0x384   : > { %v1706_v15 = vpop.f32.mrb[7].mxu0  ;;  %v914_v16 = vsel %vm691_vm7, %v909_v12, -inf }
 0x385   : > { %915 = vmax.xlane.f32.xlu1 %v914_v16  ;;  %v1769_v16 = vld [vmem:[%s2200_s7 + $0x10] sm:$0xff]  }
 0x389   : > { %v1018_v18 = vpop.f32.mrb[8].mxu0 }
 0x38a   : > { %v1019_v19 = vadd.f32 %v1018_v18, %v640_v60  ;;  %v1717_v20 = vpop.f32.mrb[9].mxu0  ;;  %v1770_v18 = vld [vmem:[%s2200_s7 + $0x18] sm:$0xff]  }
 0x38b   : > { %v1021_v21 = vpop.f32.mrb[10].mxu0 }
 0x38c   : > { %v1718_v22 = vpop.f32.mrb[11].mxu0  ;;  %v1024_v23 = vsel %vm691_vm7, %v1019_v19, -inf }
 0x38d   : > { %1025 = vmax.xlane.f32.xlu0 %v1024_v23 }
 0x406   : > { %v694_v24 = vpop.xlane.xlu1 %693 }
 0x407   : > { %v695_v25 = vsub.f32 %v686_v62, %v694_v24 }
 0x409   : > { %v696_v26 = vmul.f32 1.442695, %v695_v25 }
 0x40a   : > { %v805_v27 = vpop.xlane.xlu0 %804 }
 0x40b   : > { %1801 = vpow2.f32 %v696_v26  ;;  %v806_v28 = vsub.f32 %v798_v5, %v805_v27 }
 0x40d   : > { %v807_v29 = vmul.f32 1.442695, %v806_v28 }
 0x40f   : > { %1803 = vpow2.f32 %v807_v29 }
 0x412   : > { %v916_v41 = vpop.xlane.xlu1 %915 }
 0x413   : > { %v917_v42 = vsub.f32 %v909_v12, %v916_v41 }
 0x415   : > { %v1802_v30 = vpop.eup %1801  ;;  %v918_v43 = vmul.f32 1.442695, %v917_v42 }
 0x416   : > { %v698_v31 = vsel %vm691_vm7, %v1802_v30, 0.0 }
 0x417   : > { %699 = vadd.xlane.f32.xlu1 %v698_v31 }
 0x419   : > { %v1804_v34 = vpop.eup %1803 }
 0x41a   : > { %v1026_v35 = vpop.xlane.xlu0 %1025  ;;  %v809_v36 = vsel %vm691_vm7, %v1804_v34, 0.0 }
 0x41b   : > { %v1027_v37 = vsub.f32 %v1019_v19, %v1026_v35  ;;  %810 = vadd.xlane.f32.xlu0 %v809_v36  ;;  %v1601_v36 = vld [vmem:[%s2201_s8] ss:$0 sm:$0xff] }
 0x41d   : > { %v1028_v38 = vmul.f32 1.442695, %v1027_v37 }
 0x41f   : > { %1805 = vpow2.f32 %v1028_v38 }
 0x420   : > { %1807 = vpow2.f32 %v918_v43 }
 0x428   : > { %816 = vrot.lane.b32.xlu1 %v2009_v50, %s1839_s25 }
 0x429   : > { %v1806_v39 = vpop.eup %1805 }
 0x42a   : > { %v1030_v40 = vsel %vm691_vm7, %v1806_v39, 0.0  ;;  %v1808_v45 = vpop.eup %1807 }
 0x42b   : > { %1031 = vadd.xlane.f32.xlu0 %v1030_v40  ;;  %v920_v46 = vsel %vm691_vm7, %v1808_v45, 0.0 }
 0x441   : > { %926 = vrot.lane.b32.xlu0 %v2009_v50, %s1842_s28 }
 0x44c   : > { %921 = vadd.xlane.f32.xlu1 %v920_v46 }
 0x45d   : > { %1036 = vrot.lane.b32.xlu1 %v2009_v50, %s1844_s30 }
 0x4a4   : > { %v700_v47 = vpop.xlane.xlu1 %699 }
 0x4a5   : > { %1809 = vrcp.f32 %v700_v47 }
 0x4a8   : > { %v811_v48 = vpop.xlane.xlu0 %810  ;;  %v817_v52 = vpop.permute.xlu1 %816 }
 0x4a9   : > { %1811 = vrcp.f32 %v811_v48  ;;  %v822_v55 = vsel %vm708_vm6, %v817_v52, 0  ;;  %v1774_v52 = vld [vmem:[%s2204_s11 + $0x10] ss:$8 sps:$4 sm:$0xff]  }
 0x4af   : > { %v1810_v49 = vpop.eup %1809 }
 0x4b0   : > { %v702_v51 = vmul.f32 %v1810_v49, %v1802_v30  ;;  %v1771_v49 = vld [vmem:[%s2204_s11] ss:$8 sps:$4 sm:$0xff]  }
 0x4b2   : > { %v703_v53 = vpack.c.bf16 %v702_v51, %v702_v51  ;;  %v1776_v51 = vld [vmem:[%s2204_s11 + $0x14] ss:$8 sps:$4 sm:$0xff]  }
 0x4b3   : > { %v1812_v54 = vpop.eup %1811 }
 0x4b4   : > { %1686 = vmatmul.mubr.msk.bf16.vlgmr.msra.gmra.mrb[8].mxu1 %vm691_vm7, %v703_v53  ;;  %v813_v56 = vmul.f32 %v1812_v54, %v1804_v34  ;;  %v1779_v53 = vld [vmem:[%s2204_s11 + $0x24] ss:$8 sps:$4 sm:$0xff]   ;;  %v1777_v54 = vld [vmem:[%s2204_s11 + $0x20] ss:$8 sps:$4 sm:$0xff]  }
 0x4b5   : > { %1696 = vmatpush3.bf16.msra.mxu1 %v822_v55  ;;  %1697 = vmatprep.mubr.msk.bf16.mxu1 %vm1837_vm4, %v1836_v32  ;;  %v1780_v55 = vld [vmem:[%s2204_s11 + $0x30] ss:$8 sps:$4 sm:$0xff]  }
 0x4b6   : > { %1707 = vmatprep.subr.bf16.mxu1 %v1836_v32  ;;  %v814_v57 = vpack.c.bf16 %v813_v56, %v813_v56  ;;  %v1782_v56 = vld [vmem:[%s2204_s11 + $0x34] ss:$8 sps:$4 sm:$0xff]  }
 0x4b8   : > { %v1032_v50 = vpop.xlane.xlu0 %1031 }
 0x4bc   : > { %v927_v58 = vpop.permute.xlu0 %926  ;;  %1698 = vmatmul.mubr.msk.bf16.vlgmr.msra.gmra.mrb[12].mxu1 %vm691_vm7, %v814_v57 }
 0x4bd   : > { %v932_v59 = vsel %vm708_vm6, %v927_v58, 0  ;;  %1709 = vmatprep.mubr.msk.bf16.mxu1 %vm1837_vm4, %v1836_v32 }
 0x4be   : > { %1708 = vmatpush3.bf16.msra.mxu1 %v932_v59 }
 0x4bf   : > { %1719 = vmatprep.subr.bf16.mxu1 %v1836_v32 }
 0x4d9   : > { %v922_v60 = vpop.xlane.xlu1 %921 }
 0x4da   : > { %1813 = vrcp.f32 %v922_v60  ;;  %v1602_v60 = vld [vmem:[%s2202_s9] ss:$0 sm:$0xff] }
 0x4db   : > { %1815 = vrcp.f32 %v1032_v50 }
 0x4dd   : > { %v1037_v63 = vpop.permute.xlu1 %1036 }
 0x4de   : > { %v1042_v3 = vsel %vm708_vm6, %v1037_v63, 0 }
 0x4e4   : > { %v1814_v61 = vpop.eup %1813 }
 0x4e5   : > { %v924_v62 = vmul.f32 %v1814_v61, %v1808_v45  ;;  %v1816_v1 = vpop.eup %1815 }
 0x4e6   : > { %v1034_v4 = vmul.f32 %v1816_v1, %v1806_v39 }
 0x4e7   : > { %v925_v0 = vpack.c.bf16 %v924_v62, %v924_v62  ;;  %v1603_v62 = vld [vmem:[%s2203_s10] ss:$0 sm:$0xff] }
 0x4e8   : > { %v1035_v5 = vpack.c.bf16 %v1034_v4, %v1034_v4  ;;  %v1784_v4 = vld [vmem:[%s2206_s13] sm:$0xff]  }
 0x4e9   : > { %1710 = vmatmul.mubr.msk.bf16.vlgmr.msra.gmra.mrb[16].mxu1 %vm691_vm7, %v925_v0 }
 0x4ea   : > { %1720 = vmatpush3.bf16.msra.mxu1 %v1042_v3  ;;  %1721 = vmatprep.mubr.msk.bf16.mxu1 %vm1837_vm4, %v1836_v32  ;;  %v1783_v3 = vld [vmem:[%s2206_s13 + $0x40] sm:$0xff]  }
 0x4f1   : > { %1722 = vmatmul.mubr.msk.bf16.vlgmr.msra.gmra.mrb[20].mxu1 %vm691_vm7, %v1035_v5  ;;  %v1785_v5 = vld [vmem:[%s2206_s13 + $0x48] sm:$0xff]  }
 0x4f2   : > { %1311 = vmatprep.mubr.bf16.mxu1 %v1835_v17  ;;  %v1768_v17 = vld [vmem:[%s2200_s7 + $0x8] sm:$0xff]  }
 0x4f3   : > { %1728 = vmatpush3.bf16.msra.mxu0 %v1768_v17  ;;  %v1795_v17 = vld [vmem:[%s2206_s13 + $0x70] sm:$0xff]  }
 0x4f4   : > { %1729 = vmatprep.subr.bf16.mxu0 %v1836_v32 }
 0x4f7   : > { %1730 = vmatpush3.bf16.msra.mxu0 %v1769_v16  ;;  %v1796_v16 = vld [vmem:[%s2206_s13 + $0x30] sm:$0xff]  }
 0x4f8   : > { %1731 = vmatprep.subr.bf16.mxu0 %v1836_v32 }
 0x4fb   : > { %1732 = vmatpush3.bf16.msra.mxu0 %v1770_v18  ;;  %v1797_v18 = vld [vmem:[%s2206_s13 + $0x78] sm:$0xff]  }
 0x4fc   : > { %1655 = vmatprep.subr.bf16.mxu0 %v1783_v3 }
 0x587   : > { %v746_v8 = vpop.f32.mrb[8].mxu1 }
 0x588   : > { %v1687_v9 = vpop.f32.mrb[9].mxu1 }
 0x589   : > { %v749_v10 = vpop.f32.mrb[10].mxu1  ;;  %v1788_v9 = vld [vmem:[%s2206_s13 + $0x10] sm:$0xff]  }
 0x58a   : > { %v1688_v11 = vpop.f32.mrb[11].mxu1  ;;  %v1789_v10 = vld [vmem:[%s2206_s13 + $0x58] sm:$0xff]  }
 0x58b   : > { %v1790_v11 = vld [vmem:[%s2206_s13 + $0x18] sm:$0xff]  }
 0x58f   : > { %v858_v12 = vpop.f32.mrb[12].mxu1 }
 0x590   : > { %1085 = vrot.lane.b32.xlu1 %v858_v12, %s1843_s29  ;;  %v1699_v13 = vpop.f32.mrb[13].mxu1  ;;  %v1791_v12 = vld [vmem:[%s2206_s13 + $0x60] sm:$0xff]  }
 0x591   : > { %v861_v14 = vpop.f32.mrb[14].mxu1  ;;  %v1792_v13 = vld [vmem:[%s2206_s13 + $0x20] sm:$0xff]  }
 0x592   : > { %v1700_v15 = vpop.f32.mrb[15].mxu1  ;;  %v1793_v14 = vld [vmem:[%s2206_s13 + $0x68] sm:$0xff]  }
 0x593   : > { %v1794_v15 = vld [vmem:[%s2206_s13 + $0x28] sm:$0xff]  }
 0x5bc   : > { %v968_v19 = vpop.f32.mrb[16].mxu1 }
 0x5bd   : > { %1089 = vrot.lane.b32.xlu0 %v968_v19, %s1841_s27  ;;  %v1711_v20 = vpop.f32.mrb[17].mxu1  ;;  %v1798_v19 = vld [vmem:[%s2206_s13 + $0x38] sm:$0xff]   ;;  %s489_s27 = scalar_lea.vmem %s2208_s15, %s1575_s22 }
 0x5be   : > { %v971_v21 = vpop.f32.mrb[18].mxu1  ;;  %v1224_v20 = vld [vmem:[%s2205_s12] sm:$0x3] }
 0x5bf   : > { %v1712_v22 = vpop.f32.mrb[19].mxu1  ;;  %v1229_v21 = vrot.slane %v1224_v20, %v545_v33 }
 0x5c0   : > { %v1233_v22 = vrot.slane %v1224_v20, %v549_v44 }
 0x5c4   : > { %v1078_v23 = vpop.f32.mrb[20].mxu1 }
 0x5c5   : > { %1093 = vrot.lane.b32.xlu1 %v1078_v23, %s1840_s26  ;;  %v1723_v24 = vpop.f32.mrb[21].mxu1 }
 0x5c6   : > { %v1081_v25 = vpop.f32.mrb[22].mxu1 }
 0x5c7   : > { %v1724_v26 = vpop.f32.mrb[23].mxu1 }
 0x602   : > { %v1086_v27 = vpop.permute.xlu1 %1085 }
 0x603   : > { %v1096_v28 = vsel %vm644_vm5, %v746_v8, %v1086_v27  ;;  %v1787_v8 = vld [vmem:[%s2206_s13 + $0x50] sm:$0xff]  }
 0x62f   : > { %v1090_v32 = vpop.permute.xlu0 %1089 }
 0x630   : > { %v1098_v29 = vsel %vm1097_vm8, %v1096_v28, %v1090_v32 }
 0x637   : > { %v1094_v30 = vpop.permute.xlu1 %1093 }
 0x638   : > { %v1100_v31 = vsel %vm1099_vm9, %v1098_v29, %v1094_v30 }
 0x639   : > { %v1109_v34 = vpack.c.bf16 %v1100_v31, %v1100_v31 }
 0x63b   : > { %1734 = vmatmul.mubr.msk.bf16.vlgmr.msra.gmra.mrb[12].mxu0 %vm503_vm3, %v1109_v34 }
 0x63c   : > { %1656 = vmatpush3.bf16.msra.mxu0 %v1784_v4 }
 0x63d   : > { %1657 = vmatprep.subr.bf16.mxu0 %v1785_v5 }
 0x640   : > { %1658 = vmatpush3.bf16.msra.mxu0 %v1786_v7 }
 0x641   : > { %1659 = vmatprep.subr.bf16.mxu0 %v1787_v8 }
 0x644   : > { %1660 = vmatpush3.bf16.msra.mxu0 %v1788_v9 }
 0x645   : > { %1661 = vmatprep.subr.bf16.mxu0 %v1789_v10 }
 0x648   : > { %1662 = vmatpush3.bf16.msra.mxu0 %v1790_v11 }
 0x649   : > { %1663 = vmatprep.subr.bf16.mxu0 %v1791_v12 }
 0x64c   : > { %1664 = vmatpush3.bf16.msra.mxu0 %v1792_v13 }
 0x64d   : > { %1665 = vmatprep.subr.bf16.mxu0 %v1793_v14 }
 0x650   : > { %1666 = vmatpush3.bf16.msra.mxu0 %v1794_v15 }
 0x651   : > { %1667 = vmatprep.subr.bf16.mxu0 %v1795_v17 }
 0x654   : > { %1668 = vmatpush3.bf16.msra.mxu0 %v1796_v16 }
 0x655   : > { %1669 = vmatprep.subr.bf16.mxu0 %v1797_v18 }
 0x658   : > { %1670 = vmatpush3.bf16.msra.mxu0 %v1798_v19 }
 0x70e   : > { %v1171_v35 = vpop.f32.mrb[12].mxu0 }
 0x70f   : > { %v1177_v37 = vadd.f32 %v1171_v35, %v1948_v6  ;;  %v1735_v38 = vpop.f32.mrb[13].mxu0  ;;  %v1773_v6 = vld [vmem:[%s2204_s11 + $0x4] ss:$8 sps:$4 sm:$0xff]  }
 0x710   : > { %v1174_v39 = vpop.f32.mrb[14].mxu0  ;;  %1279 = vmatprep.subr.bf16.mxu1 %v1773_v6 }
 0x711   : > { %v2089_v40 = vadd.f32 %v1601_v36, %v1177_v37  ;;  %v1736_v41 = vpop.f32.mrb[15].mxu0  ;;  %1280 = vmatpush1.bf16.msra.mxu1 %v1771_v49 }
 0x712   : > { %1281 = vmatprep.subr.bf16.mxu1 %v1776_v51 }
 0x713   : > { %v1188_v42 = vsel %vm503_vm3, %v2089_v40, 0.0 }
 0x714   : > { %1189 = vadd.xlane.f32.xlu0 %v1188_v42 }
 0x715   : > { %1282 = vmatpush1.bf16.msra.mxu1 %v1774_v52 }
 0x716   : > { %1283 = vmatprep.subr.bf16.mxu1 %v1779_v53 }
 0x719   : > { %1284 = vmatpush1.bf16.msra.mxu1 %v1777_v54 }
 0x71a   : > { %1285 = vmatprep.subr.bf16.mxu1 %v1782_v56 }
 0x71d   : > { %1286 = vmatpush1.bf16.msra.mxu1 %v1780_v55 }
 0x7a1   : > { %v1190_v43 = vpop.xlane.xlu0 %1189 }
 0x7a2   : > { %v1191_v45 = vmul.f32 0.015625, %v1190_v43  ;;  %v1615_v43 = vld [vmem:[%s2207_s14] ss:$0 sm:$0xff] }
 0x7a4   : > { %v1192_v46 = vsub.f32 %v2089_v40, %v1191_v45 }
 0x7a6   : > { %v1193_v47 = vmul.f32 %v1192_v46, %v1192_v46 }
 0x7a8   : > { %v1194_v48 = vsel %vm503_vm3, %v1193_v47, 0.0 }
 0x7a9   : > { %1195 = vadd.xlane.f32.xlu1 %v1194_v48 }
 0x836   : > { %v1196_v50 = vpop.xlane.xlu1 %1195 }
 0x837   : > { %v1197_v57 = vmul.f32 0.015625, %v1196_v50 }
 0x839   : > { %v1198_v58 = vadd.f32 1e-05, %v1197_v57 }
 0x83b   : > { %1817 = vrsqrt.f32 %v1198_v58 }
 0x845   : > { %v1818_v59 = vpop.eup %1817 }
 0x846   : > { %v1200_v61 = vmul.f32 %v1818_v59, %v1192_v46 }
 0x848   : > { %v1207_v63 = vmul.f32 %v1602_v60, %v1200_v61 }
 0x84a   : > { %v1214_v0 = vadd.f32 %v1603_v62, %v1207_v63 }
 0x84c   : > { %v1223_v1 = vpack.c.bf16 %v1214_v0, %v1214_v0 }
 0x84e   : > { %1612 = vmatmul.mubr.msk.bf16.vlgmr.msra.gmra.mrb[24].mxu1 %vm503_vm3, %v1223_v1 }
 0x921   : > { %v1313_v23 = vpop.f32.mrb[24].mxu1 }
 0x922   : > { %v1314_v24 = vadd.f32 %v1313_v23, %v1229_v21  ;;  %v1315_v25 = vpop.f32.mrb[25].mxu1 }
 0x923   : > { %v1316_v26 = vadd.f32 %v1315_v25, %v1233_v22  ;;  %v1317_v27 = vpop.f32.mrb[26].mxu1 }
 0x924   : > { %v1613_v32 = vmul.f32 -1.702, %v1314_v24  ;;  %v1318_v28 = vpop.f32.mrb[27].mxu1 }
 0x925   : > { %v1614_v29 = vmul.f32 -1.702, %v1316_v26 }
 0x926   : > { %v1324_v30 = vmul.f32 1.442695, %v1613_v32 }
 0x927   : > { %v1326_v31 = vmul.f32 1.442695, %v1614_v29 }
 0x928   : > { %1819 = vpow2.f32 %v1324_v30 }
 0x929   : > { %1821 = vpow2.f32 %v1326_v31 }
 0x932   : > { %v1820_v34 = vpop.eup %1819 }
 0x933   : > { %v1822_v35 = vpop.eup %1821  ;;  %v1328_v36 = vadd.f32 1.0, %v1820_v34 }
 0x934   : > { %v1329_v37 = vadd.f32 1.0, %v1822_v35 }
 0x935   : > { %1823 = vrcp.f32 %v1328_v36 }
 0x936   : > { %1825 = vrcp.f32 %v1329_v37 }
 0x93f   : > { %v1824_v2 = vpop.eup %1823 }
 0x940   : > { %v1826_v33 = vpop.eup %1825  ;;  %v1334_v44 = vmul.f32 %v1824_v2, %v1314_v24 }
 0x941   : > { %v1335_v38 = vmul.f32 %v1826_v33, %v1316_v26 }
 0x942   : > { %v1368_v41 = vpack.c.bf16 %v1334_v44, %v1334_v44 }
 0x943   : > { %v1369_v39 = vpack.c.bf16 %v1335_v38, %v1335_v38 }
 0x945   : > { %1505 = vmatprep.mubr.bf16.mxu0 %v1369_v39 }
 0x946   : > { %1506 = vmatmul.mubr.bf16.vlgmr.msra.gmra.mrb[16].mxu0 %v1368_v41 }
 0xa19   : > { %v1671_v42 = vpop.f32.mrb[16].mxu0 }
 0xa1a   : > { %v1672_v45 = vpop.f32.mrb[17].mxu0 }
 0xa1b   : > { %v1673_v46 = vadd.f32 %v1672_v45, %v1671_v42  ;;  %v1674_v47 = vpop.f32.mrb[18].mxu0 }
 0xa1c   : > { %v1675_v48 = vpop.f32.mrb[19].mxu0 }
 0xa1d   : > { %v1508_v6 = vadd.f32 %v1673_v46, %v1615_v43 }
 0xa1f   : > { %v1513_v49 = vadd.f32 %v1508_v6, %v2089_v40 }
 0xa21   : > { %v1514_v51 = vpack.c.bf16 %v1513_v49, %v1513_v49 }
 0xa23   : > { %1516 = vst.msk [vmem:[%s489_s27] sm:$0xf] %vm1515_vm10, %v1514_v51 }
 0xa24 PF: > { %s25_s18 = sadd.s32 1, %s1833_s18  }
 0xa25   : > { %p22_p4 = scmp.ge.s32.totalorder %s25_s18, 5  }
 0xa27   :  { %24 = sbr.rel (!%p22_p4) target bundleno = 1 (0x1), region = 110 }

// kernel: _lambda_.14
= control target key start
LH: loop header
LB: loop body
LE: loop exit
PB: predicated region body
PF: predicated region fallthrough
CT: control target
= control target key end

     0   :  { %vm22_vm0 = vcmask 518144   ;;  %v174_v9 = vmov 0.0   ;;  %vm175_vm1 = vmmov 0   ;;  %vm84_vm2 = vcmask 523264   ;;  %s229_s0 = inlined_call_operand.vmem [shape: bf16[3,64], index: 0, kind: input, shape index: {}]   ;;  %s230_s3 = inlined_call_operand.vmem [shape: bf16[64,64], index: 3, kind: input, shape index: {}]   ;;  %s231_s1 = inlined_call_operand.vmem [shape: f32[1,64], index: 1, kind: input, shape index: {}]   ;;  %s232_s2 = inlined_call_operand.vmem [shape: f32[1,64], index: 2, kind: input, shape index: {}]   ;;  %s233_s4 = inlined_call_operand.vmem [shape: f32[3,64], index: 4, kind: output, shape index: {}]  }
   0x1   :  { %v18_v0 = vld [vmem:[%s229_s0] sm:$0x3]  ;;  %152 = vmatprep.subr.bf16.mxu0 %v174_v9  ;;  %v167_v10 = vld [vmem:[%s230_s3 + $0x8] sm:$0xff]   ;;  %v168_v11 = vld [vmem:[%s230_s3 + $0x10] sm:$0xff]   ;;  %160 = vmatprep.mubr.msk.bf16.mxu0 %vm175_vm1, %v174_v9 }
   0x2   :  { %v19_v1 = vunpack.c.l.bf16 %v18_v0  ;;  %v166_v8 = vld [vmem:[%s230_s3] sm:$0xff]   ;;  %v169_v12 = vld [vmem:[%s230_s3 + $0x18] sm:$0xff]  }
   0x3   :  { %153 = vmatpush3.bf16.msra.mxu0 %v166_v8  ;;  %v140_v17 = vld [vmem:[%s231_s1] ss:$0 sm:$0xff] }
   0x4   :  { %v23_v2 = vsel %vm22_vm0, %v19_v1, 0.0  ;;  %154 = vmatprep.subr.bf16.mxu0 %v174_v9  ;;  %v141_v19 = vld [vmem:[%s232_s2] ss:$0 sm:$0xff] }
   0x5   :  { %24 = vadd.xlane.f32.xlu0 %v23_v2 }
   0x7   :  { %155 = vmatpush3.bf16.msra.mxu0 %v167_v10 }
   0x8   :  { %156 = vmatprep.subr.bf16.mxu0 %v174_v9 }
   0xb   :  { %157 = vmatpush3.bf16.msra.mxu0 %v168_v11 }
   0xc   :  { %158 = vmatprep.subr.bf16.mxu0 %v174_v9 }
   0xf   :  { %159 = vmatpush3.bf16.msra.mxu0 %v169_v12 }
  0x92   :  { %v25_v3 = vpop.xlane.xlu0 %24 }
  0x93   :  { %v27_v4 = vmul.f32 0.015625, %v25_v3 }
  0x95   :  { %v28_v5 = vsub.f32 %v19_v1, %v27_v4 }
  0x97   :  { %v29_v6 = vmul.f32 %v28_v5, %v28_v5 }
  0x99   :  { %v30_v7 = vsel %vm22_vm0, %v29_v6, 0.0 }
  0x9a   :  { %31 = vadd.xlane.f32.xlu0 %v30_v7 }
 0x127   :  { %v32_v13 = vpop.xlane.xlu0 %31 }
 0x128   :  { %v33_v14 = vmul.f32 0.015625, %v32_v13 }
 0x12a   :  { %v34_v15 = vadd.f32 1e-05, %v33_v14 }
 0x12c   :  { %170 = vrsqrt.f32 %v34_v15 }
 0x136   :  { %v171_v16 = vpop.eup %170 }
 0x137   :  { %v36_v18 = vmul.f32 %v171_v16, %v28_v5 }
 0x139   :  { %v43_v20 = vmul.f32 %v140_v17, %v36_v18 }
 0x13b   :  { %v50_v21 = vadd.f32 %v141_v19, %v43_v20 }
 0x13d   :  { %v59_v22 = vpack.c.bf16 %v50_v21, %v50_v21 }
 0x13f   :  { %161 = vmatmul.mubr.msk.bf16.vlgmr.msra.gmra.mrb[0].mxu0 %vm84_vm2, %v59_v22 }
 0x212   :  { %v122_v23 = vpop.f32.mrb[0].mxu0 }
 0x213   :  { %v162_v24 = vpop.f32.mrb[1].mxu0  ;;  %v128_v25 = vmul.f32 %v122_v23, %v122_v23 }
 0x214   :  { %v125_v26 = vpop.f32.mrb[2].mxu0 }
 0x215   :  { %v163_v27 = vpop.f32.mrb[3].mxu0  ;;  %v129_v28 = vsel %vm22_vm0, %v128_v25, 0.0 }
 0x216   :  { %130 = vadd.xlane.f32.xlu1 %v129_v28 }
 0x2a3   :  { %v131_v29 = vpop.xlane.xlu1 %130 }
 0x2a4   :  { %v132_v30 = vadd.f32 1e-12, %v131_v29 }
 0x2a6   :  { %172 = vrsqrt.f32 %v132_v30 }
 0x2b0   :  { %v173_v31 = vpop.eup %172 }
 0x2b1   :  { %v134_v32 = vmul.f32 %v173_v31, %v122_v23 }
 0x2b3   :  { %135 = vst.msk [vmem:[%s233_s4] sm:$0x7] %vm22_vm0, %v134_v32 }

// kernel: _lambda_.19
= control target key start
LH: loop header
LB: loop body
LE: loop exit
PB: predicated region body
PF: predicated region fallthrough
CT: control target
= control target key end

     0   :  { %vm15_vm0 = vcmask 523264   ;;  %v115_v1 = vmov 0.0   ;;  %vm116_vm1 = vmmov 0   ;;  %s151_s0 = inlined_call_operand.vmem [shape: bf16[2,64], index: 0, kind: input, shape index: {}]   ;;  %s152_s1 = inlined_call_operand.vmem [shape: bf16[3,64], index: 1, kind: input, shape index: {}]   ;;  %s153_s2 = inlined_call_operand.hbm [shape: f32[2,3], index: 2, kind: output, shape index: {}]  }
   0x1   :  { %v14_v0 = vld [vmem:[%s152_s1] sm:$0x3]  ;;  %82 = vmatprep.subr.bf16.mxu0 %v115_v1  ;;  %84 = vmatprep.mubr.msk.bf16.mxu0 %vm116_vm1, %v115_v1 }
   0x2   :  { %v20_v2 = vsel %vm15_vm0, %v14_v0, 0 }
   0x3   :  { %7 = vsyncpa [#allocation3], 0  ;;  %83 = vmatpush3.bf16.xpose.msra.mxu0 %v20_v2  ;;  %v13_v3 = vld [vmem:[%s151_s0] sm:$0x1]  ;;  %s117_s13 = smov [#allocation2]   ;;  %vm63_vm2 = vcmask 17408  }
   0x4   :  { %s71_s14 = sshll.u32 %s117_s13, 4  ;;  %s72_s14 = int_to_ptr.vmem [resolvable:$true] %s71_s14 }
   0x5   :  { %s91_s1 = scalar_lea.vmem %s72_s14, 32  ;;  %p96_p1 = scmp.lt.s32.totalorder %s72_s14, %s72_s14 }
   0x6   :  { %p92_p0 = scmp.ne.s32.totalorder %s72_s14, %s91_s1  ;;  %p97_p2 = scmp.lt.s32.totalorder %s91_s1, %s91_s1 }
   0x8   :  { %p98_p3 = por %p97_p2, %p96_p1 }
   0xa   :  { %85 = vmatmul.mubr.msk.bf16.vlgmr.msra.gmra.mrb[0].mxu0 %vm15_vm0, %v13_v3  ;;  %p99_p4 = pnand %p98_p3, %p92_p0 }
  0xdd   :  { %v56_v4 = vpop.f32.mrb[0].mxu0 }
  0xde   :  { %v62_v5 = vmul.f32 14.285714, %v56_v4  ;;  %v86_v6 = vpop.f32.mrb[1].mxu0 }
  0xdf   :  { %v59_v7 = vpop.f32.mrb[2].mxu0 }
  0xe0   :  { %v87_v8 = vpop.f32.mrb[3].mxu0  ;;  %64 = vst.msk [vmem:[#allocation2] sm:$0x3] %vm63_vm2, %v62_v5 }
  0xe1   :  { %102 = shalt.err (!%p99_p4)
}
  0xe2   :  { %s103_s16 = scalar_lea.hbm %s153_s2, 32 }
  0xe3   :  { %p104_p5 = scmp.ne.s32.totalorder %s153_s2, %s103_s16  ;;  %p107_p6 = scmp.lt.u32.totalorder %s103_s16, %s153_s2 }
  0xe5   :  { %p109_p7 = pnand %p107_p6, %p104_p5 }
  0xe7   :  { %112 = shalt.err (!%p109_p7)
}
  0xe8   :  { %74 = dma.vmem_to_hbm [thread:$0]  %s72_s14, 32, %s153_s2, [#allocation3]  }
  0xe9   :  { %113 = dma.done.wait [#allocation3], 32  }
  0xea   :  { %114 = vsyncadd [#allocation3], 4294967264 }
  0xeb   :  { %78 = vsyncpa [#allocation3], 1 }

</bundles_post_ra>
